<compile_context>
chip_gen: v6e
topology: v6e:2x2x1
jax: 0.10.0
libtpu: 0.0.40
codegen_flags: <defaults>
</compile_context>

<pallas_src>
import numpy as np
import jax
import jax.numpy as jnp
from jax.experimental import pallas as pl
from jax.experimental.pallas import tpu as pltpu

# Keep reference & in-kernel f32 matmuls at full f32 precision so they agree.
jax.config.update("jax_default_matmul_precision", "highest")

# ---- sizes fixed by the module & packed TimeEmbed-slab layout ---------------
_TE_DIM = 20                       # TimeEmbed sinusoid / hidden width (module hard-codes 20)
_S_PAD = 16                        # timestep rows padded to a sublane multiple (needs n_steps+1 <= 16)
_ROW_SIN = 0                       # sinusoid table           rows [0, 16)
_ROW_HW = _S_PAD                   # combined hidden weight   rows [16, 56)
_ROW_HB = _ROW_HW + 2 * _TE_DIM    # combined hidden bias     row   56
_ROW_OW = 64                       # block-diag out weight    rows [64, 104)
_ROW_OB = _ROW_OW + 2 * _TE_DIM    # combined out bias        row   104
_TE_ROWS = 112
_TE_COLS = 2 * _TE_DIM             # 40  (te1 | te2 hidden units side by side)


def _swish(v):
    # numerically stable v * sigmoid(v): exp only of non-positive arguments
    e = jnp.exp(-jnp.abs(v))
    return v * (jnp.where(v >= 0, 1.0, e) / (1.0 + e))


# -----------------------------------------------------------------------------
# Pallas kernel: entire Denoiser.forward for one batch tile
# -----------------------------------------------------------------------------
def denoiser_kernel(t_ref, z_ref, c_ref, ac_ref,
                    te_ref, item_ref, big_ref, mix_ref, out_ref):
    f32 = jnp.float32
    tb, n_items = z_ref.shape
    E = item_ref.shape[1]

    # ---- t_embed1 & t_embed2: two TimeEmbed(20->20->1) MLPs, run as one pass.
    # Sinusoid row gather == one-hot matmul against the in-VMEM table.
    t_idx = t_ref[...]                                               # (tb, 1) int32
    steps = jax.lax.broadcasted_iota(jnp.int32, (tb, _S_PAD), 1)
    onehot = (steps == t_idx).astype(f32)                            # (tb, 16)
    emb = jnp.dot(onehot, te_ref[_ROW_SIN:_ROW_SIN + _S_PAD, :],
                  preferred_element_type=f32)                        # (tb, 40)
    h = (jnp.dot(emb, te_ref[_ROW_HW:_ROW_HW + _TE_COLS, :],
                 preferred_element_type=f32)
         + te_ref[_ROW_HB:_ROW_HB + 1, :])                           # (tb, 40)
    h = _swish(h)
    te = (jnp.dot(h, te_ref[_ROW_OW:_ROW_OW + _TE_COLS, :],
                  preferred_element_type=f32)
          + te_ref[_ROW_OB:_ROW_OB + 1, :])                          # (tb, 40)
    te1 = te[:, 0:1]                                                 # (tb, 1)
    te2 = te[:, 1:2]                                                 # (tb, 1)

    # ---- item-embedding projections -----------------------------------------
    z = z_ref[...]
    c = c_ref[...]
    ac = ac_ref[...]
    item = item_ref[...]                                             # (n_items, E)
    z_emb = jnp.dot(z * (1.0 / n_items), item, preferred_element_type=f32)
    c_norm = jnp.maximum(jnp.sum(jnp.abs(c), axis=-1, keepdims=True), 1.0)  # L1
    c_emb = jnp.dot(c / c_norm, item, preferred_element_type=f32)    # (tb, E)

    # ---- embed_mixer = SimpleMixer(3): fused scalar-weighted elementwise -----
    # mix_ref (SMEM, 41 f32): [0:9] hidden W(3,3), [9:12] hidden b,
    #   [12:15] out W(1,3), [15] out b, [16:32] score hidden W(4,4),
    #   [32:36] score hidden b, [36:40] score out W(1,4), [40] score out b.
    x_embed = jnp.zeros((tb, E), f32) + mix_ref[15]
    for j in range(3):
        hj = (mix_ref[3 * j + 0] * z_emb
              + mix_ref[3 * j + 1] * c_emb
              + mix_ref[3 * j + 2] * te1            # t_embed1.repeat(1, E)
              + mix_ref[9 + j])
        x_embed = x_embed + mix_ref[12 + j] * _swish(hj)             # (tb, E)

    # ---- x_mid = x_embed @ item_embed.T (pre-transposed slab rows [0, E)) ----
    x_mid = jnp.dot(x_embed, big_ref[0:E, :], preferred_element_type=f32)

    # ---- score_mixer.t_embed2_proj(t_embed2.repeat(1, E)) --------------------
    te2_full = jnp.broadcast_to(te2, (tb, E))
    t_proj = (jnp.dot(te2_full, big_ref[E:2 * E, :], preferred_element_type=f32)
              + big_ref[2 * E:2 * E + 1, :])                         # (tb, n_items)

    # ---- score_mixer = ScoreMixer(4): fused scalar-weighted elementwise ------
    out = jnp.zeros((tb, n_items), f32) + mix_ref[40]
    for j in range(4):
        hj = (mix_ref[16 + 4 * j + 0] * x_mid
              + mix_ref[16 + 4 * j + 1] * c
              + mix_ref[16 + 4 * j + 2] * ac
              + mix_ref[16 + 4 * j + 3] * t_proj
              + mix_ref[32 + j])
        out = out + mix_ref[36 + j] * _swish(hj)

    out_ref[...] = out


# -----------------------------------------------------------------------------
# Wrapper
# -----------------------------------------------------------------------------
def denoiser_forward(z_t, c, Ac, t, packed, *, tb=None):
    """z_t, c, Ac: (B, n_items) f32;  t: (B,) or (B,1) int timesteps."""
    B, n_items = z_t.shape
    E = packed["item_embed"].shape[1]
    assert packed["big_slab"].shape == (2 * E + 8, n_items)

    if tb is None:
        if B % 16 == 0 and B // 2 <= 1024:
            tb = B // 2          # 2 parallel grid steps -> both v7x TensorCores
        elif B % 1024 == 0:
            tb = 1024            # large-B case: big lane/sublane-aligned tiles
        else:
            tb = B               # single grid step: zero pipeline bookkeeping
    assert B % tb == 0 and (tb % 8 == 0 or tb == B)

    t2 = jnp.asarray(t, jnp.int32).reshape(B, 1)

    def batched(w):
        return pl.BlockSpec((tb, w), lambda i: (i, 0))

    def full2d(a):
        return pl.BlockSpec(a.shape, lambda i: (0, 0))

    grid_spec = pltpu.PrefetchScalarGridSpec(
        num_scalar_prefetch=0,
        grid=(B // tb,),
        in_specs=[
            batched(1),                       # t (B, 1) int32
            batched(n_items),                 # z_t
            batched(n_items),                 # c
            batched(n_items),                 # Ac
            full2d(packed["te_slab"]),        # TimeEmbed slab (112, 40)
            full2d(packed["item_embed"]),     # item embedding (n_items, E)
            full2d(packed["big_slab"]),       # [item^T ; Wproj^T ; b] (2E+8, n_items)
            pl.BlockSpec(memory_space=pltpu.MemorySpace.SMEM),   # 41 mixer scalars
        ],
        out_specs=batched(n_items),
    )

    return pl.pallas_call(
        denoiser_kernel,
        out_shape=jax.ShapeDtypeStruct((B, n_items), jnp.float32),
        grid_spec=grid_spec,
        compiler_params=pltpu.CompilerParams(
            dimension_semantics=("parallel",)),
    )(t2, z_t, c, Ac,
      packed["te_slab"], packed["item_embed"], packed["big_slab"], packed["mix"])


# -----------------------------------------------------------------------------
# Parameter construction & packing (mirrors nn.Module __init__ shapes)
# -----------------------------------------------------------------------------
def make_sinusoids(embed_dim, n_steps, max_wavelength=10000.0):
    assert embed_dim % 2 == 0
    timescales = np.power(max_wavelength, -np.arange(0, embed_dim, 2) / embed_dim)
    timesteps = np.arange(n_steps + 1)
    angles = timesteps[:, None] * timescales[None, :]
    return jnp.asarray(
        np.concatenate([np.sin(angles), np.cos(angles)], axis=-1), jnp.float32)


def make_params(key, n_items, embed_dim):
    ks = jax.random.split(key, 12)

    def lin(k, dout, din, scale=0.1):
        kw, kb = jax.random.split(k)
        w = scale * jax.random.normal(kw, (dout, din), jnp.float32)   # PyTorch [out, in]
        b = scale * jax.random.normal(kb, (dout,), jnp.float32)
        return w, b

    te1_hw, te1_hb = lin(ks[0], _TE_DIM, _TE_DIM)
    te1_ow, te1_ob = lin(ks[1], 1, _TE_DIM)
    te2_hw, te2_hb = lin(ks[2], _TE_DIM, _TE_DIM)
    te2_ow, te2_ob = lin(ks[3], 1, _TE_DIM)
    em_hw, em_hb = lin(ks[4], 3, 3)
    em_ow, em_ob = lin(ks[5], 1, 3)
    sm_hw, sm_hb = lin(ks[6], 4, 4)
    sm_ow, sm_ob = lin(ks[7], 1, 4)
    sm_proj_w, sm_proj_b = lin(ks[8], n_items, embed_dim)
    item_embed = jax.random.normal(ks[9], (n_items, embed_dim), jnp.float32)
    return dict(item_embed=item_embed,
                te1_hw=te1_hw, te1_hb=te1_hb, te1_ow=te1_ow, te1_ob=te1_ob,
                te2_hw=te2_hw, te2_hb=te2_hb, te2_ow=te2_ow, te2_ob=te2_ob,
                em_hw=em_hw, em_hb=em_hb, em_ow=em_ow, em_ob=em_ob,
                sm_hw=sm_hw, sm_hb=sm_hb, sm_ow=sm_ow, sm_ob=sm_ob,
                sm_proj_w=sm_proj_w, sm_proj_b=sm_proj_b)


def pack_params(raw, sinusoids):
    """Pack the many tiny operands into 2 VMEM slabs + 1 SMEM scalar vector."""
    n_items, E = raw["item_embed"].shape
    assert E % 8 == 0, "embed_dim must be a sublane multiple"
    S = sinusoids.shape[0]
    assert S <= _S_PAD and sinusoids.shape[1] == _TE_DIM

    # -- TimeEmbed slab: both TimeEmbeds combined into a width-40 hidden layer.
    hw = jnp.concatenate([raw["te1_hw"].T, raw["te2_hw"].T], axis=1)    # (20, 40)
    hb = jnp.concatenate([raw["te1_hb"], raw["te2_hb"]])                # (40,)
    ow = jnp.zeros((_TE_COLS, 2), jnp.float32)                          # block-diag out weight
    ow = ow.at[:_TE_DIM, 0].set(raw["te1_ow"][0])
    ow = ow.at[_TE_DIM:, 1].set(raw["te2_ow"][0])
    ob = jnp.concatenate([raw["te1_ob"], raw["te2_ob"]])                # (2,)

    te_slab = jnp.zeros((_TE_ROWS, _TE_COLS), jnp.float32)
    te_slab = te_slab.at[_ROW_SIN:_ROW_SIN + S, :_TE_DIM].set(sinusoids)
    te_slab = te_slab.at[_ROW_HW:_ROW_HW + _TE_DIM, :].set(hw)
    te_slab = te_slab.at[_ROW_HB, :].set(hb)
    te_slab = te_slab.at[_ROW_OW:_ROW_OW + _TE_COLS, :2].set(ow)
    te_slab = te_slab.at[_ROW_OB, :2].set(ob)

    # -- Big slab: item_embed^T | t_embed2_proj.weight^T | t_embed2_proj.bias.
    big = jnp.zeros((2 * E + 8, n_items), jnp.float32)
    big = big.at[0:E, :].set(raw["item_embed"].T)
    big = big.at[E:2 * E, :].set(raw["sm_proj_w"].T)
    big = big.at[2 * E, :].set(raw["sm_proj_b"])

    # -- Mixer scalars (SimpleMixer(3) + ScoreMixer(4)) -> SMEM.
    mix = jnp.concatenate([
        raw["em_hw"].reshape(-1), raw["em_hb"].reshape(-1),
        raw["em_ow"].reshape(-1), raw["em_ob"].reshape(-1),
        raw["sm_hw"].reshape(-1), raw["sm_hb"].reshape(-1),
        raw["sm_ow"].reshape(-1), raw["sm_ob"].reshape(-1),
    ]).astype(jnp.float32)
    assert mix.shape == (41,)

    return dict(te_slab=te_slab, item_embed=raw["item_embed"],
                big_slab=big, mix=mix)


# -----------------------------------------------------------------------------
# Pure-JAX reference (mirrors the PyTorch forward, default config)
# -----------------------------------------------------------------------------
def reference_forward(z_t, c, Ac, t, p, sinusoids):
    n_items, E = p["item_embed"].shape

    def swish(v):
        return v * jax.nn.sigmoid(v)

    def time_embed(hw, hb, ow, ob):
        e = sinusoids[t]                               # (B, 20)
        h = swish(e @ hw.T + hb)
        return h @ ow.T + ob                           # (B, 1)

    te1 = time_embed(p["te1_hw"], p["te1_hb"], p["te1_ow"], p["te1_ob"])
    te2 = time_embed(p["te2_hw"], p["te2_hb"], p["te2_ow"], p["te2_ob"])
    t_embed1 = jnp.tile(te1, (1, E))
    t_embed2 = jnp.tile(te2, (1, E))

    z_embed = (z_t / n_items) @ p["item_embed"]
    c_norm = jnp.maximum(jnp.sum(jnp.abs(c), axis=-1, keepdims=True), 1.0)
    c_embed = (c / c_norm) @ p["item_embed"]

    xs = jnp.stack([z_embed, c_embed, t_embed1], axis=-1)            # (B, E, 3)
    h = swish(xs @ p["em_hw"].T + p["em_hb"])
    x_embed = (h @ p["em_ow"].T + p["em_ob"])[..., 0]                # (B, E)

    x_mid = x_embed @ p["item_embed"].T                              # (B, n_items)
    t_proj = t_embed2 @ p["sm_proj_w"].T + p["sm_proj_b"]            # (B, n_items)

    xs2 = jnp.concatenate([jnp.stack([x_mid, c, Ac], axis=-1),
                           t_proj[..., None]], axis=-1)              # (B, n_items, 4)
    h2 = swish(xs2 @ p["sm_hw"].T + p["sm_hb"])
    return (h2 @ p["sm_ow"].T + p["sm_ob"])[..., 0]                  # (B, n_items)


if __name__ == "__main__":
    # Small shapes consistent with the module; n_items/embed_dim chosen as
    # multiples of 128 so every matmul operand and the output are lane-dense.
    n_items, embed_dim, n_steps, B = 128, 128, 10, 32

    key = jax.random.PRNGKey(0)
    kz, kc, ka, kt, kp = jax.random.split(key, 5)
    z_t = jax.random.normal(kz, (B, n_items), jnp.float32)
    c = jax.random.normal(kc, (B, n_items), jnp.float32)
    Ac = jax.random.normal(ka, (B, n_items), jnp.float32)
    t = jax.random.randint(kt, (B,), 0, n_steps + 1, dtype=jnp.int32)

    sinusoids = make_sinusoids(_TE_DIM, n_steps)
    raw = make_params(kp, n_items, embed_dim)
    packed = pack_params(raw, sinusoids)

    out = jax.block_until_ready(denoiser_forward(z_t, c, Ac, t, packed))

    ref = reference_forward(z_t, c, Ac, t, raw, sinusoids)
    np.testing.assert_allclose(np.asarray(out), np.asarray(ref),
                               rtol=1e-3, atol=1e-5)
    print("KERNEL_OK")
</pallas_src>

<mosaic_0001>
module attributes {stable_mosaic.version = 11 : i64} {
  func.func @denoiser_kernel(%arg0: i32, %arg1: memref<16x1xi32, #tpu.memory_space<vmem>>, %arg2: memref<16x128xf32, #tpu.memory_space<vmem>>, %arg3: memref<16x128xf32, #tpu.memory_space<vmem>>, %arg4: memref<16x128xf32, #tpu.memory_space<vmem>>, %arg5: memref<112x40xf32, #tpu.memory_space<vmem>>, %arg6: memref<128x128xf32, #tpu.memory_space<vmem>>, %arg7: memref<264x128xf32, #tpu.memory_space<vmem>>, %arg8: memref<41xf32, #tpu.memory_space<smem>>, %arg9: memref<16x128xf32, #tpu.memory_space<vmem>>) attributes {dimension_semantics = [#tpu.dimension_semantics<parallel>], iteration_bounds = array<i64: 2>, scalar_prefetch = 0 : i64, scratch_operands = 0 : i64, tpu.core_type = #tpu.core_type<tc>, window_params = [{transform_indices = @transform_0, window_bounds = array<i64: 16, 1>}, {transform_indices = @transform_1, window_bounds = array<i64: 16, 128>}, {transform_indices = @transform_2, window_bounds = array<i64: 16, 128>}, {transform_indices = @transform_3, window_bounds = array<i64: 16, 128>}, {pipeline_mode = #tpu.pipeline_mode<synchronous>, transform_indices = @transform_4, window_bounds = array<i64: 112, 40>}, {pipeline_mode = #tpu.pipeline_mode<synchronous>, transform_indices = @transform_5, window_bounds = array<i64: 128, 128>}, {pipeline_mode = #tpu.pipeline_mode<synchronous>, transform_indices = @transform_6, window_bounds = array<i64: 264, 128>}, {transform_indices = @transform_7, window_bounds = array<i64: 41>}, {transform_indices = @transform_8, window_bounds = array<i64: 16, 128>}]} {
    %c0 = arith.constant 0 : index
    %c0_0 = arith.constant 0 : index
    %0 = vector.load %arg1[%c0, %c0_0] : memref<16x1xi32, #tpu.memory_space<vmem>>, vector<16x1xi32>
    %1 = tpu.iota {dimensions = array<i32: 1>} : vector<16x16xi32>
    %2 = vector.broadcast %0 : vector<16x1xi32> to vector<16x16xi32>
    %3 = arith.cmpi eq, %1, %2 : vector<16x16xi32>
    %4 = arith.extui %3 : vector<16x16xi1> to vector<16x16xi32>
    %5 = arith.sitofp %4 : vector<16x16xi32> to vector<16x16xf32>
    %c0_1 = arith.constant 0 : index
    %c0_2 = arith.constant 0 : index
    %6 = vector.load %arg5[%c0_1, %c0_2] : memref<112x40xf32, #tpu.memory_space<vmem>>, vector<16x40xf32>
    %cst = arith.constant dense<0.000000e+00> : vector<16x40xf32>
    %7 = tpu.matmul %5, %6, %cst {dimension_numbers = #tpu.dot_dimension_numbers<[1], [0], [0], [1], [0, 0, 1, 1], [], []>, precision = #tpu.contract_precision<fp32>} : vector<16x16xf32>, vector<16x40xf32>, vector<16x40xf32> -> vector<16x40xf32>
    %c16 = arith.constant 16 : index
    %c0_3 = arith.constant 0 : index
    %8 = vector.load %arg5[%c16, %c0_3] : memref<112x40xf32, #tpu.memory_space<vmem>>, vector<40x40xf32>
    %cst_4 = arith.constant dense<0.000000e+00> : vector<16x40xf32>
    %9 = tpu.matmul %7, %8, %cst_4 {dimension_numbers = #tpu.dot_dimension_numbers<[1], [0], [0], [1], [0, 0, 1, 1], [], []>, precision = #tpu.contract_precision<fp32>} : vector<16x40xf32>, vector<40x40xf32>, vector<16x40xf32> -> vector<16x40xf32>
    %c56 = arith.constant 56 : index
    %c0_5 = arith.constant 0 : index
    %10 = vector.load %arg5[%c56, %c0_5] : memref<112x40xf32, #tpu.memory_space<vmem>>, vector<1x40xf32>
    %11 = vector.broadcast %10 : vector<1x40xf32> to vector<16x40xf32>
    %12 = arith.addf %9, %11 : vector<16x40xf32>
    %13 = math.absf %12 : vector<16x40xf32>
    %cst_6 = arith.constant 0.000000e+00 : f32
    %14 = vector.broadcast %cst_6 : f32 to vector<16x40xf32>
    %15 = arith.subf %14, %13 : vector<16x40xf32>
    %16 = math.exp %15 : vector<16x40xf32>
    %cst_7 = arith.constant 0.000000e+00 : f32
    %17 = vector.broadcast %cst_7 : f32 to vector<16x40xf32>
    %18 = arith.cmpf oge, %12, %17 : vector<16x40xf32>
    %cst_8 = arith.constant 1.000000e+00 : f32
    %19 = vector.broadcast %cst_8 : f32 to vector<16x40xf32>
    %20 = arith.select %18, %19, %16 : vector<16x40xi1>, vector<16x40xf32>
    %cst_9 = arith.constant 1.000000e+00 : f32
    %21 = vector.broadcast %cst_9 : f32 to vector<16x40xf32>
    %22 = arith.addf %21, %16 : vector<16x40xf32>
    %23 = arith.divf %20, %22 : vector<16x40xf32>
    %24 = arith.mulf %12, %23 : vector<16x40xf32>
    %c64 = arith.constant 64 : index
    %c0_10 = arith.constant 0 : index
    %25 = vector.load %arg5[%c64, %c0_10] : memref<112x40xf32, #tpu.memory_space<vmem>>, vector<40x40xf32>
    %cst_11 = arith.constant dense<0.000000e+00> : vector<16x40xf32>
    %26 = tpu.matmul %24, %25, %cst_11 {dimension_numbers = #tpu.dot_dimension_numbers<[1], [0], [0], [1], [0, 0, 1, 1], [], []>, precision = #tpu.contract_precision<fp32>} : vector<16x40xf32>, vector<40x40xf32>, vector<16x40xf32> -> vector<16x40xf32>
    %c104 = arith.constant 104 : index
    %c0_12 = arith.constant 0 : index
    %27 = vector.load %arg5[%c104, %c0_12] : memref<112x40xf32, #tpu.memory_space<vmem>>, vector<1x40xf32>
    %28 = vector.broadcast %27 : vector<1x40xf32> to vector<16x40xf32>
    %29 = arith.addf %26, %28 : vector<16x40xf32>
    %30 = vector.extract_strided_slice %29 {offsets = [0, 0], sizes = [16, 1], strides = [1, 1]} : vector<16x40xf32> to vector<16x1xf32>
    %31 = vector.extract_strided_slice %29 {offsets = [0, 1], sizes = [16, 1], strides = [1, 1]} : vector<16x40xf32> to vector<16x1xf32>
    %c0_13 = arith.constant 0 : index
    %c0_14 = arith.constant 0 : index
    %32 = vector.load %arg2[%c0_13, %c0_14] : memref<16x128xf32, #tpu.memory_space<vmem>>, vector<16x128xf32>
    %c0_15 = arith.constant 0 : index
    %c0_16 = arith.constant 0 : index
    %33 = vector.load %arg3[%c0_15, %c0_16] : memref<16x128xf32, #tpu.memory_space<vmem>>, vector<16x128xf32>
    %c0_17 = arith.constant 0 : index
    %c0_18 = arith.constant 0 : index
    %34 = vector.load %arg4[%c0_17, %c0_18] : memref<16x128xf32, #tpu.memory_space<vmem>>, vector<16x128xf32>
    %c0_19 = arith.constant 0 : index
    %c0_20 = arith.constant 0 : index
    %35 = vector.load %arg6[%c0_19, %c0_20] : memref<128x128xf32, #tpu.memory_space<vmem>>, vector<128x128xf32>
    %cst_21 = arith.constant 7.812500e-03 : f32
    %36 = vector.broadcast %cst_21 : f32 to vector<16x128xf32>
    %37 = arith.mulf %32, %36 : vector<16x128xf32>
    %cst_22 = arith.constant dense<0.000000e+00> : vector<16x128xf32>
    %38 = tpu.matmul %37, %35, %cst_22 {dimension_numbers = #tpu.dot_dimension_numbers<[1], [0], [0], [1], [0, 0, 1, 1], [], []>, precision = #tpu.contract_precision<fp32>} : vector<16x128xf32>, vector<128x128xf32>, vector<16x128xf32> -> vector<16x128xf32>
    %39 = math.absf %33 : vector<16x128xf32>
    %cst_23 = arith.constant dense<0.000000e+00> : vector<16xf32>
    %40 = vector.multi_reduction <add>, %39, %cst_23 [1] : vector<16x128xf32> to vector<16xf32>
    %41 = vector.shape_cast %40 : vector<16xf32> to vector<16x1xf32>
    %cst_24 = arith.constant 1.000000e+00 : f32
    %42 = vector.broadcast %cst_24 : f32 to vector<16x1xf32>
    %43 = arith.maximumf %41, %42 : vector<16x1xf32>
    %44 = vector.broadcast %43 : vector<16x1xf32> to vector<16x128xf32>
    %45 = arith.divf %33, %44 : vector<16x128xf32>
    %cst_25 = arith.constant dense<0.000000e+00> : vector<16x128xf32>
    %46 = tpu.matmul %45, %35, %cst_25 {dimension_numbers = #tpu.dot_dimension_numbers<[1], [0], [0], [1], [0, 0, 1, 1], [], []>, precision = #tpu.contract_precision<fp32>} : vector<16x128xf32>, vector<128x128xf32>, vector<16x128xf32> -> vector<16x128xf32>
    %cst_26 = arith.constant 0.000000e+00 : f32
    %47 = vector.broadcast %cst_26 : f32 to vector<16x128xf32>
    %c15 = arith.constant 15 : index
    %48 = memref.load %arg8[%c15] : memref<41xf32, #tpu.memory_space<smem>>
    %49 = vector.broadcast %48 : f32 to vector<16x128xf32>
    %50 = arith.addf %47, %49 : vector<16x128xf32>
    %c0_27 = arith.constant 0 : index
    %51 = memref.load %arg8[%c0_27] : memref<41xf32, #tpu.memory_space<smem>>
    %52 = vector.broadcast %51 : f32 to vector<16x128xf32>
    %53 = arith.mulf %52, %38 : vector<16x128xf32>
    %c1 = arith.constant 1 : index
    %54 = memref.load %arg8[%c1] : memref<41xf32, #tpu.memory_space<smem>>
    %55 = vector.broadcast %54 : f32 to vector<16x128xf32>
    %56 = arith.mulf %55, %46 : vector<16x128xf32>
    %57 = arith.addf %53, %56 : vector<16x128xf32>
    %c2 = arith.constant 2 : index
    %58 = memref.load %arg8[%c2] : memref<41xf32, #tpu.memory_space<smem>>
    %59 = vector.broadcast %58 : f32 to vector<16x1xf32>
    %60 = arith.mulf %59, %30 : vector<16x1xf32>
    %61 = vector.broadcast %60 : vector<16x1xf32> to vector<16x128xf32>
    %62 = arith.addf %57, %61 : vector<16x128xf32>
    %c9 = arith.constant 9 : index
    %63 = memref.load %arg8[%c9] : memref<41xf32, #tpu.memory_space<smem>>
    %64 = vector.broadcast %63 : f32 to vector<16x128xf32>
    %65 = arith.addf %62, %64 : vector<16x128xf32>
    %c12 = arith.constant 12 : index
    %66 = memref.load %arg8[%c12] : memref<41xf32, #tpu.memory_space<smem>>
    %67 = math.absf %65 : vector<16x128xf32>
    %cst_28 = arith.constant 0.000000e+00 : f32
    %68 = vector.broadcast %cst_28 : f32 to vector<16x128xf32>
    %69 = arith.subf %68, %67 : vector<16x128xf32>
    %70 = math.exp %69 : vector<16x128xf32>
    %cst_29 = arith.constant 0.000000e+00 : f32
    %71 = vector.broadcast %cst_29 : f32 to vector<16x128xf32>
    %72 = arith.cmpf oge, %65, %71 : vector<16x128xf32>
    %cst_30 = arith.constant 1.000000e+00 : f32
    %73 = vector.broadcast %cst_30 : f32 to vector<16x128xf32>
    %74 = arith.select %72, %73, %70 : vector<16x128xi1>, vector<16x128xf32>
    %cst_31 = arith.constant 1.000000e+00 : f32
    %75 = vector.broadcast %cst_31 : f32 to vector<16x128xf32>
    %76 = arith.addf %75, %70 : vector<16x128xf32>
    %77 = arith.divf %74, %76 : vector<16x128xf32>
    %78 = arith.mulf %65, %77 : vector<16x128xf32>
    %79 = vector.broadcast %66 : f32 to vector<16x128xf32>
    %80 = arith.mulf %79, %78 : vector<16x128xf32>
    %81 = arith.addf %50, %80 : vector<16x128xf32>
    %c3 = arith.constant 3 : index
    %82 = memref.load %arg8[%c3] : memref<41xf32, #tpu.memory_space<smem>>
    %83 = vector.broadcast %82 : f32 to vector<16x128xf32>
    %84 = arith.mulf %83, %38 : vector<16x128xf32>
    %c4 = arith.constant 4 : index
    %85 = memref.load %arg8[%c4] : memref<41xf32, #tpu.memory_space<smem>>
    %86 = vector.broadcast %85 : f32 to vector<16x128xf32>
    %87 = arith.mulf %86, %46 : vector<16x128xf32>
    %88 = arith.addf %84, %87 : vector<16x128xf32>
    %c5 = arith.constant 5 : index
    %89 = memref.load %arg8[%c5] : memref<41xf32, #tpu.memory_space<smem>>
    %90 = vector.broadcast %89 : f32 to vector<16x1xf32>
    %91 = arith.mulf %90, %30 : vector<16x1xf32>
    %92 = vector.broadcast %91 : vector<16x1xf32> to vector<16x128xf32>
    %93 = arith.addf %88, %92 : vector<16x128xf32>
    %c10 = arith.constant 10 : index
    %94 = memref.load %arg8[%c10] : memref<41xf32, #tpu.memory_space<smem>>
    %95 = vector.broadcast %94 : f32 to vector<16x128xf32>
    %96 = arith.addf %93, %95 : vector<16x128xf32>
    %c13 = arith.constant 13 : index
    %97 = memref.load %arg8[%c13] : memref<41xf32, #tpu.memory_space<smem>>
    %98 = math.absf %96 : vector<16x128xf32>
    %cst_32 = arith.constant 0.000000e+00 : f32
    %99 = vector.broadcast %cst_32 : f32 to vector<16x128xf32>
    %100 = arith.subf %99, %98 : vector<16x128xf32>
    %101 = math.exp %100 : vector<16x128xf32>
    %cst_33 = arith.constant 0.000000e+00 : f32
    %102 = vector.broadcast %cst_33 : f32 to vector<16x128xf32>
    %103 = arith.cmpf oge, %96, %102 : vector<16x128xf32>
    %cst_34 = arith.constant 1.000000e+00 : f32
    %104 = vector.broadcast %cst_34 : f32 to vector<16x128xf32>
    %105 = arith.select %103, %104, %101 : vector<16x128xi1>, vector<16x128xf32>
    %cst_35 = arith.constant 1.000000e+00 : f32
    %106 = vector.broadcast %cst_35 : f32 to vector<16x128xf32>
    %107 = arith.addf %106, %101 : vector<16x128xf32>
    %108 = arith.divf %105, %107 : vector<16x128xf32>
    %109 = arith.mulf %96, %108 : vector<16x128xf32>
    %110 = vector.broadcast %97 : f32 to vector<16x128xf32>
    %111 = arith.mulf %110, %109 : vector<16x128xf32>
    %112 = arith.addf %81, %111 : vector<16x128xf32>
    %c6 = arith.constant 6 : index
    %113 = memref.load %arg8[%c6] : memref<41xf32, #tpu.memory_space<smem>>
    %114 = vector.broadcast %113 : f32 to vector<16x128xf32>
    %115 = arith.mulf %114, %38 : vector<16x128xf32>
    %c7 = arith.constant 7 : index
    %116 = memref.load %arg8[%c7] : memref<41xf32, #tpu.memory_space<smem>>
    %117 = vector.broadcast %116 : f32 to vector<16x128xf32>
    %118 = arith.mulf %117, %46 : vector<16x128xf32>
    %119 = arith.addf %115, %118 : vector<16x128xf32>
    %c8 = arith.constant 8 : index
    %120 = memref.load %arg8[%c8] : memref<41xf32, #tpu.memory_space<smem>>
    %121 = vector.broadcast %120 : f32 to vector<16x1xf32>
    %122 = arith.mulf %121, %30 : vector<16x1xf32>
    %123 = vector.broadcast %122 : vector<16x1xf32> to vector<16x128xf32>
    %124 = arith.addf %119, %123 : vector<16x128xf32>
    %c11 = arith.constant 11 : index
    %125 = memref.load %arg8[%c11] : memref<41xf32, #tpu.memory_space<smem>>
    %126 = vector.broadcast %125 : f32 to vector<16x128xf32>
    %127 = arith.addf %124, %126 : vector<16x128xf32>
    %c14 = arith.constant 14 : index
    %128 = memref.load %arg8[%c14] : memref<41xf32, #tpu.memory_space<smem>>
    %129 = math.absf %127 : vector<16x128xf32>
    %cst_36 = arith.constant 0.000000e+00 : f32
    %130 = vector.broadcast %cst_36 : f32 to vector<16x128xf32>
    %131 = arith.subf %130, %129 : vector<16x128xf32>
    %132 = math.exp %131 : vector<16x128xf32>
    %cst_37 = arith.constant 0.000000e+00 : f32
    %133 = vector.broadcast %cst_37 : f32 to vector<16x128xf32>
    %134 = arith.cmpf oge, %127, %133 : vector<16x128xf32>
    %cst_38 = arith.constant 1.000000e+00 : f32
    %135 = vector.broadcast %cst_38 : f32 to vector<16x128xf32>
    %136 = arith.select %134, %135, %132 : vector<16x128xi1>, vector<16x128xf32>
    %cst_39 = arith.constant 1.000000e+00 : f32
    %137 = vector.broadcast %cst_39 : f32 to vector<16x128xf32>
    %138 = arith.addf %137, %132 : vector<16x128xf32>
    %139 = arith.divf %136, %138 : vector<16x128xf32>
    %140 = arith.mulf %127, %139 : vector<16x128xf32>
    %141 = vector.broadcast %128 : f32 to vector<16x128xf32>
    %142 = arith.mulf %141, %140 : vector<16x128xf32>
    %143 = arith.addf %112, %142 : vector<16x128xf32>
    %c0_40 = arith.constant 0 : index
    %c0_41 = arith.constant 0 : index
    %144 = vector.load %arg7[%c0_40, %c0_41] : memref<264x128xf32, #tpu.memory_space<vmem>>, vector<128x128xf32>
    %cst_42 = arith.constant dense<0.000000e+00> : vector<16x128xf32>
    %145 = tpu.matmul %143, %144, %cst_42 {dimension_numbers = #tpu.dot_dimension_numbers<[1], [0], [0], [1], [0, 0, 1, 1], [], []>, precision = #tpu.contract_precision<fp32>} : vector<16x128xf32>, vector<128x128xf32>, vector<16x128xf32> -> vector<16x128xf32>
    %146 = vector.shape_cast %31 : vector<16x1xf32> to vector<16x1xf32>
    %147 = vector.broadcast %146 : vector<16x1xf32> to vector<16x128xf32>
    %c128 = arith.constant 128 : index
    %c0_43 = arith.constant 0 : index
    %148 = vector.load %arg7[%c128, %c0_43] : memref<264x128xf32, #tpu.memory_space<vmem>>, vector<128x128xf32>
    %cst_44 = arith.constant dense<0.000000e+00> : vector<16x128xf32>
    %149 = tpu.matmul %147, %148, %cst_44 {dimension_numbers = #tpu.dot_dimension_numbers<[1], [0], [0], [1], [0, 0, 1, 1], [], []>, precision = #tpu.contract_precision<fp32>} : vector<16x128xf32>, vector<128x128xf32>, vector<16x128xf32> -> vector<16x128xf32>
    %c256 = arith.constant 256 : index
    %c0_45 = arith.constant 0 : index
    %150 = vector.load %arg7[%c256, %c0_45] : memref<264x128xf32, #tpu.memory_space<vmem>>, vector<1x128xf32>
    %151 = vector.broadcast %150 : vector<1x128xf32> to vector<16x128xf32>
    %152 = arith.addf %149, %151 : vector<16x128xf32>
    %cst_46 = arith.constant 0.000000e+00 : f32
    %153 = vector.broadcast %cst_46 : f32 to vector<16x128xf32>
    %c40 = arith.constant 40 : index
    %154 = memref.load %arg8[%c40] : memref<41xf32, #tpu.memory_space<smem>>
    %155 = vector.broadcast %154 : f32 to vector<16x128xf32>
    %156 = arith.addf %153, %155 : vector<16x128xf32>
    %c16_47 = arith.constant 16 : index
    %157 = memref.load %arg8[%c16_47] : memref<41xf32, #tpu.memory_space<smem>>
    %158 = vector.broadcast %157 : f32 to vector<16x128xf32>
    %159 = arith.mulf %158, %145 : vector<16x128xf32>
    %c17 = arith.constant 17 : index
    %160 = memref.load %arg8[%c17] : memref<41xf32, #tpu.memory_space<smem>>
    %161 = vector.broadcast %160 : f32 to vector<16x128xf32>
    %162 = arith.mulf %161, %33 : vector<16x128xf32>
    %163 = arith.addf %159, %162 : vector<16x128xf32>
    %c18 = arith.constant 18 : index
    %164 = memref.load %arg8[%c18] : memref<41xf32, #tpu.memory_space<smem>>
    %165 = vector.broadcast %164 : f32 to vector<16x128xf32>
    %166 = arith.mulf %165, %34 : vector<16x128xf32>
    %167 = arith.addf %163, %166 : vector<16x128xf32>
    %c19 = arith.constant 19 : index
    %168 = memref.load %arg8[%c19] : memref<41xf32, #tpu.memory_space<smem>>
    %169 = vector.broadcast %168 : f32 to vector<16x128xf32>
    %170 = arith.mulf %169, %152 : vector<16x128xf32>
    %171 = arith.addf %167, %170 : vector<16x128xf32>
    %c32 = arith.constant 32 : index
    %172 = memref.load %arg8[%c32] : memref<41xf32, #tpu.memory_space<smem>>
    %173 = vector.broadcast %172 : f32 to vector<16x128xf32>
    %174 = arith.addf %171, %173 : vector<16x128xf32>
    %c36 = arith.constant 36 : index
    %175 = memref.load %arg8[%c36] : memref<41xf32, #tpu.memory_space<smem>>
    %176 = math.absf %174 : vector<16x128xf32>
    %cst_48 = arith.constant 0.000000e+00 : f32
    %177 = vector.broadcast %cst_48 : f32 to vector<16x128xf32>
    %178 = arith.subf %177, %176 : vector<16x128xf32>
    %179 = math.exp %178 : vector<16x128xf32>
    %cst_49 = arith.constant 0.000000e+00 : f32
    %180 = vector.broadcast %cst_49 : f32 to vector<16x128xf32>
    %181 = arith.cmpf oge, %174, %180 : vector<16x128xf32>
    %cst_50 = arith.constant 1.000000e+00 : f32
    %182 = vector.broadcast %cst_50 : f32 to vector<16x128xf32>
    %183 = arith.select %181, %182, %179 : vector<16x128xi1>, vector<16x128xf32>
    %cst_51 = arith.constant 1.000000e+00 : f32
    %184 = vector.broadcast %cst_51 : f32 to vector<16x128xf32>
    %185 = arith.addf %184, %179 : vector<16x128xf32>
    %186 = arith.divf %183, %185 : vector<16x128xf32>
    %187 = arith.mulf %174, %186 : vector<16x128xf32>
    %188 = vector.broadcast %175 : f32 to vector<16x128xf32>
    %189 = arith.mulf %188, %187 : vector<16x128xf32>
    %190 = arith.addf %156, %189 : vector<16x128xf32>
    %c20 = arith.constant 20 : index
    %191 = memref.load %arg8[%c20] : memref<41xf32, #tpu.memory_space<smem>>
    %192 = vector.broadcast %191 : f32 to vector<16x128xf32>
    %193 = arith.mulf %192, %145 : vector<16x128xf32>
    %c21 = arith.constant 21 : index
    %194 = memref.load %arg8[%c21] : memref<41xf32, #tpu.memory_space<smem>>
    %195 = vector.broadcast %194 : f32 to vector<16x128xf32>
    %196 = arith.mulf %195, %33 : vector<16x128xf32>
    %197 = arith.addf %193, %196 : vector<16x128xf32>
    %c22 = arith.constant 22 : index
    %198 = memref.load %arg8[%c22] : memref<41xf32, #tpu.memory_space<smem>>
    %199 = vector.broadcast %198 : f32 to vector<16x128xf32>
    %200 = arith.mulf %199, %34 : vector<16x128xf32>
    %201 = arith.addf %197, %200 : vector<16x128xf32>
    %c23 = arith.constant 23 : index
    %202 = memref.load %arg8[%c23] : memref<41xf32, #tpu.memory_space<smem>>
    %203 = vector.broadcast %202 : f32 to vector<16x128xf32>
    %204 = arith.mulf %203, %152 : vector<16x128xf32>
    %205 = arith.addf %201, %204 : vector<16x128xf32>
    %c33 = arith.constant 33 : index
    %206 = memref.load %arg8[%c33] : memref<41xf32, #tpu.memory_space<smem>>
    %207 = vector.broadcast %206 : f32 to vector<16x128xf32>
    %208 = arith.addf %205, %207 : vector<16x128xf32>
    %c37 = arith.constant 37 : index
    %209 = memref.load %arg8[%c37] : memref<41xf32, #tpu.memory_space<smem>>
    %210 = math.absf %208 : vector<16x128xf32>
    %cst_52 = arith.constant 0.000000e+00 : f32
    %211 = vector.broadcast %cst_52 : f32 to vector<16x128xf32>
    %212 = arith.subf %211, %210 : vector<16x128xf32>
    %213 = math.exp %212 : vector<16x128xf32>
    %cst_53 = arith.constant 0.000000e+00 : f32
    %214 = vector.broadcast %cst_53 : f32 to vector<16x128xf32>
    %215 = arith.cmpf oge, %208, %214 : vector<16x128xf32>
    %cst_54 = arith.constant 1.000000e+00 : f32
    %216 = vector.broadcast %cst_54 : f32 to vector<16x128xf32>
    %217 = arith.select %215, %216, %213 : vector<16x128xi1>, vector<16x128xf32>
    %cst_55 = arith.constant 1.000000e+00 : f32
    %218 = vector.broadcast %cst_55 : f32 to vector<16x128xf32>
    %219 = arith.addf %218, %213 : vector<16x128xf32>
    %220 = arith.divf %217, %219 : vector<16x128xf32>
    %221 = arith.mulf %208, %220 : vector<16x128xf32>
    %222 = vector.broadcast %209 : f32 to vector<16x128xf32>
    %223 = arith.mulf %222, %221 : vector<16x128xf32>
    %224 = arith.addf %190, %223 : vector<16x128xf32>
    %c24 = arith.constant 24 : index
    %225 = memref.load %arg8[%c24] : memref<41xf32, #tpu.memory_space<smem>>
    %226 = vector.broadcast %225 : f32 to vector<16x128xf32>
    %227 = arith.mulf %226, %145 : vector<16x128xf32>
    %c25 = arith.constant 25 : index
    %228 = memref.load %arg8[%c25] : memref<41xf32, #tpu.memory_space<smem>>
    %229 = vector.broadcast %228 : f32 to vector<16x128xf32>
    %230 = arith.mulf %229, %33 : vector<16x128xf32>
    %231 = arith.addf %227, %230 : vector<16x128xf32>
    %c26 = arith.constant 26 : index
    %232 = memref.load %arg8[%c26] : memref<41xf32, #tpu.memory_space<smem>>
    %233 = vector.broadcast %232 : f32 to vector<16x128xf32>
    %234 = arith.mulf %233, %34 : vector<16x128xf32>
    %235 = arith.addf %231, %234 : vector<16x128xf32>
    %c27 = arith.constant 27 : index
    %236 = memref.load %arg8[%c27] : memref<41xf32, #tpu.memory_space<smem>>
    %237 = vector.broadcast %236 : f32 to vector<16x128xf32>
    %238 = arith.mulf %237, %152 : vector<16x128xf32>
    %239 = arith.addf %235, %238 : vector<16x128xf32>
    %c34 = arith.constant 34 : index
    %240 = memref.load %arg8[%c34] : memref<41xf32, #tpu.memory_space<smem>>
    %241 = vector.broadcast %240 : f32 to vector<16x128xf32>
    %242 = arith.addf %239, %241 : vector<16x128xf32>
    %c38 = arith.constant 38 : index
    %243 = memref.load %arg8[%c38] : memref<41xf32, #tpu.memory_space<smem>>
    %244 = math.absf %242 : vector<16x128xf32>
    %cst_56 = arith.constant 0.000000e+00 : f32
    %245 = vector.broadcast %cst_56 : f32 to vector<16x128xf32>
    %246 = arith.subf %245, %244 : vector<16x128xf32>
    %247 = math.exp %246 : vector<16x128xf32>
    %cst_57 = arith.constant 0.000000e+00 : f32
    %248 = vector.broadcast %cst_57 : f32 to vector<16x128xf32>
    %249 = arith.cmpf oge, %242, %248 : vector<16x128xf32>
    %cst_58 = arith.constant 1.000000e+00 : f32
    %250 = vector.broadcast %cst_58 : f32 to vector<16x128xf32>
    %251 = arith.select %249, %250, %247 : vector<16x128xi1>, vector<16x128xf32>
    %cst_59 = arith.constant 1.000000e+00 : f32
    %252 = vector.broadcast %cst_59 : f32 to vector<16x128xf32>
    %253 = arith.addf %252, %247 : vector<16x128xf32>
    %254 = arith.divf %251, %253 : vector<16x128xf32>
    %255 = arith.mulf %242, %254 : vector<16x128xf32>
    %256 = vector.broadcast %243 : f32 to vector<16x128xf32>
    %257 = arith.mulf %256, %255 : vector<16x128xf32>
    %258 = arith.addf %224, %257 : vector<16x128xf32>
    %c28 = arith.constant 28 : index
    %259 = memref.load %arg8[%c28] : memref<41xf32, #tpu.memory_space<smem>>
    %260 = vector.broadcast %259 : f32 to vector<16x128xf32>
    %261 = arith.mulf %260, %145 : vector<16x128xf32>
    %c29 = arith.constant 29 : index
    %262 = memref.load %arg8[%c29] : memref<41xf32, #tpu.memory_space<smem>>
    %263 = vector.broadcast %262 : f32 to vector<16x128xf32>
    %264 = arith.mulf %263, %33 : vector<16x128xf32>
    %265 = arith.addf %261, %264 : vector<16x128xf32>
    %c30 = arith.constant 30 : index
    %266 = memref.load %arg8[%c30] : memref<41xf32, #tpu.memory_space<smem>>
    %267 = vector.broadcast %266 : f32 to vector<16x128xf32>
    %268 = arith.mulf %267, %34 : vector<16x128xf32>
    %269 = arith.addf %265, %268 : vector<16x128xf32>
    %c31 = arith.constant 31 : index
    %270 = memref.load %arg8[%c31] : memref<41xf32, #tpu.memory_space<smem>>
    %271 = vector.broadcast %270 : f32 to vector<16x128xf32>
    %272 = arith.mulf %271, %152 : vector<16x128xf32>
    %273 = arith.addf %269, %272 : vector<16x128xf32>
    %c35 = arith.constant 35 : index
    %274 = memref.load %arg8[%c35] : memref<41xf32, #tpu.memory_space<smem>>
    %275 = vector.broadcast %274 : f32 to vector<16x128xf32>
    %276 = arith.addf %273, %275 : vector<16x128xf32>
    %c39 = arith.constant 39 : index
    %277 = memref.load %arg8[%c39] : memref<41xf32, #tpu.memory_space<smem>>
    %278 = math.absf %276 : vector<16x128xf32>
    %cst_60 = arith.constant 0.000000e+00 : f32
    %279 = vector.broadcast %cst_60 : f32 to vector<16x128xf32>
    %280 = arith.subf %279, %278 : vector<16x128xf32>
    %281 = math.exp %280 : vector<16x128xf32>
    %cst_61 = arith.constant 0.000000e+00 : f32
    %282 = vector.broadcast %cst_61 : f32 to vector<16x128xf32>
    %283 = arith.cmpf oge, %276, %282 : vector<16x128xf32>
    %cst_62 = arith.constant 1.000000e+00 : f32
    %284 = vector.broadcast %cst_62 : f32 to vector<16x128xf32>
    %285 = arith.select %283, %284, %281 : vector<16x128xi1>, vector<16x128xf32>
    %cst_63 = arith.constant 1.000000e+00 : f32
    %286 = vector.broadcast %cst_63 : f32 to vector<16x128xf32>
    %287 = arith.addf %286, %281 : vector<16x128xf32>
    %288 = arith.divf %285, %287 : vector<16x128xf32>
    %289 = arith.mulf %276, %288 : vector<16x128xf32>
    %290 = vector.broadcast %277 : f32 to vector<16x128xf32>
    %291 = arith.mulf %290, %289 : vector<16x128xf32>
    %292 = arith.addf %258, %291 : vector<16x128xf32>
    %c0_64 = arith.constant 0 : index
    %c0_65 = arith.constant 0 : index
    %293 = vector.load %arg9[%c0_64, %c0_65] : memref<16x128xf32, #tpu.memory_space<vmem>>, vector<16x128xf32>
    tpu.vector_store %arg9[%c0_64, %c0_65], %292 {strides = array<i32>} : memref<16x128xf32, #tpu.memory_space<vmem>>, vector<16x128xf32>,
    return
  }
  func.func @transform_0(%arg0: i32) -> (i32, i32) {
    %c0_i32 = arith.constant 0 : i32
    %c0_i32_0 = arith.constant 0 : i32
    return %arg0, %c0_i32 : i32, i32
  }
  func.func @transform_1(%arg0: i32) -> (i32, i32) {
    %c0_i32 = arith.constant 0 : i32
    %c0_i32_0 = arith.constant 0 : i32
    return %arg0, %c0_i32 : i32, i32
  }
  func.func @transform_2(%arg0: i32) -> (i32, i32) {
    %c0_i32 = arith.constant 0 : i32
    %c0_i32_0 = arith.constant 0 : i32
    return %arg0, %c0_i32 : i32, i32
  }
  func.func @transform_3(%arg0: i32) -> (i32, i32) {
    %c0_i32 = arith.constant 0 : i32
    %c0_i32_0 = arith.constant 0 : i32
    return %arg0, %c0_i32 : i32, i32
  }
  func.func @transform_4(%arg0: i32) -> (i32, i32) {
    %c0_i32 = arith.constant 0 : i32
    %c0_i32_0 = arith.constant 0 : i32
    %c0_i32_1 = arith.constant 0 : i32
    return %c0_i32, %c0_i32_0 : i32, i32
  }
  func.func @transform_5(%arg0: i32) -> (i32, i32) {
    %c0_i32 = arith.constant 0 : i32
    %c0_i32_0 = arith.constant 0 : i32
    %c0_i32_1 = arith.constant 0 : i32
    return %c0_i32, %c0_i32_0 : i32, i32
  }
  func.func @transform_6(%arg0: i32) -> (i32, i32) {
    %c0_i32 = arith.constant 0 : i32
    %c0_i32_0 = arith.constant 0 : i32
    %c0_i32_1 = arith.constant 0 : i32
    return %c0_i32, %c0_i32_0 : i32, i32
  }
  func.func @transform_7(%arg0: i32) -> i32 {
    %c0_i32 = arith.constant 0 : i32
    %c0_i32_0 = arith.constant 0 : i32
    return %c0_i32 : i32
  }
  func.func @transform_8(%arg0: i32) -> (i32, i32) {
    %c0_i32 = arith.constant 0 : i32
    %c0_i32_0 = arith.constant 0 : i32
    return %arg0, %c0_i32 : i32, i32
  }
}

</mosaic_0001>

<bundles_post_ra>
// kernel: tpu_custom_call.1
= control target key start
LH: loop header
LB: loop body
LE: loop exit
PB: predicated region body
PF: predicated region fallthrough
CT: control target
= control target key end

     0   :  { %s9499_s0 = inlined_call_operand.vmem [shape: s32[32,1], index: 0, kind: input, shape index: {}]   ;;  %s9500_s1 = inlined_call_operand.vmem [shape: f32[32,128], index: 1, kind: input, shape index: {}]   ;;  %s9501_s2 = inlined_call_operand.vmem [shape: f32[32,128], index: 2, kind: input, shape index: {}]   ;;  %s9502_s3 = inlined_call_operand.hbm [shape: f32[32,128], index: 3, kind: input, shape index: {}]   ;;  %s9503_s4 = inlined_call_operand.vmem [shape: f32[112,40], index: 4, kind: input, shape index: {}]   ;;  %s9504_s5 = inlined_call_operand.vmem [shape: f32[128,128], index: 5, kind: input, shape index: {}]   ;;  %s9505_s6 = inlined_call_operand.hbm [shape: f32[264,128], index: 6, kind: input, shape index: {}]   ;;  %s9506_s7 = inlined_call_operand.vmem [shape: f32[41], index: 7, kind: input, shape index: {}]   ;;  %s9507_s8 = inlined_call_operand.hbm [shape: f32[32,128], index: 8, kind: output, shape index: {}]  }
   0x1   :  { %9581 = sst [smem:[#allocation37_spill]] %s9505_s6 }
   0x2   :  { %9582 = sst [smem:[#allocation38_spill]] %s9506_s7 }
   0x3   :  { %13 = vsyncpa [#allocation3], 0 }
   0x4   :  { %15 = vsyncpa [#allocation3 + $0x1], 0 }
   0x5   :  { %16 = vsyncpa [#allocation7], 0 }
   0x6   :  { %17 = vsyncpa [#allocation5], 0 }
   0x7   :  { %18 = vsyncpa [#allocation4], 0 }
   0x8   :  { %20 = vsyncpa [#allocation4 + $0x1], 0  ;;  %s7434_s27 = smov 0   ;;  %s7436_s28 = smov 0  }
   0x9   :  { %s7438_s29 = smov 0   ;;  %s7440_s30 = smov 0  }
   0xa LB: > { %s7455_s9 = sadd.s32 4294967295, %s7376_s30   ;;  %s5431_s10 = sadd.s32 4294967294, %s7376_s30   ;;  %s7376_s30 = sphi %s7440_s30, %s9674_s30   ;;  %s7372_s29 = sphi %s7438_s29, %s9673_s29   ;;  %s7368_s28 = sphi %s7436_s28, %s9672_s28   ;;  %s7364_s27 = sphi %s7434_s27, %s9671_s27  }
   0xb   : > { %p124_p0 = scmp.ne.s32.totalorder %s7368_s28, %s7364_s27  ;;  %p9510_p1 = scmp.eq.s32.totalorder %s7455_s9, 0 }
   0xc   : > { %p238_p3 = scmp.eq.s32.totalorder %s5431_s10, 1  ;;  %p5432_p5 = scmp.ge.s32.totalorder %s7376_s30, 1 }
   0xd   : > { %p7464_p4 = por %p9510_p1, %p124_p0  ;;  %p245_p7 = scmp.lt.s32.totalorder %s7376_s30, 3 }
   0xe   : > { %p7469_p6 = por %p238_p3, %p124_p0  ;;  %s7378_s14 = smov [#allocation6]  }
   0xf   : > { %s9583_s11 = scalar_select %p7464_p4, 1, 0 }
  0x10   : > { %s9584_s12 = scalar_select %p7469_p6, 1, 0 }
  0x11   : > { %p7474_p8 = pnand %p5432_p5, %p245_p7  ;;  %s263_s15 = sshll.u32 %s7378_s14, 4  ;;  %s264_s15 = int_to_ptr.vmem [resolvable:$true] %s263_s15 }
  0x12   : > { %s9586_s7 = sld [smem:[#allocation38_spill]]  ;;  %s7246_s20 = scalar_lea.vmem %s264_s15, 4224 }
  0x13   : > { %s9585_s13 = scalar_select %p7474_p8, 1, 0 }
  0x14   : > { %p7098_p9 = pneg %p7474_p8  ;;  %p7247_p13 = scmp.ne.s32.totalorder %s264_s15, %s7246_s20 }
  0x15   : > { %p7254_p5 = scmp.lt.s32.totalorder %s264_s15, %s264_s15  ;;  %p7255_p7 = scmp.lt.s32.totalorder %s7246_s20, %s7246_s20 }
  0x16   : > { %p7486_p11 = pnand %p7098_p9, %p9510_p1 }
  0x17   : > { %p7256_p10 = por %p7255_p7, %p7254_p5 }
  0x18   : > { %s277_s18 = sshll.u32 %s9586_s7, 4  ;;  %p7237_p12 = pneg %p7486_p11  ;;  %s278_s18 = int_to_ptr.vmem [resolvable:$true] %s277_s18 }
  0x1a   : > { %p7249_p0 = pnand %p7247_p13, %p7237_p12 }
  0x1c   : > { %p7250_p3 = pneg %p7249_p0 }
  0x1e   : > { %p7257_p2 = pnand %p7256_p10, %p7250_p3 }
  0x20   : > { %7260 = shalt.err (!%p7257_p2)
}
  0x21   : > { %s9508_s21 = smov 128   ;;  %s9509_s22 = smov 8  }
  0x22   : > { %s9588_s6 = sld [smem:[#allocation37_spill]]  ;;  %s7261_s25 = scalar_lea.vmem %s278_s18, 16 }
  0x23   : > { %p7262_p9 = scmp.ne.s32.totalorder %s278_s18, %s7261_s25  ;;  %p7269_p10 = scmp.lt.s32.totalorder %s278_s18, %s278_s18 }
  0x24   : > { %p7270_p2 = scmp.lt.s32.totalorder %s7261_s25, %s7261_s25 }
  0x25   : > { %p7264_p13 = pnand %p7262_p9, %p7237_p12 }
  0x26   : > { %p7271_p3 = por %p7270_p2, %p7269_p10 }
  0x27   : > { %p7265_p0 = pneg %p7264_p13 }
  0x28   : > { %7101 = dma.hbm_to_vmem [thread:$0]  (!%p7486_p11), %s9588_s6, 4224, %s264_s15, [#allocation7], %s9508_s21, %s9508_s21, %s9509_s22  }
  0x29   : > { %p7272_p5 = pnand %p7271_p3, %p7265_p0 }
  0x2b   : > { %7275 = shalt.err (!%p7272_p5)
}
  0x2c   : > { %s7381_s26 = smov [#allocation8]   ;;  %s7509_s10 = sadd.s32 1, %s7376_s30  }
  0x2d   : > { %7104 = dma.vmem_to_smem (!%p7486_p11), %s278_s18, 16, %s7381_s26, [#allocation5]  }
  0x2e   : > { %s111_s14 = sadd.s32 1, %s7372_s29  ;;  %s108_s15 = ssub.s32 %s7376_s30, %s7509_s10 }
  0x2f   : > { %p118_p12 = scmp.ne.s32.totalorder %s7372_s29, %s7368_s28  ;;  %p109_p7 = scmp.eq.s32.totalorder %s108_s15, 0 }
  0x30   : > { %p119_p9 = scmp.eq.s32.totalorder %s7376_s30, 0  ;;  %p9589_p13 = scmp.eq.s32.totalorder %s7455_s9, 1 }
  0x31   : > { %p7115_p10 = scmp.lt.s32.totalorder %s7376_s30, 2  ;;  %s315_s19 = sand.u32 1, %s7372_s29  }
  0x32   : > { %p7519_p0 = por %p9589_p13, %p118_p12  ;;  %p120_p2 = por %p119_p9, %p118_p12 }
  0x33   : > { %s7525_s17 = scalar_select %p109_p7, %s7372_s29, %s111_s14  }
  0x34   : > { %s9590_s16 = scalar_select %p7519_p0, 1, 0 }
  0x35   : > { %s5436_s20 = sshll.u32 %s315_s19, 4  ;;  %s5506_s18 = sshll.u32 %s7376_s30, 8 }
  0x36   : > { %s7532_s25 = scalar_lea.hbm %s9502_s3, %s5506_s18  ;;  %s319_s26 = scalar_lea.vmem [#allocation2], %s5436_s20 }
  0x37   : > { %s326_s15 = sshll.u32 %s319_s26, 4  ;;  %p7536_p11 = pnand %p7115_p10, %p120_p2  ;;  %s7534_s15 = int_to_ptr.vmem [resolvable:$true] %s326_s15 }
  0x38   : > { %s7540_s14 = scalar_lea.sflag [#allocation3], %s315_s19  ;;  %s7276_s22 = scalar_lea.hbm %s7532_s25, 256 }
  0x39   : > { %p7277_p3 = scmp.ne.s32.totalorder %s7532_s25, %s7276_s22  ;;  %p7278_p5 = pneg %p7536_p11 }
  0x3a   : > { %s7281_s20 = scalar_lea.hbm %s9502_s3, 512  ;;  %p7282_p9 = scmp.lt.s32.totalorder %s7532_s25, %s9502_s3 }
  0x3b   : > { %p7279_p12 = pnand %p7278_p5, %p7277_p3  ;;  %p7283_p13 = scmp.lt.s32.totalorder %s7281_s20, %s7276_s22 }
  0x3d   : > { %p7280_p7 = pneg %p7279_p12  ;;  %p7284_p10 = por %p7283_p13, %p7282_p9 }
  0x3f   : > { %p7285_p2 = pnand %p7284_p10, %p7280_p7 }
  0x41   : > { %7288 = shalt.err (!%p7285_p2)
}
  0x42   : > { %s7289_s19 = scalar_lea.vmem %s7534_s15, 256  ;;  %s7382_s6 = smov [#allocation2]  }
  0x43   : > { %p7290_p1 = scmp.ne.s32.totalorder %s7534_s15, %s7289_s19  ;;  %s7294_s7 = sshll.u32 %s7382_s6, 4  ;;  %s7295_s7 = int_to_ptr.vmem [resolvable:$false] %s7294_s7 }
  0x44   : > { %s7296_s18 = scalar_lea.vmem %s7295_s7, 512  ;;  %p7297_p12 = scmp.lt.s32.totalorder %s7534_s15, %s7295_s7 }
  0x45   : > { %p7292_p6 = pnand %p7290_p1, %p7278_p5  ;;  %p7298_p0 = scmp.lt.s32.totalorder %s7296_s18, %s7289_s19 }
  0x47   : > { %p7293_p3 = pneg %p7292_p6  ;;  %p7299_p4 = por %p7298_p0, %p7297_p12 }
  0x49   : > { %p7300_p8 = pnand %p7299_p4, %p7293_p3 }
  0x4b   : > { %7303 = shalt.err (!%p7300_p8)
}
  0x4c   : > { %s9592_s22 = smov 8   ;;  %s9593_s23 = smov 128  }
  0x4d   : > { %7108 = dma.hbm_to_vmem [thread:$0]  (!%p7536_p11), %s7532_s25, 256, %s7534_s15, %s7540_s14, %s9593_s23, %s9593_s23, %s9592_s22  }
  0x4e   : > { %p9594_p1 = scmp.ne.s32.totalorder %s9585_s13, 0 }
  0x50   : > { %338 = sbr.rel (%p9594_p1) target bundleno = 1668 (0x684), region = 52 }
  0x55   : > { %s7567_s6 = sand.u32 1, %s7368_s28   ;;  %p9595_p4 = scmp.ne.s32.totalorder %s9583_s11, 0 }
  0x56   : > { %s9580_s7 = sshll.u32 %s7567_s6, 4  ;;  %s341_s20 = scalar_lea.sflag [#allocation3], %s7567_s6 }
  0x57   : > { %s7573_s21 = scalar_lea.vmem [#allocation2], %s9580_s7 }
  0x58   : > { %7347 = dma.done.wait (%p9595_p4), %s341_s20, 256  }
  0x59   : > { %7349 = vsyncadd (%p9595_p4), %s341_s20, 4294967040  ;;  %p9596_p6 = scmp.eq.s32.totalorder %s7455_s9, 0 }
  0x5b   : > { %7351 = dma.done.wait (%p9596_p6), [#allocation7], 4224   ;;  %p9597_p8 = pmov %p9596_p6 }
  0x5c   : > { %p9598_p0 = pmov %p9596_p6 }
  0x5d   : > { %7353 = vsyncadd (%p9597_p8), [#allocation7], 4294963072 }
  0x5e   : > { %7355 = dma.done.wait (%p9598_p0), [#allocation5], 16   ;;  %p9599_p11 = pmov %p9598_p0 }
  0x60   : > { %7357 = vsyncadd (%p9599_p11), [#allocation5], 4294967280 }
  0x61   : > { %357 = sfence }
  0x62   : > { %s5444_s13 = sshll.u32 %s7455_s9, 1  ;;  %v438_v0 = vld [vmem:[%s9503_s4 + $0x8] sm:$0xff]  ;;  %v437_v1 = vld [vmem:[%s9503_s4] sm:$0xff]  ;;  %v7383_v2 = vmov 0   ;;  %v423_v15 = vlaneseq  ;;  %vm439_vm0 = vcmask 130048   ;;  %v7384_v18 = vmov 0.0  }
  0x63   : > { %7160 = vset.pattern.permute.xlu0 %v7383_v2  ;;  %p402_p5 = scmp.lt.s32.totalorder %s5444_s13, 3  ;;  %v475_v3 = vand.u32 4294901760, %v438_v0  ;;  %v478_v4 = vand.u32 4294901760, %v437_v1  ;;  %7161 = vset.pattern.permute.xlu1 %v7383_v2  ;;  %v952_v32 = vld [vmem:[%s9503_s4 + $0x30] sm:$0xff]  ;;  %v951_v34 = vld [vmem:[%s9503_s4 + $0x28] sm:$0xff]  ;;  %v950_v37 = vld [vmem:[%s9503_s4 + $0x20] sm:$0xff] }
  0x64   : > { %v424_v16 = vand.u32 127, %v423_v15  ;;  %v7611_v33 = vand.u32 4294901760, %v952_v32  ;;  %v7619_v36 = vand.u32 4294901760, %v951_v34  ;;  %v7632_v40 = vand.u32 4294901760, %v950_v37  ;;  %v949_v41 = vld [vmem:[%s9503_s4 + $0x18] sm:$0xff]  ;;  %v948_v46 = vld [vmem:[%s9503_s4 + $0x10] sm:$0xff] }
  0x65   : > { %s9676_s13 = smov (!%p402_p5, %s5444_s13), 3  ;;  %v563_v5 = vsub.f32 %v438_v0, %v475_v3  ;;  %v570_v6 = vsub.f32 %v437_v1, %v478_v4  ;;  %6048 = vmatprep.subr.mxu0 %v475_v3  ;;  %v7647_v45 = vand.u32 4294901760, %v949_v41  ;;  %v7663_v51 = vand.u32 4294901760, %v948_v46  ;;  %s8532_s22 = sld [smem:[#allocation8 + $0x2]] }
  0x66   : > { %6049 = vmatpush3.msra.mxu0 %v475_v3  ;;  %s7594_s24 = sshll.u32 %s9676_s13, 3  ;;  %v7617_v35 = vsub.f32 %v952_v32, %v7611_v33  ;;  %v7630_v39 = vsub.f32 %v951_v34, %v7619_v36  ;;  %v7645_v44 = vsub.f32 %v950_v37, %v7632_v40  ;;  %vm958_vm3 = vcmask 326656   ;;  %s5472_s20 = sld [smem:[#allocation8 + $0x8]] }
  0x67   : > { %v564_v7 = vand.u32 4294901760, %v563_v5  ;;  %v571_v8 = vand.u32 4294901760, %v570_v6  ;;  %6050 = vmatprep.subr.mxu0 %v478_v4  ;;  %s405_s18 = scalar_lea.vmem %s9499_s0, %s7594_s24  ;;  %v7660_v50 = vsub.f32 %v949_v41, %v7647_v45  ;;  %v7672_v55 = vsub.f32 %v948_v46, %v7663_v51  ;;  %s7729_s23 = scalar_lea.vmem %s9501_s2, %s7594_s24 }
  0x68   : > { %6051 = vmatpush3.msra.mxu0 %v478_v4  ;;  %v421_v9 = vld [vmem:[%s405_s18] sm:$0xff]  ;;  %v422_v12 = vld [vmem:[%s405_s18 + $0x8] sm:$0xff]  ;;  %v7627_v38 = vand.u32 4294901760, %v7617_v35  ;;  %v7642_v43 = vand.u32 4294901760, %v7630_v39  ;;  %v7657_v49 = vand.u32 4294901760, %v7645_v44  ;;  %s411_s26 = scalar_lea.vmem %s9500_s1, %s7594_s24  ;;  %s8528_s18 = sld [smem:[#allocation8 + $0x5]] }
  0x69   : > { %v565_v10 = vsub.f32 %v563_v5, %v564_v7  ;;  %v572_v11 = vsub.f32 %v570_v6, %v571_v8  ;;  %6062 = vmatprep.subr.mxu0 %v563_v5  ;;  %426 = vperm.xlu0 %7160, %v421_v9   ;;  %v7669_v54 = vand.u32 4294901760, %v7660_v50  ;;  %v7679_v58 = vand.u32 4294901760, %v7672_v55  ;;  %v7732_v32 = vld [vmem:[%s7729_s23] sm:$0xff]  ;;  %v2086_v37 = vld [vmem:[%s7729_s23 + $0x8] sm:$0xff]  ;;  %s8759_s13 = sld [smem:[#allocation8]]  ;;  %p9668_p9 = scmp.ne.s32.totalorder %s9590_s16, 0 }
  0x6a   : > { %v1081_v42 = vsub.f32 %v7617_v35, %v7627_v38  ;;  %v1088_v48 = vsub.f32 %v7630_v39, %v7642_v43  ;;  %v1095_v53 = vsub.f32 %v7645_v44, %v7657_v49  ;;  %9600 = vst [vmem:[#allocation14_spill] sm:$0xff] %v7732_v32  ;;  %s8761_s25 = sld [smem:[#allocation8 + $0x3]] }
  0x6b   : > { %v566_v13 = vand.u32 4294901760, %v565_v10  ;;  %v573_v14 = vand.u32 4294901760, %v572_v11  ;;  %v1102_v57 = vsub.f32 %v7660_v50, %v7669_v54  ;;  %v1109_v60 = vsub.f32 %v7672_v55, %v7679_v58  ;;  %s8765_s15 = sld [smem:[#allocation8 + $0x6]] }
  0x6c   : > { %v1082_v47 = vand.u32 4294901760, %v1081_v42  ;;  %v1089_v52 = vand.u32 4294901760, %v1088_v48  ;;  %v1096_v56 = vand.u32 4294901760, %v1095_v53  ;;  %s8767_s11 = sld [smem:[#allocation8 + $0x1]] }
  0x6d   : > { %6055 = vmatprep.subr.mxu1 %v566_v13  ;;  %429 = vperm.xlu0 %7160, %v422_v12   ;;  %v1103_v59 = vand.u32 4294901760, %v1102_v57  ;;  %v1110_v61 = vand.u32 4294901760, %v1109_v60  ;;  %s8769_s14 = sld [smem:[#allocation8 + $0x4]] }
  0x6e   : > { %6056 = vmatpush3.msra.mxu1 %v566_v13  ;;  %s8773_s24 = sld [smem:[#allocation8 + $0x9]] }
  0x6f   : > { %6057 = vmatprep.subr.mxu1 %v573_v14  ;;  %s8775_s19 = sld [smem:[#allocation8 + $0xa]] }
  0x70   : > { %6058 = vmatpush3.msra.mxu1 %v573_v14  ;;  %s9353_s7 = sld [smem:[#allocation8 + $0x1e]] }
  0x71   : > { %6069 = vmatprep.subr.mxu1 %v475_v3 }
  0xe4   : > { %v427_v17 = vpop.permute.xlu0 %426 }
  0xe5   : > { %vm431_vm1 = vcmp.eq.s32.totalorder %v424_v16, %v427_v17 }
  0xe6   : > { %v5450_v19 = vsel %vm431_vm1, 1.0, %v7384_v18 }
  0xe7   : > { %v441_v20 = vsel %vm439_vm0, %v5450_v19, 0  ;;  %6059 = vmatprep.mubr.msk.f32.mxu1 %vm439_vm0, %v5450_v19 }
  0xe8   : > { %v514_v21 = vsub.f32 %v441_v20, %v441_v20  ;;  %v430_v22 = vpop.permute.xlu0 %429 }
  0xe9   : > { %vm432_vm2 = vcmp.eq.s32.totalorder %v424_v16, %v430_v22 }
  0xea   : > { %v5451_v23 = vsel %vm432_vm2, 1.0, %v7384_v18  ;;  %v515_v24 = vand.u32 4294901760, %v514_v21 }
  0xeb   : > { %v444_v25 = vsel %vm439_vm0, %v5451_v23, 0  ;;  %6060 = vmatmul.mubr.msk.f32.vlgmr.msra.gmra.mxu1 %vm439_vm0, %v5451_v23 }
  0xec   : > { %v524_v26 = vsub.f32 %v444_v25, %v444_v25  ;;  %6073 = vmatprep.mubr.f32.mxu1 %v515_v24  ;;  %6070 = vmatpush3.msra.mxu1 %v475_v3  ;;  %v516_v27 = vsub.f32 %v514_v21, %v515_v24 }
  0xed   : > { %6071 = vmatprep.subr.mxu1 %v478_v4 }
  0xee   : > { %6072 = vmatpush3.msra.mxu1 %v478_v4  ;;  %v517_v28 = vand.u32 4294901760, %v516_v27  ;;  %v525_v29 = vand.u32 4294901760, %v524_v26 }
  0xef   : > { %6083 = vmatprep.subr.mxu1 %v475_v3 }
  0xf0   : > { %6052 = vmatprep.mubr.f32.mxu0 %v517_v28  ;;  %6074 = vmatmul.mubr.f32.vlgmr.msra.gmra.mxu1 %v525_v29  ;;  %v526_v30 = vsub.f32 %v524_v26, %v525_v29 }
  0xf1   : > { %6084 = vmatpush3.msra.mxu1 %v475_v3  ;;  %6087 = vmatprep.mubr.msk.f32.mxu1 %vm439_vm0, %v5450_v19 }
  0xf2   : > { %6085 = vmatprep.subr.mxu1 %v478_v4  ;;  %v527_v31 = vand.u32 4294901760, %v526_v30 }
  0xf3   : > { %6086 = vmatpush3.msra.mxu1 %v478_v4 }
  0xf4   : > { %6053 = vmatmul.mubr.f32.vlgmr.msra.gmra.mxu0 %v527_v31  ;;  %6088 = vmatmul.mubr.msk.f32.vlgmr.msra.gmra.mxu1 %vm439_vm0, %v5451_v23 }
  0xf5   : > { %6063 = vmatpush3.msra.mxu0 %v563_v5  ;;  %6066 = vmatprep.mubr.f32.mxu0 %v514_v21 }
  0xf6   : > { %6064 = vmatprep.subr.mxu0 %v570_v6  ;;  %6103 = vmatprep.subr.mxu1 %v1082_v47 }
  0xf7   : > { %6065 = vmatpush3.msra.mxu0 %v570_v6  ;;  %6104 = vmatpush3.msra.mxu1 %v1082_v47 }
  0xf8   : > { %6076 = vmatprep.subr.mxu0 %v564_v7  ;;  %6067 = vmatmul.mubr.f32.vlgmr.msra.gmra.mxu0 %v524_v26 }
  0xf9   : > { %6077 = vmatpush3.msra.mxu0 %v564_v7  ;;  %6080 = vmatprep.mubr.msk.f32.mxu0 %vm439_vm0, %v5450_v19 }
  0xfa   : > { %6078 = vmatprep.subr.mxu0 %v571_v8  ;;  %6105 = vmatprep.subr.mxu1 %v1089_v52 }
  0xfb   : > { %6079 = vmatpush3.msra.mxu0 %v571_v8  ;;  %6106 = vmatpush3.msra.mxu1 %v1089_v52 }
  0xfc   : > { %6081 = vmatmul.mubr.msk.f32.vlgmr.msra.gmra.mxu0 %vm439_vm0, %v5451_v23  ;;  %6090 = vmatprep.subr.mxu0 %v7611_v33 }
  0xfd   : > { %6091 = vmatpush3.msra.mxu0 %v7611_v33  ;;  %6107 = vmatprep.subr.mxu1 %v1096_v56 }
  0xfe   : > { %6092 = vmatprep.subr.mxu0 %v7619_v36  ;;  %6108 = vmatpush3.msra.mxu1 %v1096_v56 }
  0xff   : > { %6093 = vmatpush3.msra.mxu0 %v7619_v36  ;;  %6109 = vmatprep.subr.mxu1 %v1103_v59 }
 0x100   : > { %6094 = vmatprep.subr.mxu0 %v7632_v40  ;;  %6110 = vmatpush3.msra.mxu1 %v1103_v59 }
 0x101   : > { %6095 = vmatpush3.msra.mxu0 %v7632_v40  ;;  %6111 = vmatprep.subr.mxu1 %v1110_v61 }
 0x102   : > { %6096 = vmatprep.subr.mxu0 %v7647_v45  ;;  %6112 = vmatpush3.msra.mxu1 %v1110_v61 }
 0x103   : > { %6097 = vmatpush3.msra.mxu0 %v7647_v45  ;;  %6129 = vmatprep.subr.mxu1 %v7611_v33 }
 0x104   : > { %6098 = vmatprep.subr.mxu0 %v7663_v51 }
 0x105   : > { %6099 = vmatpush3.msra.mxu0 %v7663_v51 }
 0x106   : > { %6116 = vmatprep.subr.mxu0 %v7617_v35 }
 0x1ab   : > { %v6061_v62 = vpop.f32.mrf.mxu1 }
 0x1ad   : > { %v610_v63 = vpop.f32.mrf.mxu1 }
 0x1b0   : > { %v6075_v0 = vpop.f32.mrf.mxu1 }
 0x1b2   : > { %v774_v4 = vpop.f32.mrf.mxu1 }
 0x1b4   : > { %v6054_v1 = vpop.f32.mrf.mxu0  ;;  %v6089_v11 = vpop.f32.mrf.mxu1 }
 0x1b5   : > { %v617_v3 = vadd.f32 %v6061_v62, %v6054_v1 }
 0x1b6   : > { %v519_v2 = vpop.f32.mrf.mxu0  ;;  %v938_v18 = vpop.f32.mrf.mxu1 }
 0x1b7   : > { %v611_v6 = vadd.f32 %v610_v63, %v519_v2 }
 0x1b8   : > { %v6068_v5 = vpop.f32.mrf.mxu0 }
 0x1b9   : > { %v700_v7 = vadd.f32 %v6068_v5, %v617_v3  ;;  %v5458_v3 = vld [vmem:[%s9503_s4 + $0x38] ss:$0 sm:$0xff] }
 0x1ba   : > { %v692_v8 = vpop.f32.mrf.mxu0 }
 0x1bb   : > { %v693_v9 = vadd.f32 %v692_v8, %v611_v6  ;;  %v783_v10 = vadd.f32 %v6075_v0, %v700_v7 }
 0x1bc   : > { %v6082_v12 = vpop.f32.mrf.mxu0 }
 0x1bd   : > { %v866_v13 = vadd.f32 %v6082_v12, %v783_v10  ;;  %v775_v14 = vadd.f32 %v774_v4, %v693_v9 }
 0x1be   : > { %v859_v15 = vpop.f32.mrf.mxu0 }
 0x1bf   : > { %v945_v16 = vadd.f32 %v6089_v11, %v866_v13  ;;  %v860_v17 = vadd.f32 %v859_v15, %v775_v14 }
 0x1c1   : > { %v963_v19 = vsel %vm958_vm3, %v945_v16, 0  ;;  %v939_v20 = vadd.f32 %v938_v18, %v860_v17 }
 0x1c2   : > { %v1045_v21 = vand.u32 4294901760, %v963_v19 }
 0x1c3   : > { %v960_v22 = vsel %vm958_vm3, %v939_v20, 0 }
 0x1c4   : > { %v1046_v23 = vsub.f32 %v963_v19, %v1045_v21  ;;  %v1035_v24 = vand.u32 4294901760, %v960_v22 }
 0x1c6   : > { %v1036_v25 = vsub.f32 %v960_v22, %v1035_v24  ;;  %6113 = vmatprep.mubr.f32.mxu1 %v1035_v24  ;;  %v1047_v26 = vand.u32 4294901760, %v1046_v23 }
 0x1c7   : > { %6114 = vmatmul.mubr.f32.vlgmr.msra.gmra.mxu1 %v1045_v21 }
 0x1c8   : > { %6130 = vmatpush3.msra.mxu1 %v7611_v33  ;;  %v1037_v27 = vand.u32 4294901760, %v1036_v25  ;;  %v1048_v28 = vsub.f32 %v1046_v23, %v1047_v26 }
 0x1c9   : > { %6131 = vmatprep.subr.mxu1 %v7619_v36 }
 0x1ca   : > { %6132 = vmatpush3.msra.mxu1 %v7619_v36  ;;  %6139 = vmatprep.mubr.f32.mxu1 %v1037_v27  ;;  %v1038_v29 = vsub.f32 %v1036_v25, %v1037_v27  ;;  %v1049_v31 = vand.u32 4294901760, %v1048_v28 }
 0x1cb   : > { %6133 = vmatprep.subr.mxu1 %v7632_v40 }
 0x1cc   : > { %6134 = vmatpush3.msra.mxu1 %v7632_v40  ;;  %v1039_v30 = vand.u32 4294901760, %v1038_v29 }
 0x1cd   : > { %6135 = vmatprep.subr.mxu1 %v7647_v45 }
 0x1ce   : > { %6136 = vmatpush3.msra.mxu1 %v7647_v45  ;;  %6100 = vmatprep.mubr.f32.mxu0 %v1039_v30 }
 0x1cf   : > { %6137 = vmatprep.subr.mxu1 %v7663_v51  ;;  %6101 = vmatmul.mubr.f32.vlgmr.msra.gmra.mxu0 %v1049_v31 }
 0x1d0   : > { %6117 = vmatpush3.msra.mxu0 %v7617_v35  ;;  %6138 = vmatpush3.msra.mxu1 %v7663_v51  ;;  %v2791_v35 = vand.u32 2147483647, %v7732_v32 }
 0x1d1   : > { %6118 = vmatprep.subr.mxu0 %v7630_v39  ;;  %6126 = vmatprep.mubr.f32.mxu0 %v1036_v25 }
 0x1d2   : > { %6140 = vmatmul.mubr.f32.vlgmr.msra.gmra.mxu1 %v1047_v26  ;;  %6155 = vmatprep.subr.mxu1 %v7611_v33 }
 0x1d3   : > { %6119 = vmatpush3.msra.mxu0 %v7630_v39  ;;  %6156 = vmatpush3.msra.mxu1 %v7611_v33  ;;  %v1530_v33 = vld [vmem:[%s9503_s4 + $0x60] sm:$0xff] }
 0x1d4   : > { %6165 = vmatprep.mubr.f32.mxu1 %v1035_v24  ;;  %6120 = vmatprep.subr.mxu0 %v7645_v44  ;;  %v7737_v34 = vand.u32 4294901760, %v1530_v33 }
 0x1d5   : > { %6157 = vmatprep.subr.mxu1 %v7619_v36  ;;  %6121 = vmatpush3.msra.mxu0 %v7645_v44  ;;  %v2792_v44 = vand.u32 2147483647, %v2086_v37 }
 0x1d6   : > { %6158 = vmatpush3.msra.mxu1 %v7619_v36  ;;  %6122 = vmatprep.subr.mxu0 %v7660_v50  ;;  %v1529_v36 = vld [vmem:[%s9503_s4 + $0x58] sm:$0xff] }
 0x1d7   : > { %6159 = vmatprep.subr.mxu1 %v7632_v40  ;;  %6123 = vmatpush3.msra.mxu0 %v7660_v50  ;;  %v7747_v39 = vand.u32 4294901760, %v1529_v36  ;;  %v1526_v50 = vld [vmem:[%s9503_s4 + $0x40] sm:$0xff] }
 0x1d8   : > { %6160 = vmatpush3.msra.mxu1 %v7632_v40  ;;  %6124 = vmatprep.subr.mxu0 %v7672_v55  ;;  %v1528_v40 = vld [vmem:[%s9503_s4 + $0x50] sm:$0xff] }
 0x1d9   : > { %6161 = vmatprep.subr.mxu1 %v7647_v45  ;;  %6125 = vmatpush3.msra.mxu0 %v7672_v55  ;;  %v7758_v42 = vsub.f32 %v1529_v36, %v7747_v39  ;;  %v7791_v55 = vand.u32 4294901760, %v1526_v50 }
 0x1da   : > { %6162 = vmatpush3.msra.mxu1 %v7647_v45  ;;  %6127 = vmatmul.mubr.f32.vlgmr.msra.gmra.mxu0 %v1046_v23  ;;  %v1527_v45 = vld [vmem:[%s9503_s4 + $0x48] sm:$0xff] }
 0x1db   : > { %6142 = vmatprep.subr.mxu0 %v7627_v38  ;;  %6163 = vmatprep.subr.mxu1 %v7663_v51  ;;  %v7770_v47 = vand.u32 4294901760, %v7758_v42  ;;  %v7800_v59 = vsub.f32 %v1526_v50, %v7791_v55 }
 0x1dc   : > { %6143 = vmatpush3.msra.mxu0 %v7627_v38  ;;  %6152 = vmatprep.mubr.f32.mxu0 %v1035_v24  ;;  %v7745_v38 = vsub.f32 %v1530_v33, %v7737_v34 }
 0x1dd   : > { %6164 = vmatpush3.msra.mxu1 %v7663_v51  ;;  %6144 = vmatprep.subr.mxu0 %v7642_v43  ;;  %v1665_v52 = vsub.f32 %v7758_v42, %v7770_v47  ;;  %v7807_v62 = vand.u32 4294901760, %v7800_v59 }
 0x1de   : > { %6166 = vmatmul.mubr.f32.vlgmr.msra.gmra.mxu1 %v1045_v21  ;;  %6145 = vmatpush3.msra.mxu0 %v7642_v43  ;;  %v7755_v41 = vand.u32 4294901760, %v7745_v38  ;;  %v7760_v43 = vand.u32 4294901760, %v1528_v40 }
 0x1df   : > { %6146 = vmatprep.subr.mxu0 %v7657_v49  ;;  %2793 = vadd.xlane.f32.xlu1 %v2791_v35  ;;  %v1666_v56 = vand.u32 4294901760, %v1665_v52  ;;  %v1686_v0 = vsub.f32 %v7800_v59, %v7807_v62 }
 0x1e0   : > { %6147 = vmatpush3.msra.mxu0 %v7657_v49  ;;  %v1658_v46 = vsub.f32 %v7745_v38, %v7755_v41  ;;  %v7773_v48 = vsub.f32 %v1528_v40, %v7760_v43  ;;  %v7775_v49 = vand.u32 4294901760, %v1527_v45 }
 0x1e1   : > { %6148 = vmatprep.subr.mxu0 %v7669_v54  ;;  %v1687_v1 = vand.u32 4294901760, %v1686_v0 }
 0x1e2   : > { %6149 = vmatpush3.msra.mxu0 %v7669_v54  ;;  %v1659_v51 = vand.u32 4294901760, %v1658_v46  ;;  %v7785_v53 = vand.u32 4294901760, %v7773_v48  ;;  %v7788_v54 = vsub.f32 %v1527_v45, %v7775_v49 }
 0x1e3   : > { %6150 = vmatprep.subr.mxu0 %v7679_v58  ;;  %2795 = vadd.xlane.f32.xlu1 %v2792_v44 }
 0x1e4   : > { %6151 = vmatpush3.msra.mxu0 %v7679_v58  ;;  %6181 = vmatprep.subr.mxu1 %v1659_v51  ;;  %v1672_v57 = vsub.f32 %v7773_v48, %v7785_v53  ;;  %v7797_v58 = vand.u32 4294901760, %v7788_v54 }
 0x1e5   : > { %6153 = vmatmul.mubr.f32.vlgmr.msra.gmra.mxu0 %v1045_v21  ;;  %6168 = vmatprep.subr.mxu0 %v7737_v34 }
 0x1e6   : > { %6169 = vmatpush3.msra.mxu0 %v7737_v34  ;;  %6182 = vmatpush3.msra.mxu1 %v1659_v51  ;;  %v1673_v60 = vand.u32 4294901760, %v1672_v57  ;;  %v1679_v61 = vsub.f32 %v7788_v54, %v7797_v58 }
 0x1e7   : > { %6170 = vmatprep.subr.mxu0 %v7747_v39  ;;  %6183 = vmatprep.subr.mxu1 %v1666_v56 }
 0x1e8   : > { %6171 = vmatpush3.msra.mxu0 %v7747_v39  ;;  %6184 = vmatpush3.msra.mxu1 %v1666_v56  ;;  %v1680_v63 = vand.u32 4294901760, %v1679_v61 }
 0x1e9   : > { %6172 = vmatprep.subr.mxu0 %v7760_v43  ;;  %6185 = vmatprep.subr.mxu1 %v1673_v60 }
 0x1ea   : > { %6173 = vmatpush3.msra.mxu0 %v7760_v43  ;;  %6186 = vmatpush3.msra.mxu1 %v1673_v60 }
 0x1eb   : > { %6174 = vmatprep.subr.mxu0 %v7775_v49  ;;  %6187 = vmatprep.subr.mxu1 %v1680_v63 }
 0x1ec   : > { %6175 = vmatpush3.msra.mxu0 %v7775_v49  ;;  %6188 = vmatpush3.msra.mxu1 %v1680_v63 }
 0x1ed   : > { %6176 = vmatprep.subr.mxu0 %v7791_v55  ;;  %6189 = vmatprep.subr.mxu1 %v1687_v1 }
 0x1ee   : > { %6177 = vmatpush3.msra.mxu0 %v7791_v55  ;;  %6190 = vmatpush3.msra.mxu1 %v1687_v1 }
 0x1ef   : > { %6194 = vmatprep.subr.mxu0 %v7745_v38  ;;  %6207 = vmatprep.subr.mxu1 %v7737_v34 }
 0x287   : > { %v6115_v4 = vpop.f32.mrf.mxu1 }
 0x289   : > { %v1147_v9 = vpop.f32.mrf.mxu1 }
 0x28f   : > { %v6102_v2 = vpop.f32.mrf.mxu0 }
 0x290   : > { %v1052_v6 = vadd.f32 %v6102_v2, %v5458_v3 }
 0x291   : > { %v1041_v5 = vpop.f32.mrf.mxu0 }
 0x292   : > { %v1042_v8 = vadd.f32 %v5458_v3, %v1041_v5  ;;  %v1154_v10 = vadd.f32 %v6115_v4, %v1052_v6  ;;  %v6141_v11 = vpop.f32.mrf.mxu1  ;;  %v2104_v4 = vld [vmem:[%s9504_s5 + $0x78] sm:$0xff] }
 0x294   : > { %v1148_v14 = vadd.f32 %v1147_v9, %v1042_v8  ;;  %v1320_v16 = vpop.f32.mrf.mxu1  ;;  %v7839_v9 = vand.u32 4294901760, %v2104_v4 }
 0x29a   : > { %v6128_v7 = vpop.f32.mrf.mxu0 }
 0x29b   : > { %v1243_v13 = vadd.f32 %v6128_v7, %v1154_v10  ;;  %v2103_v7 = vld [vmem:[%s9504_s5 + $0x70] sm:$0xff]  ;;  %v2102_v10 = vld [vmem:[%s9504_s5 + $0x68] sm:$0xff] }
 0x29c   : > { %v1235_v12 = vpop.f32.mrf.mxu0 }
 0x29d   : > { %v1236_v15 = vadd.f32 %v1235_v12, %v1148_v14  ;;  %v1329_v17 = vadd.f32 %v6141_v11, %v1243_v13  ;;  %v7846_v12 = vand.u32 4294901760, %v2103_v7  ;;  %v2101_v14 = vld [vmem:[%s9504_s5 + $0x60] sm:$0xff] }
 0x29e   : > { %v6167_v18 = vpop.f32.mrf.mxu1 }
 0x29f   : > { %v1321_v21 = vadd.f32 %v1320_v16, %v1236_v15  ;;  %v7854_v15 = vsub.f32 %v2104_v4, %v7839_v9  ;;  %v7856_v16 = vand.u32 4294901760, %v2102_v10 }
 0x2a0   : > { %v1496_v25 = vpop.f32.mrf.mxu1 }
 0x2a5   : > { %v6154_v19 = vpop.f32.mrf.mxu0 }
 0x2a6   : > { %v1421_v20 = vadd.f32 %v6154_v19, %v1329_v17  ;;  %v7862_v17 = vsub.f32 %v2103_v7, %v7846_v12  ;;  %v2100_v19 = vld [vmem:[%s9504_s5 + $0x58] sm:$0xff] }
 0x2a7   : > { %v1414_v22 = vpop.f32.mrf.mxu0 }
 0x2a8   : > { %v1503_v23 = vadd.f32 %v6167_v18, %v1421_v20  ;;  %v1415_v24 = vadd.f32 %v1414_v22, %v1321_v21  ;;  %v7864_v18 = vand.u32 4294901760, %v2101_v14  ;;  %v7872_v20 = vand.u32 4294901760, %v7854_v15  ;;  %v2099_v21 = vld [vmem:[%s9504_s5 + $0x50] sm:$0xff] }
 0x2a9   : > { %v7882_v22 = vand.u32 4294901760, %v2100_v19 }
 0x2aa   : > { %v1507_v26 = vand.u32 2147483647, %v1503_v23  ;;  %v1497_v27 = vadd.f32 %v1496_v25, %v1415_v24  ;;  %vm1515_vm4 = vcmp.ge.f32.partialorder %v1503_v23, 0.0  ;;  %v7890_v24 = vand.u32 4294901760, %v7862_v17 }
 0x2ab   : > { %v7893_v25 = vsub.f32 %v2101_v14, %v7864_v18 }
 0x2ac   : > { %v1509_v28 = vsub.f32 0.0, %v1507_v26  ;;  %v1506_v29 = vand.u32 2147483647, %v1497_v27  ;;  %vm1514_vm5 = vcmp.ge.f32.partialorder %v1497_v27, 0.0  ;;  %v2212_v26 = vsub.f32 %v7854_v15, %v7872_v20 }
 0x2ae   : > { %v1512_v30 = vmul.f32 1.442695, %v1509_v28  ;;  %v1508_v31 = vsub.f32 0.0, %v1506_v29  ;;  %v7921_v29 = vand.u32 4294901760, %v7893_v25 }
 0x2b0   : > { %7164 = vpow2.f32 %v1512_v30  ;;  %v1510_v33 = vmul.f32 1.442695, %v1508_v31  ;;  %v2096_v31 = vld [vmem:[%s9504_s5 + $0x38] sm:$0xff] }
 0x2b2   : > { %7166 = vpow2.f32 %v1510_v33 }
 0x2bd   : > { %v7165_v35 = vpop.eup %7164 }
 0x2be   : > { %v1519_v36 = vadd.f32 1.0, %v7165_v35  ;;  %v1517_v45 = vsel %vm1515_vm4, 1.0, %v7165_v35 }
 0x2bf   : > { %v7167_v37 = vpop.eup %7166 }
 0x2c0   : > { %7168 = vrcp.f32 %v1519_v36  ;;  %v1518_v40 = vadd.f32 1.0, %v7167_v37  ;;  %v1516_v51 = vsel %vm1514_vm5, 1.0, %v7167_v37  ;;  %v2095_v36 = vld [vmem:[%s9504_s5 + $0x30] sm:$0xff] }
 0x2c2   : > { %7170 = vrcp.f32 %v1518_v40  ;;  %v2233_v40 = vsub.f32 %v7893_v25, %v7921_v29 }
 0x2cd   : > { %v7169_v44 = vpop.eup %7168 }
 0x2ce   : > { %v1523_v46 = vmul.f32 %v7169_v44, %v1517_v45  ;;  %v2094_v45 = vld [vmem:[%s9504_s5 + $0x28] sm:$0xff] }
 0x2cf   : > { %v7171_v50 = vpop.eup %7170 }
 0x2d0   : > { %v1525_v52 = vmul.f32 %v1523_v46, %v1503_v23  ;;  %v1521_v56 = vmul.f32 %v7171_v50, %v1516_v51  ;;  %v2098_v23 = vld [vmem:[%s9504_s5 + $0x48] sm:$0xff]  ;;  %v7969_v46 = vand.u32 4294901760, %v2095_v36 }
 0x2d1   : > { %v7909_v28 = vand.u32 4294901760, %v2098_v23 }
 0x2d2   : > { %v1524_v57 = vmul.f32 %v1521_v56, %v1497_v27  ;;  %v1540_v60 = vsel %vm958_vm3, %v1525_v52, 0 }
 0x2d3   : > { %v7817_v61 = vand.u32 4294901760, %v1540_v60  ;;  %v7940_v35 = vsub.f32 %v2098_v23, %v7909_v28 }
 0x2d4   : > { %v1537_v63 = vsel %vm958_vm3, %v1524_v57, 0  ;;  %v7988_v57 = vand.u32 4294901760, %v2094_v45 }
 0x2d5   : > { %v7820_v0 = vand.u32 4294901760, %v1537_v63  ;;  %v7823_v1 = vsub.f32 %v1540_v60, %v7817_v61  ;;  %v7976_v51 = vand.u32 4294901760, %v7940_v35  ;;  %v7992_v60 = vand.u32 4294901760, %v2233_v40 }
 0x2d7   : > { %6191 = vmatprep.mubr.f32.mxu1 %v7820_v0  ;;  %v1613_v2 = vsub.f32 %v1537_v63, %v7820_v0  ;;  %v1624_v3 = vand.u32 4294901760, %v7823_v1 }
 0x2d8   : > { %6192 = vmatmul.mubr.f32.vlgmr.msra.gmra.mxu1 %v7817_v61 }
 0x2d9   : > { %6208 = vmatpush3.msra.mxu1 %v7737_v34  ;;  %v1614_v5 = vand.u32 4294901760, %v1613_v2  ;;  %v1625_v6 = vsub.f32 %v7823_v1, %v1624_v3 }
 0x2da   : > { %6209 = vmatprep.subr.mxu1 %v7747_v39 }
 0x2db   : > { %6210 = vmatpush3.msra.mxu1 %v7747_v39  ;;  %6217 = vmatprep.mubr.f32.mxu1 %v1614_v5  ;;  %v1615_v8 = vsub.f32 %v1613_v2, %v1614_v5  ;;  %v1626_v13 = vand.u32 4294901760, %v1625_v6  ;;  %v8024_v6 = vsub.f32 %v2094_v45, %v7988_v57 }
 0x2dc   : > { %6211 = vmatprep.subr.mxu1 %v7760_v43 }
 0x2dd   : > { %6212 = vmatpush3.msra.mxu1 %v7760_v43  ;;  %v1616_v11 = vand.u32 4294901760, %v1615_v8  ;;  %v8059_v23 = vand.u32 4294901760, %v8024_v6 }
 0x2de   : > { %6213 = vmatprep.subr.mxu1 %v7775_v49 }
 0x2df   : > { %6214 = vmatpush3.msra.mxu1 %v7775_v49  ;;  %6178 = vmatprep.mubr.f32.mxu0 %v1616_v11  ;;  %v2282_v45 = vsub.f32 %v8024_v6, %v8059_v23 }
 0x2e0   : > { %6215 = vmatprep.subr.mxu1 %v7791_v55  ;;  %6179 = vmatmul.mubr.f32.vlgmr.msra.gmra.mxu0 %v1626_v13 }
 0x2e1   : > { %6195 = vmatpush3.msra.mxu0 %v7745_v38  ;;  %6216 = vmatpush3.msra.mxu1 %v7791_v55  ;;  %v7875_v38 = vsub.f32 %v2102_v10, %v7856_v16 }
 0x2e2   : > { %6196 = vmatprep.subr.mxu0 %v7758_v42  ;;  %6204 = vmatprep.mubr.f32.mxu0 %v1613_v2 }
 0x2e3   : > { %6218 = vmatmul.mubr.f32.vlgmr.msra.gmra.mxu1 %v1624_v3  ;;  %6233 = vmatprep.subr.mxu1 %v7737_v34  ;;  %v7907_v27 = vand.u32 4294901760, %v7875_v38  ;;  %v2254_v3 = vsub.f32 %v7940_v35, %v7976_v51 }
 0x2e4   : > { %6197 = vmatpush3.msra.mxu0 %v7758_v42  ;;  %6234 = vmatpush3.msra.mxu1 %v7737_v34  ;;  %v7897_v34 = vand.u32 4294901760, %v2099_v21  ;;  %v2097_v42 = vld [vmem:[%s9504_s5 + $0x40] sm:$0xff] }
 0x2e5   : > { %6243 = vmatprep.mubr.f32.mxu1 %v7820_v0  ;;  %6198 = vmatprep.subr.mxu0 %v7773_v48  ;;  %v7923_v30 = vand.u32 4294901760, %v2097_v42  ;;  %v2226_v33 = vsub.f32 %v7875_v38, %v7907_v27 }
 0x2e6   : > { %6235 = vmatprep.subr.mxu1 %v7747_v39  ;;  %6199 = vmatpush3.msra.mxu0 %v7773_v48  ;;  %v7914_v48 = vsub.f32 %v2100_v19, %v7882_v22  ;;  %v8049_v19 = vand.u32 4294901760, %v2254_v3 }
 0x2e7   : > { %6236 = vmatpush3.msra.mxu1 %v7747_v39  ;;  %6200 = vmatprep.subr.mxu0 %v7788_v54  ;;  %v2219_v39 = vsub.f32 %v7862_v17, %v7890_v24  ;;  %v7959_v44 = vsub.f32 %v2097_v42, %v7923_v30  ;;  %v7973_v50 = vand.u32 4294901760, %v2226_v33 }
 0x2e8   : > { %6237 = vmatprep.subr.mxu1 %v7760_v43  ;;  %6201 = vmatpush3.msra.mxu0 %v7788_v54  ;;  %v7935_v54 = vand.u32 4294901760, %v2212_v26  ;;  %9603 = vst [vmem:[#allocation17_spill] sm:$0xff] %v8049_v19 }
 0x2e9   : > { %6238 = vmatpush3.msra.mxu1 %v7760_v43  ;;  %6202 = vmatprep.subr.mxu0 %v7800_v59  ;;  %v7931_v43 = vsub.f32 %v2099_v21, %v7897_v34  ;;  %v7954_v37 = vand.u32 4294901760, %v2219_v39  ;;  %v7995_v63 = vand.u32 4294901760, %v7959_v44 }
 0x2ea   : > { %6239 = vmatprep.subr.mxu1 %v7775_v49  ;;  %6203 = vmatpush3.msra.mxu0 %v7800_v59  ;;  %v7950_v59 = vand.u32 4294901760, %v2096_v31 }
 0x2eb   : > { %6240 = vmatpush3.msra.mxu1 %v7775_v49  ;;  %6205 = vmatmul.mubr.f32.vlgmr.msra.gmra.mxu0 %v7823_v1  ;;  %v7948_v49 = vand.u32 4294901760, %v7914_v48  ;;  %v8005_v1 = vsub.f32 %v2095_v36, %v7969_v46  ;;  %v2261_v8 = vsub.f32 %v7959_v44, %v7995_v63 }
 0x2ec   : > { %6220 = vmatprep.subr.mxu0 %v7755_v41  ;;  %6241 = vmatprep.subr.mxu1 %v7791_v55  ;;  %v7986_v56 = vsub.f32 %v2096_v31, %v7950_v59 }
 0x2ed   : > { %6221 = vmatpush3.msra.mxu0 %v7755_v41  ;;  %6230 = vmatprep.mubr.f32.mxu0 %v7820_v0  ;;  %v7967_v41 = vand.u32 4294901760, %v7931_v43  ;;  %v2240_v52 = vsub.f32 %v7914_v48, %v7948_v49  ;;  %v8040_v11 = vand.u32 4294901760, %v8005_v1  ;;  %v8068_v26 = vand.u32 4294901760, %v2261_v8 }
 0x2ee   : > { %6242 = vmatpush3.msra.mxu1 %v7791_v55  ;;  %6222 = vmatprep.subr.mxu0 %v7770_v47  ;;  %v2093_v55 = vld [vmem:[%s9504_s5 + $0x20] sm:$0xff]  ;;  %v8021_v5 = vand.u32 4294901760, %v7986_v56 }
 0x2ef   : > { %6244 = vmatmul.mubr.f32.vlgmr.msra.gmra.mxu1 %v7817_v61  ;;  %6281 = vmatprep.subr.mxu1 %v7935_v54  ;;  %v2247_v0 = vsub.f32 %v7931_v43, %v7967_v41  ;;  %v8007_v2 = vand.u32 4294901760, %v2093_v55  ;;  %v8018_v4 = vand.u32 4294901760, %v2240_v52  ;;  %9604 = vst [vmem:[#allocation18_spill] sm:$0xff] %v8068_v26  ;;  %v2275_v39 = vsub.f32 %v8005_v1, %v8040_v11 }
 0x2f0   : > { %6223 = vmatpush3.msra.mxu0 %v7770_v47  ;;  %6282 = vmatpush3.msra.mxu1 %v7935_v54  ;;  %v2092_v47 = vld [vmem:[%s9504_s5 + $0x18] sm:$0xff]  ;;  %v2268_v21 = vsub.f32 %v7986_v56, %v8021_v5 }
 0x2f1   : > { %6224 = vmatprep.subr.mxu0 %v7785_v53  ;;  %6283 = vmatprep.subr.mxu1 %v7954_v37  ;;  %9601 = vst [vmem:[#allocation15_spill] sm:$0xff] %v8018_v4  ;;  %v8026_v7 = vand.u32 4294901760, %v2092_v47  ;;  %v8037_v10 = vand.u32 4294901760, %v2247_v0  ;;  %v8043_v13 = vsub.f32 %v2093_v55, %v8007_v2  ;;  %v2084_v0 = vld [vmem:[%s411_s26 + $0x8] sm:$0xff]  ;;  %v8104_v3 = vand.u32 4294901760, %v2275_v39 }
 0x2f2   : > { %6225 = vmatpush3.msra.mxu0 %v7785_v53  ;;  %6284 = vmatpush3.msra.mxu1 %v7954_v37  ;;  %v2091_v53 = vld [vmem:[%s9504_s5 + $0x10] sm:$0xff]  ;;  %v8090_v40 = vand.u32 4294901760, %v2268_v21  ;;  %v8118_v39 = vand.u32 4294901760, %v2282_v45 }
 0x2f3   : > { %6226 = vmatprep.subr.mxu0 %v7797_v58  ;;  %6285 = vmatprep.subr.mxu1 %v7973_v50  ;;  %9602 = vst [vmem:[#allocation16_spill] sm:$0xff] %v8037_v10  ;;  %v8045_v14 = vand.u32 4294901760, %v2091_v53  ;;  %v8079_v31 = vand.u32 4294901760, %v8043_v13  ;;  %9606 = vst [vmem:[#allocation20_spill] sm:$0xff] %v8104_v3 }
 0x2f4   : > { %6227 = vmatpush3.msra.mxu0 %v7797_v58  ;;  %6286 = vmatpush3.msra.mxu1 %v7973_v50  ;;  %v2090_v58 = vld [vmem:[%s9504_s5 + $0x8] sm:$0xff]  ;;  %9605 = vst [vmem:[#allocation19_spill] sm:$0xff] %v8090_v40  ;;  %9607 = vst [vmem:[#allocation21_spill] sm:$0xff] %v8118_v39 }
 0x2f5   : > { %6228 = vmatprep.subr.mxu0 %v7807_v62  ;;  %6287 = vmatprep.subr.mxu1 %v7992_v60  ;;  %v8064_v42 = vand.u32 4294901760, %v2090_v58  ;;  %v8082_v33 = vsub.f32 %v2091_v53, %v8045_v14  ;;  %v2289_v53 = vsub.f32 %v8043_v13, %v8079_v31 }
 0x2f6   : > { %6229 = vmatpush3.msra.mxu0 %v7807_v62  ;;  %6288 = vmatpush3.msra.mxu1 %v7992_v60  ;;  %v2089_v62 = vld [vmem:[%s9504_s5] sm:$0xff] }
 0x2f7   : > { %6231 = vmatmul.mubr.f32.vlgmr.msra.gmra.mxu0 %v7817_v61  ;;  %6246 = vmatprep.subr.mxu0 %v7839_v9  ;;  %v8062_v61 = vsub.f32 %v2092_v47, %v8026_v7  ;;  %v8084_v36 = vand.u32 4294901760, %v2089_v62  ;;  %v8098_v52 = vsub.f32 %v2090_v58, %v8064_v42  ;;  %v2083_v47 = vld [vmem:[%s411_s26] sm:$0xff]  ;;  %v8109_v8 = vand.u32 4294901760, %v8082_v33  ;;  %s8771_s26 = sld [smem:[#allocation8 + $0x7]] }
 0x2f8   : > { %6289 = vmatprep.subr.mxu1 %v8018_v4  ;;  %6247 = vmatpush3.msra.mxu0 %v7839_v9  ;;  %v2105_v21 = vmul.f32 0.0078125, %v2083_v47 }
 0x2f9   : > { %6290 = vmatpush3.msra.mxu1 %v8018_v4  ;;  %6248 = vmatprep.subr.mxu0 %v7846_v12  ;;  %v8095_v55 = vand.u32 4294901760, %v8062_v61  ;;  %v8112_v58 = vsub.f32 %v2089_v62, %v8084_v36  ;;  %v8123_v32 = vand.u32 4294901760, %v8098_v52  ;;  %v8129_v62 = vand.u32 4294901760, %v2289_v53 }
 0x2fa   : > { %6291 = vmatprep.subr.mxu1 %v8037_v10  ;;  %6249 = vmatpush3.msra.mxu0 %v7846_v12  ;;  %v2303_v45 = vsub.f32 %v8082_v33, %v8109_v8 }
 0x2fb   : > { %6292 = vmatpush3.msra.mxu1 %v8037_v10  ;;  %6250 = vmatprep.subr.mxu0 %v7856_v16  ;;  %v2106_v10 = vmul.f32 0.0078125, %v2084_v0  ;;  %9608 = vst [vmem:[#allocation22_spill] sm:$0xff] %v8129_v62  ;;  %v8134_v47 = vand.u32 4294901760, %v8112_v58  ;;  %v2310_v53 = vsub.f32 %v8098_v52, %v8123_v32 }
 0x2fc   : > { %6293 = vmatprep.subr.mxu1 %v8049_v19  ;;  %6251 = vmatpush3.msra.mxu0 %v7856_v16 }
 0x2fd   : > { %6294 = vmatpush3.msra.mxu1 %v8049_v19  ;;  %6252 = vmatprep.subr.mxu0 %v7864_v18  ;;  %v2296_v19 = vsub.f32 %v8062_v61, %v8095_v55 }
 0x2fe   : > { %6295 = vmatprep.subr.mxu1 %v8068_v26  ;;  %6253 = vmatpush3.msra.mxu0 %v7864_v18 }
 0x2ff   : > { %6296 = vmatpush3.msra.mxu1 %v8068_v26  ;;  %6254 = vmatprep.subr.mxu0 %v7882_v22  ;;  %v8140_v0 = vand.u32 4294901760, %v2296_v19  ;;  %v8148_v26 = vand.u32 4294901760, %v2106_v10  ;;  %v2317_v19 = vsub.f32 %v8112_v58, %v8134_v47 }
 0x300   : > { %6297 = vmatprep.subr.mxu1 %v8090_v40  ;;  %6255 = vmatpush3.msra.mxu0 %v7882_v22 }
 0x301   : > { %6298 = vmatpush3.msra.mxu1 %v8090_v40  ;;  %6256 = vmatprep.subr.mxu0 %v7897_v34  ;;  %v8144_v40 = vand.u32 4294901760, %v2105_v21 }
 0x302   : > { %6299 = vmatprep.subr.mxu1 %v8104_v3  ;;  %6257 = vmatpush3.msra.mxu0 %v7897_v34 }
 0x303   : > { %6300 = vmatpush3.msra.mxu1 %v8104_v3  ;;  %6258 = vmatprep.subr.mxu0 %v7909_v28  ;;  %v8152_v3 = vand.u32 4294901760, %v2303_v45  ;;  %v8163_v4 = vsub.f32 %v2105_v21, %v8144_v40  ;;  %v8168_v45 = vsub.f32 %v2106_v10, %v8148_v26 }
 0x304   : > { %6301 = vmatprep.subr.mxu1 %v8118_v39  ;;  %6259 = vmatpush3.msra.mxu0 %v7909_v28 }
 0x305   : > { %6302 = vmatpush3.msra.mxu1 %v8118_v39  ;;  %6260 = vmatprep.subr.mxu0 %v7923_v30  ;;  %v8160_v39 = vand.u32 4294901760, %v2310_v53  ;;  %v9531_v21 = vand.u32 4294901760, %v8163_v4  ;;  %v2200_v10 = vand.u32 4294901760, %v8168_v45 }
 0x306   : > { %6303 = vmatprep.subr.mxu1 %v8129_v62  ;;  %6261 = vmatpush3.msra.mxu0 %v7923_v30 }
 0x307   : > { %6304 = vmatpush3.msra.mxu1 %v8129_v62  ;;  %6262 = vmatprep.subr.mxu0 %v7950_v59  ;;  %v8172_v62 = vand.u32 4294901760, %v2317_v19  ;;  %v2191_v53 = vsub.f32 %v8163_v4, %v9531_v21  ;;  %v2201_v19 = vsub.f32 %v8168_v45, %v2200_v10 }
 0x308   : > { %6305 = vmatprep.subr.mxu1 %v8140_v0  ;;  %6263 = vmatpush3.msra.mxu0 %v7950_v59 }
 0x309   : > { %6306 = vmatpush3.msra.mxu1 %v8140_v0  ;;  %6264 = vmatprep.subr.mxu0 %v7969_v46  ;;  %9609 = vst [vmem:[#allocation23_spill] sm:$0xff] %v8172_v62  ;;  %v2192_v21 = vand.u32 4294901760, %v2191_v53 }
 0x30a   : > { %6307 = vmatprep.subr.mxu1 %v8152_v3  ;;  %6265 = vmatpush3.msra.mxu0 %v7969_v46 }
 0x30b   : > { %6308 = vmatpush3.msra.mxu1 %v8152_v3  ;;  %6266 = vmatprep.subr.mxu0 %v7988_v57 }
 0x30c   : > { %6309 = vmatprep.subr.mxu1 %v8160_v39  ;;  %6267 = vmatpush3.msra.mxu0 %v7988_v57 }
 0x30d   : > { %6310 = vmatpush3.msra.mxu1 %v8160_v39  ;;  %6268 = vmatprep.subr.mxu0 %v8007_v2 }
 0x30e   : > { %6311 = vmatprep.subr.mxu1 %v8172_v62  ;;  %6269 = vmatpush3.msra.mxu0 %v8007_v2 }
 0x30f   : > { %6312 = vmatpush3.msra.mxu1 %v8172_v62  ;;  %6270 = vmatprep.subr.mxu0 %v8026_v7  ;;  %v2202_v62 = vand.u32 4294901760, %v2201_v19 }
 0x310   : > { %6313 = vmatprep.mubr.f32.mxu1 %v8144_v40  ;;  %6351 = vmatprep.subr.mxu1 %v7839_v9 }
 0x311   : > { %6271 = vmatpush3.msra.mxu0 %v8026_v7  ;;  %6314 = vmatmul.mubr.f32.vlgmr.msra.gmra.mxu1 %v8148_v26 }
 0x312   : > { %6352 = vmatpush3.msra.mxu1 %v7839_v9  ;;  %6272 = vmatprep.subr.mxu0 %v8045_v14 }
 0x313   : > { %6353 = vmatprep.subr.mxu1 %v7846_v12  ;;  %6273 = vmatpush3.msra.mxu0 %v8045_v14 }
 0x314   : > { %6354 = vmatpush3.msra.mxu1 %v7846_v12  ;;  %6274 = vmatprep.subr.mxu0 %v8064_v42 }
 0x315   : > { %6355 = vmatprep.subr.mxu1 %v7856_v16  ;;  %6275 = vmatpush3.msra.mxu0 %v8064_v42 }
 0x316   : > { %6356 = vmatpush3.msra.mxu1 %v7856_v16  ;;  %6276 = vmatprep.subr.mxu0 %v8084_v36 }
 0x317   : > { %6357 = vmatprep.subr.mxu1 %v7864_v18  ;;  %6277 = vmatpush3.msra.mxu0 %v8084_v36 }
 0x318   : > { %6278 = vmatprep.mubr.f32.mxu0 %v2192_v21  ;;  %6358 = vmatpush3.msra.mxu1 %v7864_v18 }
 0x319   : > { %6279 = vmatmul.mubr.f32.vlgmr.msra.gmra.mxu0 %v2202_v62  ;;  %6316 = vmatprep.subr.mxu0 %v7854_v15  ;;  %v9610_v62 = vand.u32 4294901760, %v8163_v4 }
 0x31a   : > { %6359 = vmatprep.subr.mxu1 %v7882_v22  ;;  %6317 = vmatpush3.msra.mxu0 %v7854_v15 }
 0x31b   : > { %6360 = vmatpush3.msra.mxu1 %v7882_v22  ;;  %6318 = vmatprep.subr.mxu0 %v7862_v17 }
 0x31c   : > { %6361 = vmatprep.subr.mxu1 %v7897_v34  ;;  %6319 = vmatpush3.msra.mxu0 %v7862_v17 }
 0x31d   : > { %6362 = vmatpush3.msra.mxu1 %v7897_v34  ;;  %6320 = vmatprep.subr.mxu0 %v7875_v38 }
 0x31e   : > { %6363 = vmatprep.subr.mxu1 %v7909_v28  ;;  %6321 = vmatpush3.msra.mxu0 %v7875_v38 }
 0x31f   : > { %6364 = vmatpush3.msra.mxu1 %v7909_v28  ;;  %6322 = vmatprep.subr.mxu0 %v7893_v25 }
 0x320   : > { %6365 = vmatprep.subr.mxu1 %v7923_v30  ;;  %6323 = vmatpush3.msra.mxu0 %v7893_v25 }
 0x321   : > { %6366 = vmatpush3.msra.mxu1 %v7923_v30  ;;  %6324 = vmatprep.subr.mxu0 %v7914_v48 }
 0x322   : > { %6367 = vmatprep.subr.mxu1 %v7950_v59  ;;  %6325 = vmatpush3.msra.mxu0 %v7914_v48 }
 0x323   : > { %6368 = vmatpush3.msra.mxu1 %v7950_v59  ;;  %6326 = vmatprep.subr.mxu0 %v7931_v43 }
 0x324   : > { %6369 = vmatprep.subr.mxu1 %v7969_v46  ;;  %6327 = vmatpush3.msra.mxu0 %v7931_v43 }
 0x325   : > { %6370 = vmatpush3.msra.mxu1 %v7969_v46  ;;  %6328 = vmatprep.subr.mxu0 %v7940_v35 }
 0x326   : > { %6371 = vmatprep.subr.mxu1 %v7988_v57  ;;  %6329 = vmatpush3.msra.mxu0 %v7940_v35 }
 0x327   : > { %6372 = vmatpush3.msra.mxu1 %v7988_v57  ;;  %6330 = vmatprep.subr.mxu0 %v7959_v44 }
 0x328   : > { %6373 = vmatprep.subr.mxu1 %v8007_v2  ;;  %6331 = vmatpush3.msra.mxu0 %v7959_v44 }
 0x329   : > { %6374 = vmatpush3.msra.mxu1 %v8007_v2  ;;  %6332 = vmatprep.subr.mxu0 %v7986_v56 }
 0x32a   : > { %6375 = vmatprep.subr.mxu1 %v8026_v7  ;;  %6333 = vmatpush3.msra.mxu0 %v7986_v56 }
 0x32b   : > { %6376 = vmatpush3.msra.mxu1 %v8026_v7  ;;  %6334 = vmatprep.subr.mxu0 %v8005_v1 }
 0x32c   : > { %6377 = vmatprep.subr.mxu1 %v8045_v14  ;;  %6335 = vmatpush3.msra.mxu0 %v8005_v1 }
 0x32d   : > { %6378 = vmatpush3.msra.mxu1 %v8045_v14  ;;  %6336 = vmatprep.subr.mxu0 %v8024_v6 }
 0x32e   : > { %6379 = vmatprep.subr.mxu1 %v8064_v42  ;;  %6337 = vmatpush3.msra.mxu0 %v8024_v6 }
 0x32f   : > { %6380 = vmatpush3.msra.mxu1 %v8064_v42  ;;  %6338 = vmatprep.subr.mxu0 %v8043_v13 }
 0x330   : > { %6381 = vmatprep.subr.mxu1 %v8084_v36  ;;  %6339 = vmatpush3.msra.mxu0 %v8043_v13 }
 0x331   : > { %6382 = vmatpush3.msra.mxu1 %v8084_v36  ;;  %6340 = vmatprep.subr.mxu0 %v8062_v61 }
 0x332   : > { %6383 = vmatprep.mubr.f32.mxu1 %v9610_v62  ;;  %6421 = vmatprep.subr.mxu1 %v7839_v9 }
 0x333   : > { %6341 = vmatpush3.msra.mxu0 %v8062_v61  ;;  %6384 = vmatmul.mubr.f32.vlgmr.msra.gmra.mxu1 %v2200_v10 }
 0x334   : > { %6422 = vmatpush3.msra.mxu1 %v7839_v9  ;;  %6342 = vmatprep.subr.mxu0 %v8082_v33 }
 0x335   : > { %6423 = vmatprep.subr.mxu1 %v7846_v12  ;;  %6343 = vmatpush3.msra.mxu0 %v8082_v33 }
 0x336   : > { %6424 = vmatpush3.msra.mxu1 %v7846_v12  ;;  %6344 = vmatprep.subr.mxu0 %v8098_v52 }
 0x337   : > { %6425 = vmatprep.subr.mxu1 %v7856_v16  ;;  %6345 = vmatpush3.msra.mxu0 %v8098_v52 }
 0x338   : > { %6426 = vmatpush3.msra.mxu1 %v7856_v16  ;;  %6346 = vmatprep.subr.mxu0 %v8112_v58 }
 0x339   : > { %6427 = vmatprep.subr.mxu1 %v7864_v18  ;;  %6347 = vmatpush3.msra.mxu0 %v8112_v58 }
 0x33a   : > { %6348 = vmatprep.mubr.f32.mxu0 %v8163_v4  ;;  %6428 = vmatpush3.msra.mxu1 %v7864_v18  ;;  %v2794_v4 = vpop.xlane.xlu1 %2793 }
 0x33b   : > { %6349 = vmatmul.mubr.f32.vlgmr.msra.gmra.mxu0 %v8168_v45  ;;  %6386 = vmatprep.subr.mxu0 %v7872_v20  ;;  %v2797_v45 = vmax.f32 %v2794_v4, 1.0  ;;  %v9616_v4 = vld [vmem:[#allocation19_spill] sm:$0xff] }
 0x33c   : > { %6429 = vmatprep.subr.mxu1 %v7882_v22  ;;  %6387 = vmatpush3.msra.mxu0 %v7872_v20 }
 0x33d   : > { %6430 = vmatpush3.msra.mxu1 %v7882_v22  ;;  %6388 = vmatprep.subr.mxu0 %v7890_v24  ;;  %7172 = vrcp.f32 %v2797_v45  ;;  %v9617_v45 = vld [vmem:[#allocation20_spill] sm:$0xff] }
 0x33e   : > { %6431 = vmatprep.subr.mxu1 %v7897_v34  ;;  %6389 = vmatpush3.msra.mxu0 %v7890_v24  ;;  %v2796_v21 = vpop.xlane.xlu1 %2795 }
 0x33f   : > { %6432 = vmatpush3.msra.mxu1 %v7897_v34  ;;  %6390 = vmatprep.subr.mxu0 %v7907_v27  ;;  %v2798_v10 = vmax.f32 %v2796_v21, 1.0 }
 0x340   : > { %6433 = vmatprep.subr.mxu1 %v7909_v28  ;;  %6391 = vmatpush3.msra.mxu0 %v7907_v27 }
 0x341   : > { %6434 = vmatpush3.msra.mxu1 %v7909_v28  ;;  %6392 = vmatprep.subr.mxu0 %v7921_v29  ;;  %7174 = vrcp.f32 %v2798_v10  ;;  %v7232_v10 = vld [vmem:[%s7729_s23 + $0x8] sm:$0xff] }
 0x342   : > { %6435 = vmatprep.subr.mxu1 %v7923_v30  ;;  %6393 = vmatpush3.msra.mxu0 %v7921_v29 }
 0x343   : > { %6436 = vmatpush3.msra.mxu1 %v7923_v30  ;;  %6394 = vmatprep.subr.mxu0 %v7948_v49 }
 0x344   : > { %6437 = vmatprep.subr.mxu1 %v7950_v59  ;;  %6395 = vmatpush3.msra.mxu0 %v7948_v49 }
 0x345   : > { %6438 = vmatpush3.msra.mxu1 %v7950_v59  ;;  %6396 = vmatprep.subr.mxu0 %v7967_v41 }
 0x346   : > { %6439 = vmatprep.subr.mxu1 %v7969_v46  ;;  %6397 = vmatpush3.msra.mxu0 %v7967_v41 }
 0x347   : > { %6440 = vmatpush3.msra.mxu1 %v7969_v46  ;;  %6398 = vmatprep.subr.mxu0 %v7976_v51 }
 0x348   : > { %6441 = vmatprep.subr.mxu1 %v7988_v57  ;;  %6399 = vmatpush3.msra.mxu0 %v7976_v51 }
 0x349   : > { %6442 = vmatpush3.msra.mxu1 %v7988_v57  ;;  %6400 = vmatprep.subr.mxu0 %v7995_v63 }
 0x34a   : > { %6443 = vmatprep.subr.mxu1 %v8007_v2  ;;  %6401 = vmatpush3.msra.mxu0 %v7995_v63 }
 0x34b   : > { %6444 = vmatpush3.msra.mxu1 %v8007_v2  ;;  %6402 = vmatprep.subr.mxu0 %v8021_v5 }
 0x34c   : > { %6445 = vmatprep.subr.mxu1 %v8026_v7  ;;  %6403 = vmatpush3.msra.mxu0 %v8021_v5 }
 0x34d   : > { %6446 = vmatpush3.msra.mxu1 %v8026_v7  ;;  %6404 = vmatprep.subr.mxu0 %v8040_v11 }
 0x34e   : > { %6447 = vmatprep.subr.mxu1 %v8045_v14  ;;  %6405 = vmatpush3.msra.mxu0 %v8040_v11 }
 0x34f   : > { %6448 = vmatpush3.msra.mxu1 %v8045_v14  ;;  %6406 = vmatprep.subr.mxu0 %v8059_v23 }
 0x350   : > { %6449 = vmatprep.subr.mxu1 %v8064_v42  ;;  %6407 = vmatpush3.msra.mxu0 %v8059_v23 }
 0x351   : > { %6450 = vmatpush3.msra.mxu1 %v8064_v42  ;;  %6408 = vmatprep.subr.mxu0 %v8079_v31 }
 0x352   : > { %6451 = vmatprep.subr.mxu1 %v8084_v36  ;;  %6409 = vmatpush3.msra.mxu0 %v8079_v31 }
 0x353   : > { %6452 = vmatpush3.msra.mxu1 %v8084_v36  ;;  %6410 = vmatprep.subr.mxu0 %v8095_v55 }
 0x354   : > { %6453 = vmatprep.mubr.f32.mxu1 %v8144_v40  ;;  %6491 = vmatprep.subr.mxu1 %v7935_v54 }
 0x355   : > { %6411 = vmatpush3.msra.mxu0 %v8095_v55  ;;  %6454 = vmatmul.mubr.f32.vlgmr.msra.gmra.mxu1 %v8148_v26 }
 0x356   : > { %6492 = vmatpush3.msra.mxu1 %v7935_v54  ;;  %6412 = vmatprep.subr.mxu0 %v8109_v8  ;;  %v7173_v54 = vpop.eup %7172 }
 0x357   : > { %6493 = vmatprep.subr.mxu1 %v7954_v37  ;;  %6413 = vmatpush3.msra.mxu0 %v8109_v8  ;;  %v7175_v62 = vpop.eup %7174 }
 0x358   : > { %6494 = vmatpush3.msra.mxu1 %v7954_v37  ;;  %6414 = vmatprep.subr.mxu0 %v8123_v32  ;;  %v9611_v37 = vld [vmem:[#allocation15_spill] sm:$0xff] }
 0x359   : > { %6495 = vmatprep.subr.mxu1 %v7973_v50  ;;  %6415 = vmatpush3.msra.mxu0 %v8123_v32 }
 0x35a   : > { %6496 = vmatpush3.msra.mxu1 %v7973_v50  ;;  %6416 = vmatprep.subr.mxu0 %v8134_v47  ;;  %v9612_v50 = vld [vmem:[#allocation16_spill] sm:$0xff] }
 0x35b   : > { %6497 = vmatprep.subr.mxu1 %v7992_v60  ;;  %6417 = vmatpush3.msra.mxu0 %v8134_v47 }
 0x35c   : > { %6418 = vmatprep.mubr.f32.mxu0 %v8144_v40  ;;  %6498 = vmatpush3.msra.mxu1 %v7992_v60  ;;  %v9613_v40 = vld [vmem:[#allocation14_spill] sm:$0xff]  ;;  %v9614_v60 = vld [vmem:[#allocation17_spill] sm:$0xff] }
 0x35d   : > { %6419 = vmatmul.mubr.f32.vlgmr.msra.gmra.mxu0 %v8148_v26  ;;  %6456 = vmatprep.subr.mxu0 %v7839_v9  ;;  %v2800_v53 = vmul.f32 %v7173_v54, %v9613_v40  ;;  %v9615_v26 = vld [vmem:[#allocation18_spill] sm:$0xff]  ;;  %v2802_v54 = vmul.f32 %v7232_v10, %v7175_v62 }
 0x35e   : > { %6499 = vmatprep.subr.mxu1 %v9611_v37  ;;  %6457 = vmatpush3.msra.mxu0 %v7839_v9 }
 0x35f   : > { %6500 = vmatpush3.msra.mxu1 %v9611_v37  ;;  %6458 = vmatprep.subr.mxu0 %v7846_v12  ;;  %v8363_v19 = vand.u32 4294901760, %v2800_v53  ;;  %v9618_v37 = vld [vmem:[#allocation21_spill] sm:$0xff] }
 0x360   : > { %6501 = vmatprep.subr.mxu1 %v9612_v50  ;;  %6459 = vmatpush3.msra.mxu0 %v7846_v12 }
 0x361   : > { %6502 = vmatpush3.msra.mxu1 %v9612_v50  ;;  %6460 = vmatprep.subr.mxu0 %v7856_v16  ;;  %v2885_v21 = vsub.f32 %v2800_v53, %v8363_v19  ;;  %v9619_v50 = vld [vmem:[#allocation22_spill] sm:$0xff]  ;;  %v8385_v53 = vand.u32 4294901760, %v2802_v54 }
 0x362   : > { %6503 = vmatprep.subr.mxu1 %v9614_v60  ;;  %6461 = vmatpush3.msra.mxu0 %v7856_v16 }
 0x363   : > { %6504 = vmatpush3.msra.mxu1 %v9614_v60  ;;  %6462 = vmatprep.subr.mxu0 %v7864_v18  ;;  %v2886_v40 = vand.u32 4294901760, %v2885_v21 }
 0x364   : > { %6505 = vmatprep.subr.mxu1 %v9615_v26  ;;  %6463 = vmatpush3.msra.mxu0 %v7864_v18 }
 0x365   : > { %6506 = vmatpush3.msra.mxu1 %v9615_v26  ;;  %6464 = vmatprep.subr.mxu0 %v7882_v22  ;;  %v2887_v60 = vsub.f32 %v2885_v21, %v2886_v40  ;;  %v8396_v26 = vsub.f32 %v2802_v54, %v8385_v53 }
 0x366   : > { %6507 = vmatprep.subr.mxu1 %v9616_v4  ;;  %6465 = vmatpush3.msra.mxu0 %v7882_v22 }
 0x367   : > { %6508 = vmatpush3.msra.mxu1 %v9616_v4  ;;  %6466 = vmatprep.subr.mxu0 %v7897_v34  ;;  %v2888_v62 = vand.u32 4294901760, %v2887_v60 }
 0x368   : > { %6509 = vmatprep.subr.mxu1 %v9617_v45  ;;  %6467 = vmatpush3.msra.mxu0 %v7897_v34 }
 0x369   : > { %6510 = vmatpush3.msra.mxu1 %v9617_v45  ;;  %6468 = vmatprep.subr.mxu0 %v7909_v28  ;;  %v3669_v45 = vld [vmem:[#allocation6 + $0x58] sm:$0xff] }
 0x36a   : > { %6511 = vmatprep.subr.mxu1 %v9618_v37  ;;  %6469 = vmatpush3.msra.mxu0 %v7909_v28 }
 0x36b   : > { %6512 = vmatpush3.msra.mxu1 %v9618_v37  ;;  %6470 = vmatprep.subr.mxu0 %v7923_v30 }
 0x36c   : > { %6513 = vmatprep.subr.mxu1 %v9619_v50  ;;  %6471 = vmatpush3.msra.mxu0 %v7923_v30 }
 0x36d   : > { %6514 = vmatpush3.msra.mxu1 %v9619_v50  ;;  %6472 = vmatprep.subr.mxu0 %v7950_v59 }
 0x36e   : > { %6515 = vmatprep.subr.mxu1 %v8140_v0  ;;  %6473 = vmatpush3.msra.mxu0 %v7950_v59 }
 0x36f   : > { %6516 = vmatpush3.msra.mxu1 %v8140_v0  ;;  %6474 = vmatprep.subr.mxu0 %v7969_v46  ;;  %v9620_v0 = vld [vmem:[#allocation23_spill] sm:$0xff] }
 0x370   : > { %6517 = vmatprep.subr.mxu1 %v8152_v3  ;;  %6475 = vmatpush3.msra.mxu0 %v7969_v46 }
 0x371   : > { %6518 = vmatpush3.msra.mxu1 %v8152_v3  ;;  %6476 = vmatprep.subr.mxu0 %v7988_v57  ;;  %v2896_v3 = vand.u32 4294901760, %v8396_v26 }
 0x372   : > { %6519 = vmatprep.subr.mxu1 %v8160_v39  ;;  %6477 = vmatpush3.msra.mxu0 %v7988_v57 }
 0x373   : > { %6520 = vmatpush3.msra.mxu1 %v8160_v39  ;;  %6523 = vmatprep.mubr.f32.mxu1 %v8363_v19  ;;  %v2897_v39 = vsub.f32 %v8396_v26, %v2896_v3 }
 0x374   : > { %6478 = vmatprep.subr.mxu0 %v8007_v2  ;;  %6521 = vmatprep.subr.mxu1 %v9620_v0 }
 0x375   : > { %6479 = vmatpush3.msra.mxu0 %v8007_v2  ;;  %6522 = vmatpush3.msra.mxu1 %v9620_v0  ;;  %v2898_v4 = vand.u32 4294901760, %v2897_v39  ;;  %v3666_v0 = vld [vmem:[#allocation6 + $0x40] sm:$0xff] }
 0x376   : > { %6480 = vmatprep.subr.mxu0 %v8026_v7  ;;  %6524 = vmatmul.mubr.f32.vlgmr.msra.gmra.mxu1 %v8385_v53 }
 0x377   : > { %6561 = vmatprep.subr.mxu1 %v7839_v9  ;;  %6481 = vmatpush3.msra.mxu0 %v8026_v7 }
 0x378   : > { %6488 = vmatprep.mubr.f32.mxu0 %v2888_v62  ;;  %6562 = vmatpush3.msra.mxu1 %v7839_v9  ;;  %v3665_v62 = vld [vmem:[#allocation6 + $0x38] sm:$0xff] }
 0x379   : > { %6593 = vmatprep.mubr.f32.mxu1 %v2886_v40  ;;  %6482 = vmatprep.subr.mxu0 %v8045_v14  ;;  %v3668_v40 = vld [vmem:[#allocation6 + $0x50] sm:$0xff] }
 0x37a   : > { %6563 = vmatprep.subr.mxu1 %v7846_v12  ;;  %6483 = vmatpush3.msra.mxu0 %v8045_v14  ;;  %v8608_v60 = vand.u32 4294901760, %v3668_v40 }
 0x37b   : > { %6564 = vmatpush3.msra.mxu1 %v7846_v12  ;;  %6484 = vmatprep.subr.mxu0 %v8064_v42 }
 0x37c   : > { %6565 = vmatprep.subr.mxu1 %v7856_v16  ;;  %6485 = vmatpush3.msra.mxu0 %v8064_v42 }
 0x37d   : > { %6566 = vmatpush3.msra.mxu1 %v7856_v16  ;;  %6486 = vmatprep.subr.mxu0 %v8084_v36 }
 0x37e   : > { %6567 = vmatprep.subr.mxu1 %v7864_v18  ;;  %6487 = vmatpush3.msra.mxu0 %v8084_v36 }
 0x37f   : > { %6568 = vmatpush3.msra.mxu1 %v7864_v18  ;;  %6489 = vmatmul.mubr.f32.vlgmr.msra.gmra.mxu0 %v2898_v4 }
 0x380   : > { %6526 = vmatprep.subr.mxu0 %v7854_v15  ;;  %6569 = vmatprep.subr.mxu1 %v7882_v22 }
 0x381   : > { %6527 = vmatpush3.msra.mxu0 %v7854_v15  ;;  %6558 = vmatprep.mubr.f32.mxu0 %v2885_v21  ;;  %v8593_v21 = vand.u32 4294901760, %v3669_v45 }
 0x382   : > { %6570 = vmatpush3.msra.mxu1 %v7882_v22  ;;  %6528 = vmatprep.subr.mxu0 %v7862_v17 }
 0x383   : > { %6571 = vmatprep.subr.mxu1 %v7897_v34  ;;  %6529 = vmatpush3.msra.mxu0 %v7862_v17 }
 0x384   : > { %6572 = vmatpush3.msra.mxu1 %v7897_v34  ;;  %6530 = vmatprep.subr.mxu0 %v7875_v38 }
 0x385   : > { %6573 = vmatprep.subr.mxu1 %v7909_v28  ;;  %6531 = vmatpush3.msra.mxu0 %v7875_v38 }
 0x386   : > { %6574 = vmatpush3.msra.mxu1 %v7909_v28  ;;  %6532 = vmatprep.subr.mxu0 %v7893_v25 }
 0x387   : > { %6575 = vmatprep.subr.mxu1 %v7923_v30  ;;  %6533 = vmatpush3.msra.mxu0 %v7893_v25 }
 0x388   : > { %6576 = vmatpush3.msra.mxu1 %v7923_v30  ;;  %6534 = vmatprep.subr.mxu0 %v7914_v48 }
 0x389   : > { %6577 = vmatprep.subr.mxu1 %v7950_v59  ;;  %6535 = vmatpush3.msra.mxu0 %v7914_v48 }
 0x38a   : > { %6578 = vmatpush3.msra.mxu1 %v7950_v59  ;;  %6536 = vmatprep.subr.mxu0 %v7931_v43 }
 0x38b   : > { %6579 = vmatprep.subr.mxu1 %v7969_v46  ;;  %6537 = vmatpush3.msra.mxu0 %v7931_v43 }
 0x38c   : > { %6580 = vmatpush3.msra.mxu1 %v7969_v46  ;;  %6538 = vmatprep.subr.mxu0 %v7940_v35 }
 0x38d   : > { %6581 = vmatprep.subr.mxu1 %v7988_v57  ;;  %6539 = vmatpush3.msra.mxu0 %v7940_v35 }
 0x38e   : > { %6582 = vmatpush3.msra.mxu1 %v7988_v57  ;;  %6540 = vmatprep.subr.mxu0 %v7959_v44 }
 0x38f   : > { %6583 = vmatprep.subr.mxu1 %v8007_v2  ;;  %6541 = vmatpush3.msra.mxu0 %v7959_v44  ;;  %v3557_v44 = vstv %s8528_s18  ;;  %s8777_s18 = sld [smem:[#allocation8 + $0xb]] }
 0x390   : > { %6584 = vmatpush3.msra.mxu1 %v8007_v2  ;;  %6542 = vmatprep.subr.mxu0 %v7986_v56 }
 0x391   : > { %6585 = vmatprep.subr.mxu1 %v8026_v7  ;;  %6543 = vmatpush3.msra.mxu0 %v7986_v56 }
 0x392   : > { %6586 = vmatpush3.msra.mxu1 %v8026_v7  ;;  %6544 = vmatprep.subr.mxu0 %v8005_v1 }
 0x393   : > { %6587 = vmatprep.subr.mxu1 %v8045_v14  ;;  %6545 = vmatpush3.msra.mxu0 %v8005_v1 }
 0x394   : > { %6588 = vmatpush3.msra.mxu1 %v8045_v14  ;;  %6546 = vmatprep.subr.mxu0 %v8024_v6 }
 0x395   : > { %6589 = vmatprep.subr.mxu1 %v8064_v42  ;;  %6547 = vmatpush3.msra.mxu0 %v8024_v6 }
 0x396   : > { %6590 = vmatpush3.msra.mxu1 %v8064_v42  ;;  %6548 = vmatprep.subr.mxu0 %v8043_v13 }
 0x397   : > { %6591 = vmatprep.subr.mxu1 %v8084_v36  ;;  %6549 = vmatpush3.msra.mxu0 %v8043_v13 }
 0x398   : > { %6592 = vmatpush3.msra.mxu1 %v8084_v36  ;;  %6550 = vmatprep.subr.mxu0 %v8062_v61  ;;  %v6193_v15 = vpop.f32.mrf.mxu1 }
 0x399   : > { %6594 = vmatmul.mubr.f32.vlgmr.msra.gmra.mxu1 %v2896_v3  ;;  %6631 = vmatprep.subr.mxu1 %v7839_v9 }
 0x39a   : > { %6551 = vmatpush3.msra.mxu0 %v8062_v61  ;;  %6632 = vmatpush3.msra.mxu1 %v7839_v9  ;;  %v1724_v38 = vpop.f32.mrf.mxu1 }
 0x39b   : > { %6663 = vmatprep.mubr.f32.mxu1 %v8363_v19  ;;  %6552 = vmatprep.subr.mxu0 %v8082_v33 }
 0x39c   : > { %6633 = vmatprep.subr.mxu1 %v7846_v12  ;;  %6553 = vmatpush3.msra.mxu0 %v8082_v33 }
 0x39d   : > { %6634 = vmatpush3.msra.mxu1 %v7846_v12  ;;  %6554 = vmatprep.subr.mxu0 %v8098_v52  ;;  %v5459_v12 = vld [vmem:[%s9503_s4 + $0x68] ss:$0 sm:$0xff] }
 0x39e   : > { %6635 = vmatprep.subr.mxu1 %v7856_v16  ;;  %6555 = vmatpush3.msra.mxu0 %v8098_v52  ;;  %v3670_v52 = vld [vmem:[#allocation6 + $0x60] sm:$0xff] }
 0x39f   : > { %6636 = vmatpush3.msra.mxu1 %v7856_v16  ;;  %6556 = vmatprep.subr.mxu0 %v8112_v58 }
 0x3a0   : > { %6637 = vmatprep.subr.mxu1 %v7864_v18  ;;  %6557 = vmatpush3.msra.mxu0 %v8112_v58  ;;  %v6180_v9 = vpop.f32.mrf.mxu0 }
 0x3a1   : > { %6638 = vmatpush3.msra.mxu1 %v7864_v18  ;;  %6559 = vmatmul.mubr.f32.vlgmr.msra.gmra.mxu0 %v8396_v26  ;;  %v1629_v17 = vadd.f32 %v6180_v9, %v5459_v12  ;;  %v3667_v26 = vld [vmem:[#allocation6 + $0x48] sm:$0xff] }
 0x3a2   : > { %6596 = vmatprep.subr.mxu0 %v7872_v20  ;;  %6639 = vmatprep.subr.mxu1 %v7882_v22  ;;  %v1618_v16 = vpop.f32.mrf.mxu0  ;;  %v8616_v9 = vand.u32 4294901760, %v3667_v26 }
 0x3a3   : > { %6597 = vmatpush3.msra.mxu0 %v7872_v20  ;;  %6628 = vmatprep.mubr.f32.mxu0 %v8363_v19  ;;  %v1619_v20 = vadd.f32 %v5459_v12, %v1618_v16  ;;  %v8590_v19 = vand.u32 4294901760, %v3670_v52  ;;  %v3664_v12 = vld [vmem:[#allocation6 + $0x30] sm:$0xff]  ;;  %v8623_v16 = vsub.f32 %v3668_v40, %v8608_v60 }
 0x3a4   : > { %6640 = vmatpush3.msra.mxu1 %v7882_v22  ;;  %6598 = vmatprep.subr.mxu0 %v7890_v24  ;;  %v1731_v22 = vadd.f32 %v6193_v15, %v1629_v17  ;;  %v8625_v17 = vand.u32 4294901760, %v3666_v0 }
 0x3a5   : > { %6641 = vmatprep.subr.mxu1 %v7897_v34  ;;  %6599 = vmatpush3.msra.mxu0 %v7890_v24  ;;  %v6219_v24 = vpop.f32.mrf.mxu1  ;;  %v8602_v50 = vsub.f32 %v3670_v52, %v8590_v19  ;;  %v3658_v52 = vld [vmem:[#allocation6] sm:$0xff] }
 0x3a6   : > { %6642 = vmatpush3.msra.mxu1 %v7897_v34  ;;  %6600 = vmatprep.subr.mxu0 %v7907_v27 }
 0x3a7   : > { %6643 = vmatprep.subr.mxu1 %v7909_v28  ;;  %6601 = vmatpush3.msra.mxu0 %v7907_v27  ;;  %v1725_v27 = vadd.f32 %v1724_v38, %v1619_v20  ;;  %v1897_v48 = vpop.f32.mrf.mxu1  ;;  %v8614_v4 = vand.u32 4294901760, %v8602_v50  ;;  %v3663_v20 = vld [vmem:[#allocation6 + $0x28] sm:$0xff] }
 0x3a8   : > { %6644 = vmatpush3.msra.mxu1 %v7909_v28  ;;  %6602 = vmatprep.subr.mxu0 %v7921_v29 }
 0x3a9   : > { %6645 = vmatprep.subr.mxu1 %v7923_v30  ;;  %6603 = vmatpush3.msra.mxu0 %v7921_v29  ;;  %9624 = vst [vmem:[#allocation17_spill] sm:$0xff] %v8614_v4 }
 0x3aa   : > { %6646 = vmatpush3.msra.mxu1 %v7923_v30  ;;  %6604 = vmatprep.subr.mxu0 %v7948_v49 }
 0x3ab   : > { %6647 = vmatprep.subr.mxu1 %v7950_v59  ;;  %6605 = vmatpush3.msra.mxu0 %v7948_v49  ;;  %v6206_v18 = vpop.f32.mrf.mxu0 }
 0x3ac   : > { %6648 = vmatpush3.msra.mxu1 %v7950_v59  ;;  %6606 = vmatprep.subr.mxu0 %v7967_v41  ;;  %v1820_v34 = vadd.f32 %v6206_v18, %v1731_v22  ;;  %v8627_v18 = vand.u32 4294901760, %v3665_v62  ;;  %v3800_v22 = vsub.f32 %v8602_v50, %v8614_v4 }
 0x3ad   : > { %6649 = vmatprep.subr.mxu1 %v7969_v46  ;;  %6607 = vmatpush3.msra.mxu0 %v7967_v41  ;;  %v1812_v25 = vpop.f32.mrf.mxu0  ;;  %v3501_v41 = vstv %s8532_s22  ;;  %s8808_s22 = sld [smem:[#allocation8 + $0xf]] }
 0x3ae   : > { %6650 = vmatpush3.msra.mxu1 %v7969_v46  ;;  %6608 = vmatprep.subr.mxu0 %v7976_v51  ;;  %v1813_v28 = vadd.f32 %v1812_v25, %v1725_v27  ;;  %v1906_v29 = vadd.f32 %v6219_v24, %v1820_v34  ;;  %v8633_v24 = vsub.f32 %v3667_v26, %v8616_v9  ;;  %v8636_v25 = vand.u32 4294901760, %v3664_v12 }
 0x3af   : > { %6651 = vmatprep.subr.mxu1 %v7988_v57  ;;  %6609 = vmatpush3.msra.mxu0 %v7976_v51  ;;  %v6245_v30 = vpop.f32.mrf.mxu1  ;;  %v8641_v27 = vand.u32 4294901760, %v8623_v16 }
 0x3b0   : > { %6652 = vmatpush3.msra.mxu1 %v7988_v57  ;;  %6610 = vmatprep.subr.mxu0 %v7995_v63  ;;  %v1898_v49 = vadd.f32 %v1897_v48, %v1813_v28  ;;  %v8644_v28 = vsub.f32 %v3666_v0, %v8625_v17  ;;  %v8647_v48 = vsub.f32 %v3665_v62, %v8627_v18  ;;  %v8711_v62 = vand.u32 4294901760, %v3658_v52 }
 0x3b1   : > { %6653 = vmatprep.subr.mxu1 %v8007_v2  ;;  %6611 = vmatpush3.msra.mxu0 %v7995_v63  ;;  %v2073_v56 = vpop.f32.mrf.mxu1  ;;  %9626 = vst [vmem:[#allocation19_spill] sm:$0xff] %v8641_v27 }
 0x3b2   : > { %6654 = vmatpush3.msra.mxu1 %v8007_v2  ;;  %6612 = vmatprep.subr.mxu0 %v8021_v5  ;;  %9637 = vst [vmem:[#allocation30_spill] sm:$0xff] %v8711_v62 }
 0x3b3   : > { %6655 = vmatprep.subr.mxu1 %v8026_v7  ;;  %6613 = vmatpush3.msra.mxu0 %v8021_v5  ;;  %v7385_v5 = vmov 1  }
 0x3b4   : > { %6656 = vmatpush3.msra.mxu1 %v8026_v7  ;;  %6614 = vmatprep.subr.mxu0 %v8040_v11  ;;  %v3613_v7 = vstv %s5472_s20  ;;  %s8810_s20 = sld [smem:[#allocation8 + $0xc]] }
 0x3b5   : > { %6657 = vmatprep.subr.mxu1 %v8045_v14  ;;  %6615 = vmatpush3.msra.mxu0 %v8040_v11 }
 0x3b6   : > { %6658 = vmatpush3.msra.mxu1 %v8045_v14  ;;  %6616 = vmatprep.subr.mxu0 %v8059_v23 }
 0x3b7   : > { %6659 = vmatprep.subr.mxu1 %v8064_v42  ;;  %6617 = vmatpush3.msra.mxu0 %v8059_v23  ;;  %v6232_v43 = vpop.f32.mrf.mxu0  ;;  %v3672_v23 = vld [vmem:[#allocation6 + $0x70] sm:$0xff] }
 0x3b8   : > { %6660 = vmatpush3.msra.mxu1 %v8064_v42  ;;  %6618 = vmatprep.subr.mxu0 %v8079_v31  ;;  %v1998_v35 = vadd.f32 %v6232_v43, %v1906_v29  ;;  %v8568_v42 = vand.u32 4294901760, %v3672_v23  ;;  %v3662_v29 = vld [vmem:[#allocation6 + $0x20] sm:$0xff]  ;;  %v8651_v43 = vand.u32 4294901760, %v8633_v24 }
 0x3b9   : > { %6661 = vmatprep.subr.mxu1 %v8084_v36  ;;  %6619 = vmatpush3.msra.mxu0 %v8079_v31  ;;  %v1991_v59 = vpop.f32.mrf.mxu0  ;;  %v3671_v31 = vld [vmem:[#allocation6 + $0x68] sm:$0xff] }
 0x3ba   : > { %6662 = vmatpush3.msra.mxu1 %v8084_v36  ;;  %6620 = vmatprep.subr.mxu0 %v8095_v55  ;;  %v2080_v46 = vadd.f32 %v6245_v30, %v1998_v35  ;;  %v1992_v51 = vadd.f32 %v1991_v59, %v1898_v49  ;;  %v8576_v36 = vsub.f32 %v3672_v23, %v8568_v42  ;;  %v3801_v30 = vand.u32 4294901760, %v3800_v22  ;;  %v3661_v59 = vld [vmem:[#allocation6 + $0x18] sm:$0xff] }
 0x3bb   : > { %6664 = vmatmul.mubr.f32.vlgmr.msra.gmra.mxu1 %v8385_v53  ;;  %6621 = vmatpush3.msra.mxu0 %v8095_v55  ;;  %v8579_v55 = vand.u32 4294901760, %v3671_v31  ;;  %9627 = vst [vmem:[#allocation20_spill] sm:$0xff] %v8651_v43  ;;  %v8654_v35 = vsub.f32 %v3664_v12, %v8636_v25  ;;  %v8657_v49 = vand.u32 4294901760, %v3663_v20 }
 0x3bc   : > { %6622 = vmatprep.subr.mxu0 %v8109_v8  ;;  %v2074_v57 = vadd.f32 %v2073_v56, %v1992_v51  ;;  %v3559_v63 = vmul.f32 %v3557_v44, %v2080_v46  ;;  %v3503_v1 = vmul.f32 %v3501_v41, %v2080_v46  ;;  %v3615_v13 = vmul.f32 %v3613_v7, %v2080_v46 }
 0x3bd   : > { %6623 = vmatpush3.msra.mxu0 %v8109_v8  ;;  %v8585_v58 = vand.u32 4294901760, %v8576_v36  ;;  %v8665_v51 = vand.u32 4294901760, %v8647_v48  ;;  %v3821_v56 = vsub.f32 %v8633_v24, %v8651_v43 }
 0x3be   : > { %6624 = vmatprep.subr.mxu0 %v8123_v32  ;;  %3567 = vperm.xlu0 %7160, %v3559_v63   ;;  %v3502_v2 = vmul.f32 %v3501_v41, %v2074_v57  ;;  %v3558_v6 = vmul.f32 %v3557_v44, %v2074_v57  ;;  %v3614_v11 = vmul.f32 %v3613_v7, %v2074_v57  ;;  %v8682_v7 = vand.u32 4294901760, %v3661_v59 }
 0x3bf   : > { %6625 = vmatpush3.msra.mxu0 %v8123_v32  ;;  %3511 = vperm.xlu1 %7161, %v3503_v1   ;;  %v3673_v32 = vld [vmem:[#allocation6 + $0x78] sm:$0xff]  ;;  %9622 = vst [vmem:[#allocation16_spill] sm:$0xff] %v8585_v58  ;;  %v3786_v54 = vsub.f32 %v8576_v36, %v8585_v58  ;;  %v3814_v41 = vsub.f32 %v8623_v16, %v8641_v27  ;;  %9629 = vst [vmem:[#allocation22_spill] sm:$0xff] %v8665_v51  ;;  %v8677_v1 = vand.u32 4294901760, %v3662_v29 }
 0x3c0   : > { %6626 = vmatprep.subr.mxu0 %v8134_v47  ;;  %v8563_v14 = vand.u32 4294901760, %v3673_v32  ;;  %v8674_v63 = vsub.f32 %v3663_v20, %v8657_v49 }
 0x3c1   : > { %6627 = vmatpush3.msra.mxu0 %v8134_v47  ;;  %v8588_v47 = vsub.f32 %v3671_v31, %v8579_v55  ;;  %v3787_v3 = vand.u32 4294901760, %v3786_v54  ;;  %v8690_v31 = vsub.f32 %v3662_v29, %v8677_v1  ;;  %v8730_v29 = vsub.f32 %v3658_v52, %v8711_v62 }
 0x3c2   : > { %6629 = vmatmul.mubr.f32.vlgmr.msra.gmra.mxu0 %v8385_v53  ;;  %3506 = vperm.xlu0 %7160, %v3502_v2   ;;  %v8566_v61 = vsub.f32 %v3673_v32, %v8563_v14  ;;  %v8606_v53 = vsub.f32 %v3669_v45, %v8593_v21  ;;  %v3660_v2 = vld [vmem:[#allocation6 + $0x10] sm:$0xff]  ;;  %v3835_v32 = vsub.f32 %v8647_v48, %v8665_v51  ;;  %v8687_v23 = vand.u32 4294901760, %v8674_v63 }
 0x3c3   : > { %7162 = vset.pattern.permute.xlu1 %v7385_v5  ;;  %6666 = vmatprep.subr.mxu0 %v8563_v14  ;;  %v8599_v37 = vand.u32 4294901760, %v8588_v47  ;;  %9632 = vst [vmem:[#allocation25_spill] sm:$0xff] %v8690_v31  ;;  %v8697_v45 = vand.u32 4294901760, %v3660_v2  ;;  %v8702_v40 = vand.u32 4294901760, %v8690_v31  ;;  %9641 = vst [vmem:[#allocation34_spill] sm:$0xff] %v8730_v29 }
 0x3c4   : > { %4360 = vperm.xlu1 %7162, %v2074_v57   ;;  %6667 = vmatpush3.msra.mxu0 %v8563_v14  ;;  %v8573_v33 = vand.u32 4294901760, %v8566_v61  ;;  %v8620_v15 = vand.u32 4294901760, %v8606_v53  ;;  %v8671_v57 = vand.u32 4294901760, %v8654_v35  ;;  %9631 = vst [vmem:[#allocation24_spill] sm:$0xff] %v8687_v23 }
 0x3c5   : > { %6668 = vmatprep.subr.mxu0 %v8568_v42  ;;  %9623 = vst [vmem:[#allocation14_spill] sm:$0xff] %v8599_v37  ;;  %v3793_v39 = vsub.f32 %v8588_v47, %v8599_v37  ;;  %9634 = vst [vmem:[#allocation27_spill] sm:$0xff] %v8702_v40  ;;  %v8708_v0 = vsub.f32 %v3660_v2, %v8697_v45  ;;  %v3856_v22 = vsub.f32 %v8690_v31, %v8702_v40 }
 0x3c6   : > { %3562 = vperm.xlu0 %7160, %v3558_v6   ;;  %9621 = vst [vmem:[#allocation15_spill] sm:$0xff] %v8573_v33  ;;  %6669 = vmatpush3.msra.mxu0 %v8568_v42  ;;  %v3779_v8 = vsub.f32 %v8566_v61, %v8573_v33  ;;  %9625 = vst [vmem:[#allocation18_spill] sm:$0xff] %v8620_v15  ;;  %v3807_v34 = vsub.f32 %v8606_v53, %v8620_v15  ;;  %v8743_v2 = vand.u32 4294901760, %v8730_v29 }
 0x3c7   : > { %6670 = vmatprep.subr.mxu0 %v8579_v55  ;;  %v3794_v38 = vand.u32 4294901760, %v3793_v39  ;;  %9630 = vst [vmem:[#allocation23_spill] sm:$0xff] %v8671_v57  ;;  %v3842_v54 = vsub.f32 %v8654_v35, %v8671_v57  ;;  %9636 = vst [vmem:[#allocation29_spill] sm:$0xff] %v8708_v0  ;;  %v3849_v39 = vsub.f32 %v8674_v63, %v8687_v23 }
 0x3c8   : > { %6671 = vmatpush3.msra.mxu0 %v8579_v55  ;;  %v3780_v10 = vand.u32 4294901760, %v3779_v8  ;;  %v3808_v44 = vand.u32 4294901760, %v3807_v34  ;;  %v8694_v8 = vsub.f32 %v3661_v59, %v8682_v7  ;;  %v8726_v34 = vand.u32 4294901760, %v8708_v0  ;;  %9643 = vst [vmem:[#allocation36_spill] sm:$0xff] %v8743_v2 }
 0x3c9   : > { %6672 = vmatprep.subr.mxu0 %v8590_v19 }
 0x3ca   : > { %3618 = vperm.xlu0 %7160, %v3614_v11   ;;  %6673 = vmatpush3.msra.mxu0 %v8590_v19  ;;  %v3659_v11 = vld [vmem:[#allocation6 + $0x8] sm:$0xff]  ;;  %9633 = vst [vmem:[#allocation26_spill] sm:$0xff] %v8694_v8  ;;  %v8716_v12 = vand.u32 4294901760, %v8694_v8  ;;  %9640 = vst [vmem:[#allocation33_spill] sm:$0xff] %v8726_v34 }
 0x3cb   : > { %6701 = vmatprep.subr.mxu1 %v3780_v10  ;;  %6674 = vmatprep.subr.mxu0 %v8593_v21  ;;  %v8705_v26 = vand.u32 4294901760, %v3659_v11 }
 0x3cc   : > { %6702 = vmatpush3.msra.mxu1 %v3780_v10  ;;  %6675 = vmatpush3.msra.mxu0 %v8593_v21  ;;  %9638 = vst [vmem:[#allocation31_spill] sm:$0xff] %v8716_v12  ;;  %v3863_v59 = vsub.f32 %v8694_v8, %v8716_v12 }
 0x3cd   : > { %6703 = vmatprep.subr.mxu1 %v3787_v3  ;;  %6676 = vmatprep.subr.mxu0 %v8608_v60  ;;  %9635 = vst [vmem:[#allocation28_spill] sm:$0xff] %v8705_v26  ;;  %v8720_v20 = vsub.f32 %v3659_v11, %v8705_v26 }
 0x3ce   : > { %3623 = vperm.xlu0 %7160, %v3615_v13   ;;  %6704 = vmatpush3.msra.mxu1 %v3787_v3  ;;  %v3822_v13 = vand.u32 4294901760, %v3821_v56  ;;  %v3836_v3 = vand.u32 4294901760, %v3835_v32  ;;  %v3870_v56 = vsub.f32 %v8708_v0, %v8726_v34 }
 0x3cf   : > { %6677 = vmatpush3.msra.mxu0 %v8608_v60  ;;  %6705 = vmatprep.subr.mxu1 %v3794_v38  ;;  %9639 = vst [vmem:[#allocation32_spill] sm:$0xff] %v8720_v20 }
 0x3d0   : > { %6678 = vmatprep.subr.mxu0 %v8616_v9  ;;  %6706 = vmatpush3.msra.mxu1 %v3794_v38  ;;  %v3843_v38 = vand.u32 4294901760, %v3842_v54  ;;  %v3871_v11 = vand.u32 4294901760, %v3870_v56 }
 0x3d1   : > { %6679 = vmatpush3.msra.mxu0 %v8616_v9  ;;  %6707 = vmatprep.subr.mxu1 %v3801_v30  ;;  %v6315_v54 = vpop.f32.mrf.mxu1 }
 0x3d2   : > { %7163 = vset.pattern.permute.xlu0 %v7385_v5  ;;  %6680 = vmatprep.subr.mxu0 %v8625_v17  ;;  %v3815_v5 = vand.u32 4294901760, %v3814_v41  ;;  %v3857_v41 = vand.u32 4294901760, %v3856_v22 }
 0x3d3   : > { %4365 = vperm.xlu0 %7163, %v2080_v46   ;;  %v8662_v46 = vand.u32 4294901760, %v8644_v28  ;;  %6708 = vmatpush3.msra.mxu1 %v3801_v30  ;;  %v3850_v30 = vand.u32 4294901760, %v3849_v39 }
 0x3d4   : > { %6681 = vmatpush3.msra.mxu0 %v8625_v17  ;;  %6709 = vmatprep.subr.mxu1 %v3808_v44 }
 0x3d5   : > { %9628 = vst [vmem:[#allocation21_spill] sm:$0xff] %v8662_v46  ;;  %v3828_v6 = vsub.f32 %v8644_v28, %v8662_v46  ;;  %6682 = vmatprep.subr.mxu0 %v8627_v18  ;;  %6710 = vmatpush3.msra.mxu1 %v3808_v44  ;;  %v8736_v44 = vand.u32 4294901760, %v8720_v20 }
 0x3d6   : > { %6683 = vmatpush3.msra.mxu0 %v8627_v18  ;;  %6711 = vmatprep.subr.mxu1 %v3815_v5 }
 0x3d7   : > { %v3829_v10 = vand.u32 4294901760, %v3828_v6  ;;  %6684 = vmatprep.subr.mxu0 %v8636_v25  ;;  %6712 = vmatpush3.msra.mxu1 %v3815_v5  ;;  %9642 = vst [vmem:[#allocation35_spill] sm:$0xff] %v8736_v44  ;;  %v3864_v5 = vand.u32 4294901760, %v3863_v59  ;;  %v3877_v6 = vsub.f32 %v8720_v20, %v8736_v44 }
 0x3d8   : > { %6685 = vmatpush3.msra.mxu0 %v8636_v25  ;;  %6713 = vmatprep.subr.mxu1 %v3822_v13 }
 0x3d9   : > { %6686 = vmatprep.subr.mxu0 %v8657_v49  ;;  %6714 = vmatpush3.msra.mxu1 %v3822_v13  ;;  %v3884_v13 = vsub.f32 %v8730_v29, %v8743_v2  ;;  %v3878_v32 = vand.u32 4294901760, %v3877_v6 }
 0x3da   : > { %6687 = vmatpush3.msra.mxu0 %v8657_v49  ;;  %6715 = vmatprep.subr.mxu1 %v3829_v10 }
 0x3db   : > { %6688 = vmatprep.subr.mxu0 %v8677_v1  ;;  %6716 = vmatpush3.msra.mxu1 %v3829_v10  ;;  %v3885_v52 = vand.u32 4294901760, %v3884_v13  ;;  %v6280_v10 = vpop.f32.mrf.mxu0 }
 0x3dc   : > { %6689 = vmatpush3.msra.mxu0 %v8677_v1  ;;  %6717 = vmatprep.subr.mxu1 %v3836_v3 }
 0x3dd   : > { %6690 = vmatprep.subr.mxu0 %v8682_v7  ;;  %6718 = vmatpush3.msra.mxu1 %v3836_v3  ;;  %v2194_v3 = vpop.f32.mrf.mxu0 }
 0x3de   : > { %6691 = vmatpush3.msra.mxu0 %v8682_v7  ;;  %6719 = vmatprep.subr.mxu1 %v3843_v38 }
 0x3df   : > { %6692 = vmatprep.subr.mxu0 %v8697_v45  ;;  %6720 = vmatpush3.msra.mxu1 %v3843_v38  ;;  %v2355_v38 = vpop.f32.mrf.mxu1 }
 0x3e0   : > { %6693 = vmatpush3.msra.mxu0 %v8697_v45  ;;  %6721 = vmatprep.subr.mxu1 %v3850_v30  ;;  %v2356_v44 = vadd.f32 %v2355_v38, %v2194_v3 }
 0x3e1   : > { %6694 = vmatprep.subr.mxu0 %v8705_v26  ;;  %6722 = vmatpush3.msra.mxu1 %v3850_v30 }
 0x3e2   : > { %6695 = vmatpush3.msra.mxu0 %v8705_v26  ;;  %6723 = vmatprep.subr.mxu1 %v3857_v41 }
 0x3e3   : > { %6696 = vmatprep.subr.mxu0 %v8711_v62  ;;  %6724 = vmatpush3.msra.mxu1 %v3857_v41 }
 0x3e4   : > { %6697 = vmatpush3.msra.mxu0 %v8711_v62  ;;  %6725 = vmatprep.subr.mxu1 %v3864_v5 }
 0x3e5   : > { %6736 = vmatprep.subr.mxu0 %v8566_v61  ;;  %6726 = vmatpush3.msra.mxu1 %v3864_v5 }
 0x3e6   : > { %6727 = vmatprep.subr.mxu1 %v3871_v11 }
 0x3e7   : > { %6728 = vmatpush3.msra.mxu1 %v3871_v11 }
 0x3e8   : > { %6729 = vmatprep.subr.mxu1 %v3878_v32 }
 0x3e9   : > { %6730 = vmatpush3.msra.mxu1 %v3878_v32  ;;  %v2362_v32 = vadd.f32 %v6315_v54, %v6280_v10 }
 0x3ea   : > { %6731 = vmatprep.subr.mxu1 %v3885_v52 }
 0x3eb   : > { %6732 = vmatpush3.msra.mxu1 %v3885_v52 }
 0x3ec   : > { %6771 = vmatprep.subr.mxu1 %v8563_v14 }
 0x3f3   : > { %v6385_v22 = vpop.f32.mrf.mxu1 }
 0x3f5   : > { %v2561_v41 = vpop.f32.mrf.mxu1 }
 0x3fb   : > { %v6350_v39 = vpop.f32.mrf.mxu0 }
 0x3fc   : > { %v2473_v34 = vadd.f32 %v6350_v39, %v2362_v32 }
 0x3fd   : > { %v2465_v30 = vpop.f32.mrf.mxu0 }
 0x3fe   : > { %v2466_v23 = vadd.f32 %v2465_v30, %v2356_v44  ;;  %v2570_v10 = vadd.f32 %v6385_v22, %v2473_v34  ;;  %v3491_v30 = vstv %s8759_s13  ;;  %s8812_s13 = sld [smem:[#allocation8 + $0xd]] }
 0x400   : > { %v2562_v38 = vadd.f32 %v2561_v41, %v2466_v23  ;;  %v3547_v23 = vstv %s8761_s25  ;;  %s8814_s25 = sld [smem:[#allocation8 + $0xe]] }
 0x415   : > { %v6455_v56 = vpop.f32.mrf.mxu1 }
 0x417   : > { %v2781_v11 = vpop.f32.mrf.mxu1 }
 0x41d   : > { %v6420_v59 = vpop.f32.mrf.mxu0 }
 0x41e   : > { %v2695_v32 = vadd.f32 %v6420_v59, %v2570_v10  ;;  %v3603_v59 = vstv %s8765_s15  ;;  %v3495_v10 = vstv %s8767_s11  ;;  %s9329_s15 = sld [smem:[#allocation8 + $0x10]] }
 0x41f   : > { %v2688_v5 = vpop.f32.mrf.mxu0  ;;  %s9331_s11 = sld [smem:[#allocation8 + $0x11]] }
 0x420   : > { %v2689_v34 = vadd.f32 %v2688_v5, %v2562_v38  ;;  %v3607_v5 = vstv %s8771_s26  ;;  %s9335_s26 = sld [smem:[#allocation8 + $0x15]] }
 0x436   : > { %v6525_v2 = vpop.f32.mrf.mxu1 }
 0x438   : > { %v3051_v57 = vpop.f32.mrf.mxu1 }
 0x439   : > { %v8757_v13 = vpop.permute.xlu0 %3567 }
 0x43d   : > { %v8763_v12 = vpop.permute.xlu0 %3506 }
 0x43f   : > { %v6490_v6 = vpop.f32.mrf.mxu0 }
 0x440   : > { %v3058_v51 = vadd.f32 %v6525_v2, %v6490_v6 }
 0x441   : > { %v2890_v52 = vpop.f32.mrf.mxu0  ;;  %v3563_v43 = vpop.permute.xlu0 %3562 }
 0x442   : > { %v3052_v3 = vadd.f32 %v3051_v57, %v2890_v52  ;;  %v2788_v57 = vadd.f32 %v6455_v56, %v2695_v32  ;;  %v2782_v52 = vadd.f32 %v2781_v11, %v2689_v34  ;;  %v3517_v11 = vstv %s8773_s24  ;;  %s9337_s24 = sld [smem:[#allocation8 + $0x18]] }
 0x443   : > { %v3573_v34 = vstv %s8775_s19  ;;  %s9339_s19 = sld [smem:[#allocation8 + $0x19]] }
 0x444   : > { %v3549_v56 = vmul.f32 %v3547_v23, %v2788_v57  ;;  %v3548_v0 = vmul.f32 %v3547_v23, %v2782_v52  ;;  %v3604_v8 = vmul.f32 %v3603_v59, %v2782_v52 }
 0x459   : > { %v6595_v54 = vpop.f32.mrf.mxu1 }
 0x45b   : > { %v3257_v2 = vpop.f32.mrf.mxu1 }
 0x461   : > { %v6560_v40 = vpop.f32.mrf.mxu0 }
 0x462   : > { %v3169_v39 = vadd.f32 %v6560_v40, %v3058_v51 }
 0x463   : > { %v3161_v46 = vpop.f32.mrf.mxu0 }
 0x464   : > { %v3162_v44 = vadd.f32 %v3161_v46, %v3052_v3  ;;  %v3266_v22 = vadd.f32 %v6595_v54, %v3169_v39  ;;  %v3619_v46 = vpop.permute.xlu0 %3618  ;;  %v3551_v3 = vstv %s8769_s14  ;;  %v3493_v54 = vmul.f32 %v3491_v30, %v2788_v57  ;;  %s9333_s14 = sld [smem:[#allocation8 + $0x14]] }
 0x465   : > { %v3605_v39 = vmul.f32 %v3603_v59, %v2788_v57 }
 0x466   : > { %v3258_v6 = vadd.f32 %v3257_v2, %v3162_v44  ;;  %v3492_v44 = vmul.f32 %v3491_v30, %v2782_v52  ;;  %v3629_v2 = vstv %s8777_s18  ;;  %s9341_s18 = sld [smem:[#allocation8 + $0x1d]] }
 0x47b   : > { %v6665_v51 = vpop.f32.mrf.mxu1 }
 0x47d   : > { %v3477_v32 = vpop.f32.mrf.mxu1 }
 0x482   : > { %v6630_v40 = vpop.f32.mrf.mxu0 }
 0x483   : > { %v3391_v41 = vadd.f32 %v6630_v40, %v3266_v22 }
 0x484   : > { %v3384_v38 = vpop.f32.mrf.mxu0 }
 0x485   : > { %v3484_v27 = vadd.f32 %v6665_v51, %v3391_v41  ;;  %v3385_v15 = vadd.f32 %v3384_v38, %v3258_v6  ;;  %v3512_v51 = vpop.permute.xlu1 %3511  ;;  %v3624_v41 = vpop.permute.xlu0 %3623 }
 0x487   : > { %v3497_v4 = vmul.f32 %v3495_v10, %v3484_v27  ;;  %v3553_v37 = vmul.f32 %v3551_v3, %v3484_v27  ;;  %v3609_v58 = vmul.f32 %v3607_v5, %v3484_v27  ;;  %v3478_v22 = vadd.f32 %v3477_v32, %v3385_v15 }
 0x489   : > { %v3499_v40 = vadd.f32 %v3497_v4, %v3493_v54  ;;  %v3555_v33 = vadd.f32 %v3553_v37, %v3549_v56  ;;  %v3611_v29 = vadd.f32 %v3609_v58, %v3605_v39  ;;  %v3496_v20 = vmul.f32 %v3495_v10, %v3478_v22 }
 0x48a   : > { %v3552_v6 = vmul.f32 %v3551_v3, %v3478_v22  ;;  %v3608_v38 = vmul.f32 %v3607_v5, %v3478_v22 }
 0x48b   : > { %v3515_v57 = vadd.f32 %v3512_v51, %v3499_v40  ;;  %v3571_v62 = vadd.f32 %v8757_v13, %v3555_v33  ;;  %v3627_v31 = vadd.f32 %v3624_v41, %v3611_v29  ;;  %v3498_v27 = vadd.f32 %v3496_v20, %v3492_v44 }
 0x48c   : > { %v3554_v15 = vadd.f32 %v3552_v6, %v3548_v0  ;;  %v3610_v30 = vadd.f32 %v3608_v38, %v3604_v8 }
 0x48d   : > { %v8789_v32 = vadd.f32 %v3517_v11, %v3515_v57  ;;  %v8791_v26 = vadd.f32 %v3573_v34, %v3571_v62  ;;  %v8793_v37 = vadd.f32 %v3629_v2, %v3627_v31  ;;  %v3514_v58 = vadd.f32 %v8763_v12, %v3498_v27 }
 0x48e   : > { %v3570_v4 = vadd.f32 %v3563_v43, %v3554_v15  ;;  %v3626_v23 = vadd.f32 %v3619_v46, %v3610_v30 }
 0x48f   : > { %v3522_v59 = vand.u32 2147483647, %v8789_v32  ;;  %v3578_v52 = vand.u32 2147483647, %v8791_v26  ;;  %v3634_v33 = vand.u32 2147483647, %v8793_v37  ;;  %v8799_v29 = vadd.f32 %v3517_v11, %v3514_v58 }
 0x490   : > { %v8801_v0 = vadd.f32 %v3573_v34, %v3570_v4  ;;  %v8803_v8 = vadd.f32 %v3629_v2, %v3626_v23  ;;  %vm3530_vm6 = vcmp.ge.f32.partialorder %v8789_v32, 0.0  ;;  %vm3586_vm7 = vcmp.ge.f32.partialorder %v8791_v26, 0.0 }
 0x491   : > { %v3524_v62 = vsub.f32 0.0, %v3522_v59  ;;  %v3580_v20 = vsub.f32 0.0, %v3578_v52  ;;  %v3636_v31 = vsub.f32 0.0, %v3634_v33  ;;  %v3521_v13 = vand.u32 2147483647, %v8799_v29 }
 0x492   : > { %v3577_v43 = vand.u32 2147483647, %v8801_v0  ;;  %v3633_v54 = vand.u32 2147483647, %v8803_v8  ;;  %v3488_v23 = vstv %s8808_s22  ;;  %v3541_v52 = vstv %s8810_s20  ;;  %s9343_s22 = sld [smem:[#allocation8 + $0x12]] }
 0x493   : > { %v3527_v12 = vmul.f32 1.442695, %v3524_v62  ;;  %v3583_v46 = vmul.f32 1.442695, %v3580_v20  ;;  %v3639_v10 = vmul.f32 1.442695, %v3636_v31  ;;  %v3597_v31 = vstv %s8812_s13 }
 0x494   : > { %v3523_v3 = vsub.f32 0.0, %v3521_v13  ;;  %v3579_v5 = vsub.f32 0.0, %v3577_v43  ;;  %v3635_v22 = vsub.f32 0.0, %v3633_v54  ;;  %vm3642_vm8 = vcmp.ge.f32.partialorder %v8793_v37, 0.0  ;;  %s9345_s20 = sld [smem:[#allocation8 + $0x16]] }
 0x495   : > { %7176 = vpow2.f32 %v3527_v12  ;;  %vm3529_vm9 = vcmp.ge.f32.partialorder %v8799_v29, 0.0  ;;  %vm3585_vm10 = vcmp.ge.f32.partialorder %v8801_v0, 0.0  ;;  %vm3641_vm11 = vcmp.ge.f32.partialorder %v8803_v8, 0.0  ;;  %s9347_s13 = sld [smem:[#allocation8 + $0x1a]] }
 0x496   : > { %7178 = vpow2.f32 %v3583_v46  ;;  %v3525_v56 = vmul.f32 1.442695, %v3523_v3  ;;  %v3581_v39 = vmul.f32 1.442695, %v3579_v5  ;;  %v3637_v44 = vmul.f32 1.442695, %v3635_v22 }
 0x497   : > { %7180 = vpow2.f32 %v3639_v10 }
 0x498   : > { %7182 = vpow2.f32 %v3525_v56 }
 0x499   : > { %7184 = vpow2.f32 %v3581_v39 }
 0x49a   : > { %7186 = vpow2.f32 %v3637_v44 }
 0x4a2   : > { %v7177_v11 = vpop.eup %7176 }
 0x4a3   : > { %v7179_v34 = vpop.eup %7178  ;;  %v3534_v2 = vadd.f32 1.0, %v7177_v11  ;;  %v3532_v4 = vsel %vm3530_vm6, 1.0, %v7177_v11 }
 0x4a4   : > { %v7181_v40 = vpop.eup %7180  ;;  %v3590_v51 = vadd.f32 1.0, %v7179_v34  ;;  %v3588_v62 = vsel %vm3586_vm7, 1.0, %v7179_v34 }
 0x4a5   : > { %v7183_v41 = vpop.eup %7182  ;;  %7188 = vrcp.f32 %v3534_v2  ;;  %v3646_v6 = vadd.f32 1.0, %v7181_v40  ;;  %v3644_v43 = vsel %vm3642_vm8, 1.0, %v7181_v40 }
 0x4a6   : > { %v7185_v38 = vpop.eup %7184  ;;  %v3533_v57 = vadd.f32 1.0, %v7183_v41  ;;  %7190 = vrcp.f32 %v3590_v51  ;;  %v3531_v46 = vsel %vm3529_vm9, 1.0, %v7183_v41  ;;  %v3653_v41 = vstv %s8814_s25  ;;  %s9349_s25 = sld [smem:[#allocation8 + $0x1c]] }
 0x4a7   : > { %v7187_v27 = vpop.eup %7186  ;;  %v3589_v15 = vadd.f32 1.0, %v7185_v38  ;;  %7192 = vrcp.f32 %v3646_v6  ;;  %v3587_v56 = vsel %vm3585_vm10, 1.0, %v7185_v38 }
 0x4a8   : > { %7194 = vrcp.f32 %v3533_v57  ;;  %v3645_v30 = vadd.f32 1.0, %v7187_v27  ;;  %v3643_v11 = vsel %vm3641_vm11, 1.0, %v7187_v27 }
 0x4a9   : > { %7196 = vrcp.f32 %v3589_v15 }
 0x4aa   : > { %7198 = vrcp.f32 %v3645_v30 }
 0x4b2   : > { %v7189_v58 = vpop.eup %7188 }
 0x4b3   : > { %v7191_v59 = vpop.eup %7190  ;;  %v3538_v33 = vmul.f32 %v7189_v58, %v3532_v4 }
 0x4b4   : > { %v7193_v20 = vpop.eup %7192  ;;  %v3594_v13 = vmul.f32 %v7191_v59, %v3588_v62 }
 0x4b5   : > { %v7195_v12 = vpop.eup %7194  ;;  %v3540_v10 = vmul.f32 %v3538_v33, %v8789_v32  ;;  %v3650_v3 = vmul.f32 %v7193_v20, %v3644_v43 }
 0x4b6   : > { %v7197_v5 = vpop.eup %7196  ;;  %v3536_v54 = vmul.f32 %v7195_v12, %v3531_v46  ;;  %v3596_v39 = vmul.f32 %v3594_v13, %v8791_v26  ;;  %v9656_v46 = vld [vmem:[#allocation19_spill] sm:$0xff] }
 0x4b7   : > { %v7199_v22 = vpop.eup %7198  ;;  %v3592_v44 = vmul.f32 %v7197_v5, %v3587_v56  ;;  %v3543_v34 = vmul.f32 %v3541_v52, %v3540_v10  ;;  %v3652_v2 = vmul.f32 %v3650_v3, %v8793_v37  ;;  %v9657_v3 = vld [vmem:[#allocation20_spill] sm:$0xff]  ;;  %v4361_v56 = vpop.permute.xlu1 %4360 }
 0x4b8   : > { %v3539_v40 = vmul.f32 %v3536_v54, %v8799_v29  ;;  %v3648_v51 = vmul.f32 %v7199_v22, %v3643_v11  ;;  %v3599_v57 = vmul.f32 %v3597_v31, %v3596_v39  ;;  %v9658_v39 = vld [vmem:[#allocation21_spill] sm:$0xff]  ;;  %v4377_v11 = vld [vmem:[#allocation6 + $0xc8] sm:$0xff] }
 0x4b9   : > { %v3595_v32 = vmul.f32 %v3592_v44, %v8801_v0  ;;  %v3545_v6 = vadd.f32 %v3543_v34, %v3488_v23  ;;  %v3655_v58 = vmul.f32 %v3653_v41, %v3652_v2  ;;  %v4378_v44 = vld [vmem:[#allocation6 + $0xd0] sm:$0xff]  ;;  %v8974_v34 = vand.u32 4294901760, %v4361_v56  ;;  %v9659_v2 = vld [vmem:[#allocation22_spill] sm:$0xff] }
 0x4ba   : > { %v3542_v15 = vmul.f32 %v3541_v52, %v3539_v40  ;;  %v3651_v38 = vmul.f32 %v3648_v51, %v8803_v8 }
 0x4bb   : > { %v3601_v30 = vadd.f32 %v3599_v57, %v3545_v6  ;;  %v3598_v4 = vmul.f32 %v3597_v31, %v3595_v32  ;;  %v8998_v57 = vand.u32 4294901760, %v4377_v11 }
 0x4bc   : > { %v3544_v26 = vadd.f32 %v3542_v15, %v3488_v23  ;;  %v3654_v33 = vmul.f32 %v3653_v41, %v3651_v38  ;;  %v8988_v41 = vand.u32 4294901760, %v4378_v44  ;;  %v4376_v15 = vld [vmem:[#allocation6 + $0xc0] sm:$0xff]  ;;  %v9003_v38 = vsub.f32 %v4361_v56, %v8974_v34  ;;  %v4370_v56 = vld [vmem:[#allocation6 + $0x90] sm:$0xff] }
 0x4bd   : > { %v3657_v59 = vadd.f32 %v3655_v58, %v3601_v30 }
 0x4be   : > { %v3600_v27 = vadd.f32 %v3598_v4, %v3544_v26  ;;  %v4375_v26 = vld [vmem:[#allocation6 + $0xb8] sm:$0xff] }
 0x4bf   : > { %v8832_v62 = vand.u32 4294901760, %v3657_v59 }
 0x4c0   : > { %v3656_v37 = vadd.f32 %v3654_v33, %v3600_v27  ;;  %v9017_v27 = vand.u32 4294901760, %v4376_v15 }
 0x4c1   : > { %v8835_v29 = vsub.f32 %v3657_v59, %v8832_v62  ;;  %v9015_v59 = vsub.f32 %v4378_v44, %v8988_v41 }
 0x4c2   : > { %v8837_v20 = vand.u32 4294901760, %v3656_v37 }
 0x4c3   : > { %v3767_v0 = vand.u32 4294901760, %v8835_v29 }
 0x4c4   : > { %6733 = vmatprep.mubr.f32.mxu1 %v8837_v20  ;;  %v3756_v8 = vsub.f32 %v3656_v37, %v8837_v20 }
 0x4c5   : > { %6734 = vmatmul.mubr.f32.vlgmr.msra.gmra.mxu1 %v8832_v62  ;;  %v3768_v52 = vsub.f32 %v8835_v29, %v3767_v0 }
 0x4c6   : > { %6772 = vmatpush3.msra.mxu1 %v8563_v14  ;;  %v3757_v23 = vand.u32 4294901760, %v3756_v8 }
 0x4c7   : > { %6773 = vmatprep.subr.mxu1 %v8568_v42  ;;  %v3769_v43 = vand.u32 4294901760, %v3768_v52 }
 0x4c8   : > { %6774 = vmatpush3.msra.mxu1 %v8568_v42  ;;  %6803 = vmatprep.mubr.f32.mxu1 %v3757_v23  ;;  %v3758_v31 = vsub.f32 %v3756_v8, %v3757_v23  ;;  %v9663_v23 = vld [vmem:[#allocation31_spill] sm:$0xff] }
 0x4c9   : > { %6775 = vmatprep.subr.mxu1 %v8579_v55 }
 0x4ca   : > { %6776 = vmatpush3.msra.mxu1 %v8579_v55  ;;  %v3759_v13 = vand.u32 4294901760, %v3758_v31 }
 0x4cb   : > { %6777 = vmatprep.subr.mxu1 %v8590_v19 }
 0x4cc   : > { %6778 = vmatpush3.msra.mxu1 %v8590_v19  ;;  %6698 = vmatprep.mubr.f32.mxu0 %v3759_v13  ;;  %v4373_v13 = vld [vmem:[#allocation6 + $0xa8] sm:$0xff] }
 0x4cd   : > { %6779 = vmatprep.subr.mxu1 %v8593_v21  ;;  %6699 = vmatmul.mubr.f32.vlgmr.msra.gmra.mxu0 %v3769_v43  ;;  %v9040_v43 = vand.u32 4294901760, %v9015_v59 }
 0x4ce   : > { %6737 = vmatpush3.msra.mxu0 %v8566_v61  ;;  %6780 = vmatpush3.msra.mxu1 %v8593_v21  ;;  %v9644_v61 = vld [vmem:[#allocation28_spill] sm:$0xff] }
 0x4cf   : > { %6738 = vmatprep.subr.mxu0 %v8576_v36  ;;  %6768 = vmatprep.mubr.f32.mxu0 %v3756_v8  ;;  %v4472_v8 = vand.u32 4294901760, %v9003_v38 }
 0x4d0   : > { %6781 = vmatprep.subr.mxu1 %v8608_v60  ;;  %6739 = vmatpush3.msra.mxu0 %v8576_v36  ;;  %v9645_v36 = vld [vmem:[#allocation25_spill] sm:$0xff] }
 0x4d1   : > { %6782 = vmatpush3.msra.mxu1 %v8608_v60  ;;  %6740 = vmatprep.subr.mxu0 %v8588_v47 }
 0x4d2   : > { %6783 = vmatprep.subr.mxu1 %v8616_v9  ;;  %6741 = vmatpush3.msra.mxu0 %v8588_v47  ;;  %v9646_v47 = vld [vmem:[#allocation30_spill] sm:$0xff] }
 0x4d3   : > { %6784 = vmatpush3.msra.mxu1 %v8616_v9  ;;  %6742 = vmatprep.subr.mxu0 %v8602_v50 }
 0x4d4   : > { %6785 = vmatprep.subr.mxu1 %v8625_v17  ;;  %6743 = vmatpush3.msra.mxu0 %v8602_v50  ;;  %v9647_v50 = vld [vmem:[#allocation26_spill] sm:$0xff] }
 0x4d5   : > { %6786 = vmatpush3.msra.mxu1 %v8625_v17  ;;  %6744 = vmatprep.subr.mxu0 %v8606_v53 }
 0x4d6   : > { %6787 = vmatprep.subr.mxu1 %v8627_v18  ;;  %6745 = vmatpush3.msra.mxu0 %v8606_v53  ;;  %v9648_v53 = vld [vmem:[#allocation29_spill] sm:$0xff] }
 0x4d7   : > { %6788 = vmatpush3.msra.mxu1 %v8627_v18  ;;  %6746 = vmatprep.subr.mxu0 %v8623_v16 }
 0x4d8   : > { %6789 = vmatprep.subr.mxu1 %v8636_v25  ;;  %6747 = vmatpush3.msra.mxu0 %v8623_v16  ;;  %v9649_v16 = vld [vmem:[#allocation32_spill] sm:$0xff] }
 0x4d9   : > { %6790 = vmatpush3.msra.mxu1 %v8636_v25  ;;  %6748 = vmatprep.subr.mxu0 %v8633_v24 }
 0x4da   : > { %6791 = vmatprep.subr.mxu1 %v8657_v49  ;;  %6749 = vmatpush3.msra.mxu0 %v8633_v24  ;;  %v9650_v24 = vld [vmem:[#allocation34_spill] sm:$0xff] }
 0x4db   : > { %6792 = vmatpush3.msra.mxu1 %v8657_v49  ;;  %6750 = vmatprep.subr.mxu0 %v8644_v28 }
 0x4dc   : > { %6793 = vmatprep.subr.mxu1 %v8677_v1  ;;  %6751 = vmatpush3.msra.mxu0 %v8644_v28 }
 0x4dd   : > { %6794 = vmatpush3.msra.mxu1 %v8677_v1  ;;  %6752 = vmatprep.subr.mxu0 %v8647_v48 }
 0x4de   : > { %6795 = vmatprep.subr.mxu1 %v8682_v7  ;;  %6753 = vmatpush3.msra.mxu0 %v8647_v48  ;;  %v4382_v48 = vld [vmem:[#allocation6 + $0xf0] sm:$0xff] }
 0x4df   : > { %6796 = vmatpush3.msra.mxu1 %v8682_v7  ;;  %6754 = vmatprep.subr.mxu0 %v8654_v35 }
 0x4e0   : > { %6797 = vmatprep.subr.mxu1 %v8697_v45  ;;  %6755 = vmatpush3.msra.mxu0 %v8654_v35  ;;  %v4381_v35 = vld [vmem:[#allocation6 + $0xe8] sm:$0xff] }
 0x4e1   : > { %6798 = vmatpush3.msra.mxu1 %v8697_v45  ;;  %6756 = vmatprep.subr.mxu0 %v8674_v63  ;;  %v8949_v10 = vand.u32 4294901760, %v4381_v35 }
 0x4e2   : > { %6799 = vmatprep.subr.mxu1 %v9644_v61  ;;  %6757 = vmatpush3.msra.mxu0 %v8674_v63  ;;  %v8940_v63 = vand.u32 4294901760, %v4382_v48 }
 0x4e3   : > { %6800 = vmatpush3.msra.mxu1 %v9644_v61  ;;  %6758 = vmatprep.subr.mxu0 %v9645_v36 }
 0x4e4   : > { %6801 = vmatprep.subr.mxu1 %v9646_v47  ;;  %6759 = vmatpush3.msra.mxu0 %v9645_v36  ;;  %v8956_v5 = vsub.f32 %v4382_v48, %v8940_v63 }
 0x4e5   : > { %6802 = vmatpush3.msra.mxu1 %v9646_v47  ;;  %6760 = vmatprep.subr.mxu0 %v9647_v50 }
 0x4e6   : > { %6804 = vmatmul.mubr.f32.vlgmr.msra.gmra.mxu1 %v3767_v0  ;;  %6841 = vmatprep.subr.mxu1 %v8563_v14  ;;  %v9031_v0 = vand.u32 4294901760, %v4375_v26 }
 0x4e7   : > { %6761 = vmatpush3.msra.mxu0 %v9647_v50  ;;  %6842 = vmatpush3.msra.mxu1 %v8563_v14  ;;  %v9651_v14 = vld [vmem:[#allocation15_spill] sm:$0xff]  ;;  %v4372_v50 = vld [vmem:[#allocation6 + $0xa0] sm:$0xff] }
 0x4e8   : > { %6873 = vmatprep.mubr.f32.mxu1 %v8837_v20  ;;  %6762 = vmatprep.subr.mxu0 %v9648_v53  ;;  %v9064_v48 = vand.u32 4294901760, %v4372_v50 }
 0x4e9   : > { %6843 = vmatprep.subr.mxu1 %v8568_v42  ;;  %6763 = vmatpush3.msra.mxu0 %v9648_v53 }
 0x4ea   : > { %6844 = vmatpush3.msra.mxu1 %v8568_v42  ;;  %6764 = vmatprep.subr.mxu0 %v9649_v16  ;;  %v9652_v42 = vld [vmem:[#allocation16_spill] sm:$0xff] }
 0x4eb   : > { %6845 = vmatprep.subr.mxu1 %v8579_v55  ;;  %6765 = vmatpush3.msra.mxu0 %v9649_v16 }
 0x4ec   : > { %6846 = vmatpush3.msra.mxu1 %v8579_v55  ;;  %6766 = vmatprep.subr.mxu0 %v9650_v24  ;;  %v4383_v55 = vld [vmem:[#allocation6 + $0xf8] sm:$0xff] }
 0x4ed   : > { %6847 = vmatprep.subr.mxu1 %v8590_v19  ;;  %6767 = vmatpush3.msra.mxu0 %v9650_v24  ;;  %v8932_v28 = vand.u32 4294901760, %v4383_v55  ;;  %v9664_v24 = vld [vmem:[#allocation33_spill] sm:$0xff] }
 0x4ee   : > { %6848 = vmatpush3.msra.mxu1 %v8590_v19  ;;  %6769 = vmatmul.mubr.f32.vlgmr.msra.gmra.mxu0 %v8835_v29  ;;  %v9653_v19 = vld [vmem:[#allocation14_spill] sm:$0xff]  ;;  %v9027_v29 = vsub.f32 %v4377_v11, %v8998_v57 }
 0x4ef   : > { %6806 = vmatprep.subr.mxu0 %v9651_v14  ;;  %6849 = vmatprep.subr.mxu1 %v8593_v21  ;;  %v8945_v12 = vsub.f32 %v4383_v55, %v8932_v28 }
 0x4f0   : > { %6807 = vmatpush3.msra.mxu0 %v9651_v14  ;;  %6838 = vmatprep.mubr.f32.mxu0 %v8837_v20  ;;  %v4374_v20 = vld [vmem:[#allocation6 + $0xb0] sm:$0xff]  ;;  %v9051_v16 = vand.u32 4294901760, %v9027_v29  ;;  %v9056_v14 = vsub.f32 %v4375_v26, %v9031_v0 }
 0x4f1   : > { %6850 = vmatpush3.msra.mxu1 %v8593_v21  ;;  %6808 = vmatprep.subr.mxu0 %v9652_v42  ;;  %v9654_v21 = vld [vmem:[#allocation17_spill] sm:$0xff]  ;;  %v9045_v36 = vand.u32 4294901760, %v4374_v20 }
 0x4f2   : > { %6851 = vmatprep.subr.mxu1 %v8608_v60  ;;  %6809 = vmatpush3.msra.mxu0 %v9652_v42  ;;  %v9058_v42 = vand.u32 4294901760, %v4373_v13  ;;  %v9080_v44 = vand.u32 4294901760, %v9056_v14 }
 0x4f3   : > { %6852 = vmatpush3.msra.mxu1 %v8608_v60  ;;  %6810 = vmatprep.subr.mxu0 %v9653_v19  ;;  %v9655_v60 = vld [vmem:[#allocation18_spill] sm:$0xff] }
 0x4f4   : > { %6853 = vmatprep.subr.mxu1 %v8616_v9  ;;  %6811 = vmatpush3.msra.mxu0 %v9653_v19  ;;  %v4473_v19 = vsub.f32 %v9003_v38, %v4472_v8  ;;  %v9083_v11 = vsub.f32 %v4373_v13, %v9058_v42 }
 0x4f5   : > { %6854 = vmatpush3.msra.mxu1 %v8616_v9  ;;  %6812 = vmatprep.subr.mxu0 %v9654_v21  ;;  %v4380_v9 = vld [vmem:[#allocation6 + $0xe0] sm:$0xff] }
 0x4f6   : > { %6855 = vmatprep.subr.mxu1 %v8625_v17  ;;  %6813 = vmatpush3.msra.mxu0 %v9654_v21  ;;  %v8958_v54 = vand.u32 4294901760, %v4380_v9  ;;  %v4371_v21 = vld [vmem:[#allocation6 + $0x98] sm:$0xff] }
 0x4f7   : > { %6856 = vmatpush3.msra.mxu1 %v8625_v17  ;;  %6814 = vmatprep.subr.mxu0 %v9655_v60  ;;  %v4379_v17 = vld [vmem:[#allocation6 + $0xd8] sm:$0xff] }
 0x4f8   : > { %6857 = vmatprep.subr.mxu1 %v8627_v18  ;;  %6815 = vmatpush3.msra.mxu0 %v9655_v60  ;;  %v8970_v22 = vand.u32 4294901760, %v4379_v17  ;;  %v8982_v40 = vsub.f32 %v4380_v9, %v8958_v54  ;;  %v4529_v60 = vsub.f32 %v9015_v59, %v9040_v43 }
 0x4f9   : > { %6858 = vmatpush3.msra.mxu1 %v8627_v18  ;;  %6816 = vmatprep.subr.mxu0 %v9656_v46  ;;  %v8963_v18 = vand.u32 4294901760, %v8945_v12 }
 0x4fa   : > { %6859 = vmatprep.subr.mxu1 %v8636_v25  ;;  %6817 = vmatpush3.msra.mxu0 %v9656_v46  ;;  %v8996_v6 = vsub.f32 %v4379_v17, %v8970_v22  ;;  %v9010_v58 = vand.u32 4294901760, %v8982_v40  ;;  %v9073_v46 = vsub.f32 %v4374_v20, %v9045_v36  ;;  %v9104_v20 = vand.u32 4294901760, %v9083_v11 }
 0x4fb   : > { %6860 = vmatpush3.msra.mxu1 %v8636_v25  ;;  %6818 = vmatprep.subr.mxu0 %v9657_v3  ;;  %v8968_v25 = vsub.f32 %v4381_v35, %v8949_v10  ;;  %v4494_v51 = vsub.f32 %v8945_v12, %v8963_v18  ;;  %v9665_v35 = vld [vmem:[#allocation35_spill] sm:$0xff] }
 0x4fc   : > { %6861 = vmatprep.subr.mxu1 %v8657_v49  ;;  %6819 = vmatpush3.msra.mxu0 %v9657_v3  ;;  %v9024_v37 = vand.u32 4294901760, %v8996_v6  ;;  %v4515_v31 = vsub.f32 %v8982_v40, %v9010_v58  ;;  %v4536_v3 = vsub.f32 %v9027_v29, %v9051_v16  ;;  %v9095_v26 = vand.u32 4294901760, %v9073_v46 }
 0x4fd   : > { %6862 = vmatpush3.msra.mxu1 %v8657_v49  ;;  %6820 = vmatprep.subr.mxu0 %v9658_v39  ;;  %v8979_v49 = vand.u32 4294901760, %v8956_v5  ;;  %v8993_v32 = vand.u32 4294901760, %v8968_v25  ;;  %v4495_v4 = vand.u32 4294901760, %v4494_v51  ;;  %v4474_v51 = vand.u32 4294901760, %v4473_v19 }
 0x4fe   : > { %6863 = vmatprep.subr.mxu1 %v8677_v1  ;;  %6821 = vmatpush3.msra.mxu0 %v9658_v39  ;;  %v4522_v53 = vsub.f32 %v8996_v6, %v9024_v37  ;;  %v4516_v55 = vand.u32 4294901760, %v4515_v31  ;;  %v9666_v39 = vld [vmem:[#allocation36_spill] sm:$0xff] }
 0x4ff   : > { %6864 = vmatpush3.msra.mxu1 %v8677_v1  ;;  %6822 = vmatprep.subr.mxu0 %v9659_v2  ;;  %v9660_v1 = vld [vmem:[#allocation23_spill] sm:$0xff]  ;;  %v4501_v30 = vsub.f32 %v8956_v5, %v8979_v49  ;;  %v4508_v33 = vsub.f32 %v8968_v25, %v8993_v32 }
 0x500   : > { %6865 = vmatprep.subr.mxu1 %v8682_v7  ;;  %6823 = vmatpush3.msra.mxu0 %v9659_v2  ;;  %v4523_v17 = vand.u32 4294901760, %v4522_v53  ;;  %v9085_v2 = vand.u32 4294901760, %v4371_v21 }
 0x501   : > { %6866 = vmatpush3.msra.mxu1 %v8682_v7  ;;  %6824 = vmatprep.subr.mxu0 %v9660_v1  ;;  %v9661_v7 = vld [vmem:[#allocation24_spill] sm:$0xff]  ;;  %v4502_v52 = vand.u32 4294901760, %v4501_v30 }
 0x502   : > { %6867 = vmatprep.subr.mxu1 %v8697_v45  ;;  %6825 = vmatpush3.msra.mxu0 %v9660_v1  ;;  %v9089_v1 = vsub.f32 %v4372_v50, %v9064_v48  ;;  %v4557_v50 = vsub.f32 %v9073_v46, %v9095_v26 }
 0x503   : > { %6868 = vmatpush3.msra.mxu1 %v8697_v45  ;;  %6826 = vmatprep.subr.mxu0 %v9661_v7  ;;  %v9662_v45 = vld [vmem:[#allocation27_spill] sm:$0xff] }
 0x504   : > { %6869 = vmatprep.subr.mxu1 %v9644_v61  ;;  %6827 = vmatpush3.msra.mxu0 %v9661_v7  ;;  %v4530_v7 = vand.u32 4294901760, %v4529_v60  ;;  %v9113_v31 = vand.u32 4294901760, %v9089_v1 }
 0x505   : > { %6870 = vmatpush3.msra.mxu1 %v9644_v61  ;;  %6828 = vmatprep.subr.mxu0 %v9662_v45  ;;  %v9043_v61 = vsub.f32 %v4376_v15, %v9017_v27  ;;  %v4369_v15 = vld [vmem:[#allocation6 + $0x88] sm:$0xff] }
 0x506   : > { %6871 = vmatprep.subr.mxu1 %v9646_v47  ;;  %6829 = vmatpush3.msra.mxu0 %v9662_v45  ;;  %v4537_v45 = vand.u32 4294901760, %v4536_v3  ;;  %v4571_v60 = vsub.f32 %v9089_v1, %v9113_v31 }
 0x507   : > { %6872 = vmatpush3.msra.mxu1 %v9646_v47  ;;  %6830 = vmatprep.subr.mxu0 %v9663_v23  ;;  %v4509_v47 = vand.u32 4294901760, %v4508_v33  ;;  %v9070_v9 = vand.u32 4294901760, %v9043_v61  ;;  %v4368_v33 = vld [vmem:[#allocation6 + $0x80] sm:$0xff] }
 0x508   : > { %6874 = vmatmul.mubr.f32.vlgmr.msra.gmra.mxu1 %v8832_v62  ;;  %6911 = vmatprep.subr.mxu1 %v4495_v4  ;;  %v9121_v53 = vand.u32 4294901760, %v4368_v33 }
 0x509   : > { %6831 = vmatpush3.msra.mxu0 %v9663_v23  ;;  %6912 = vmatpush3.msra.mxu1 %v4495_v4  ;;  %v4543_v30 = vsub.f32 %v9043_v61, %v9070_v9  ;;  %v9097_v4 = vand.u32 4294901760, %v4370_v56  ;;  %v9107_v23 = vsub.f32 %v4371_v21, %v9085_v2 }
 0x50a   : > { %6943 = vmatprep.mubr.f32.mxu1 %v8974_v34  ;;  %6832 = vmatprep.subr.mxu0 %v9664_v24  ;;  %v9141_v3 = vsub.f32 %v4368_v33, %v9121_v53 }
 0x50b   : > { %6913 = vmatprep.subr.mxu1 %v4502_v52  ;;  %6833 = vmatpush3.msra.mxu0 %v9664_v24  ;;  %v4544_v13 = vand.u32 4294901760, %v4543_v30  ;;  %v9128_v19 = vand.u32 4294901760, %v9107_v23 }
 0x50c   : > { %6914 = vmatpush3.msra.mxu1 %v4502_v52  ;;  %6834 = vmatprep.subr.mxu0 %v9665_v35  ;;  %v9109_v52 = vand.u32 4294901760, %v4369_v15  ;;  %v9155_v30 = vand.u32 4294901760, %v9141_v3 }
 0x50d   : > { %6915 = vmatprep.subr.mxu1 %v4509_v47  ;;  %6835 = vmatpush3.msra.mxu0 %v9665_v35  ;;  %v4558_v35 = vand.u32 4294901760, %v4557_v50 }
 0x50e   : > { %6916 = vmatpush3.msra.mxu1 %v4509_v47  ;;  %6836 = vmatprep.subr.mxu0 %v9666_v39  ;;  %v9119_v47 = vsub.f32 %v4370_v56, %v9097_v4  ;;  %v9131_v21 = vsub.f32 %v4369_v15, %v9109_v52  ;;  %v4572_v15 = vand.u32 4294901760, %v4571_v60 }
 0x50f   : > { %6917 = vmatprep.subr.mxu1 %v4516_v55  ;;  %6837 = vmatpush3.msra.mxu0 %v9666_v39  ;;  %v4578_v39 = vsub.f32 %v9107_v23, %v9128_v19 }
 0x510   : > { %6918 = vmatpush3.msra.mxu1 %v4516_v55  ;;  %6839 = vmatmul.mubr.f32.vlgmr.msra.gmra.mxu0 %v8832_v62  ;;  %v4550_v62 = vsub.f32 %v9056_v14, %v9080_v44  ;;  %v4564_v55 = vsub.f32 %v9083_v11, %v9104_v20 }
 0x511   : > { %6876 = vmatprep.subr.mxu0 %v8932_v28  ;;  %6919 = vmatprep.subr.mxu1 %v4523_v17  ;;  %v4579_v33 = vand.u32 4294901760, %v4578_v39 }
 0x512   : > { %6877 = vmatpush3.msra.mxu0 %v8932_v28  ;;  %6908 = vmatprep.mubr.f32.mxu0 %v4474_v51  ;;  %v4551_v24 = vand.u32 4294901760, %v4550_v62  ;;  %v4565_v56 = vand.u32 4294901760, %v4564_v55  ;;  %v9148_v51 = vand.u32 4294901760, %v9131_v21 }
 0x513   : > { %6920 = vmatpush3.msra.mxu1 %v4523_v17  ;;  %6878 = vmatprep.subr.mxu0 %v8940_v63  ;;  %v9138_v17 = vand.u32 4294901760, %v9119_v47 }
 0x514   : > { %6921 = vmatprep.subr.mxu1 %v4530_v7  ;;  %6879 = vmatpush3.msra.mxu0 %v8940_v63  ;;  %v4592_v62 = vsub.f32 %v9131_v21, %v9148_v51 }
 0x515   : > { %6922 = vmatpush3.msra.mxu1 %v4530_v7  ;;  %6880 = vmatprep.subr.mxu0 %v8949_v10  ;;  %v4585_v7 = vsub.f32 %v9119_v47, %v9138_v17 }
 0x516   : > { %6923 = vmatprep.subr.mxu1 %v4537_v45  ;;  %6881 = vmatpush3.msra.mxu0 %v8949_v10  ;;  %v4593_v55 = vand.u32 4294901760, %v4592_v62 }
 0x517   : > { %6924 = vmatpush3.msra.mxu1 %v4537_v45  ;;  %6882 = vmatprep.subr.mxu0 %v8958_v54  ;;  %v4366_v45 = vpop.permute.xlu0 %4365  ;;  %v4586_v50 = vand.u32 4294901760, %v4585_v7 }
 0x518   : > { %6925 = vmatprep.subr.mxu1 %v4544_v13  ;;  %6883 = vmatpush3.msra.mxu0 %v8958_v54 }
 0x519   : > { %6926 = vmatpush3.msra.mxu1 %v4544_v13  ;;  %6884 = vmatprep.subr.mxu0 %v8970_v22  ;;  %v9162_v13 = vand.u32 4294901760, %v4366_v45 }
 0x51a   : > { %6927 = vmatprep.subr.mxu1 %v4551_v24  ;;  %6885 = vmatpush3.msra.mxu0 %v8970_v22 }
 0x51b   : > { %6928 = vmatpush3.msra.mxu1 %v4551_v24  ;;  %6886 = vmatprep.subr.mxu0 %v8988_v41  ;;  %v4599_v24 = vsub.f32 %v9141_v3, %v9155_v30 }
 0x51c   : > { %6929 = vmatprep.subr.mxu1 %v4558_v35  ;;  %6887 = vmatpush3.msra.mxu0 %v8988_v41 }
 0x51d   : > { %6930 = vmatpush3.msra.mxu1 %v4558_v35  ;;  %6888 = vmatprep.subr.mxu0 %v8998_v57  ;;  %v9171_v35 = vsub.f32 %v4366_v45, %v9162_v13  ;;  %v4600_v60 = vand.u32 4294901760, %v4599_v24 }
 0x51e   : > { %6931 = vmatprep.subr.mxu1 %v4565_v56  ;;  %6889 = vmatpush3.msra.mxu0 %v8998_v57 }
 0x51f   : > { %6932 = vmatpush3.msra.mxu1 %v4565_v56  ;;  %6890 = vmatprep.subr.mxu0 %v9017_v27  ;;  %v4482_v56 = vand.u32 4294901760, %v9171_v35 }
 0x520   : > { %6933 = vmatprep.subr.mxu1 %v4572_v15  ;;  %6891 = vmatpush3.msra.mxu0 %v9017_v27 }
 0x521   : > { %6934 = vmatpush3.msra.mxu1 %v4572_v15  ;;  %6892 = vmatprep.subr.mxu0 %v9031_v0  ;;  %v4483_v39 = vsub.f32 %v9171_v35, %v4482_v56 }
 0x522   : > { %6935 = vmatprep.subr.mxu1 %v4579_v33  ;;  %6893 = vmatpush3.msra.mxu0 %v9031_v0 }
 0x523   : > { %6936 = vmatpush3.msra.mxu1 %v4579_v33  ;;  %6894 = vmatprep.subr.mxu0 %v9045_v36  ;;  %v4484_v15 = vand.u32 4294901760, %v4483_v39 }
 0x524   : > { %6937 = vmatprep.subr.mxu1 %v4586_v50  ;;  %6895 = vmatpush3.msra.mxu0 %v9045_v36 }
 0x525   : > { %6938 = vmatpush3.msra.mxu1 %v4586_v50  ;;  %6896 = vmatprep.subr.mxu0 %v9058_v42 }
 0x526   : > { %6939 = vmatprep.subr.mxu1 %v4593_v55  ;;  %6897 = vmatpush3.msra.mxu0 %v9058_v42 }
 0x527   : > { %6940 = vmatpush3.msra.mxu1 %v4593_v55  ;;  %6898 = vmatprep.subr.mxu0 %v9064_v48 }
 0x528   : > { %6941 = vmatprep.subr.mxu1 %v4600_v60  ;;  %6899 = vmatpush3.msra.mxu0 %v9064_v48 }
 0x529   : > { %6942 = vmatpush3.msra.mxu1 %v4600_v60  ;;  %6900 = vmatprep.subr.mxu0 %v9085_v2 }
 0x52a   : > { %6944 = vmatmul.mubr.f32.vlgmr.msra.gmra.mxu1 %v9162_v13  ;;  %6981 = vmatprep.subr.mxu1 %v8932_v28 }
 0x52b   : > { %6901 = vmatpush3.msra.mxu0 %v9085_v2  ;;  %6982 = vmatpush3.msra.mxu1 %v8932_v28 }
 0x52c   : > { %7013 = vmatprep.mubr.f32.mxu1 %v4472_v8  ;;  %6902 = vmatprep.subr.mxu0 %v9097_v4  ;;  %v5185_v8 = vstv %s9339_s19  ;;  %s9383_s19 = sld [smem:[#allocation8 + $0x23]] }
 0x52d   : > { %6983 = vmatprep.subr.mxu1 %v8940_v63  ;;  %6903 = vmatpush3.msra.mxu0 %v9097_v4 }
 0x52e   : > { %6984 = vmatpush3.msra.mxu1 %v8940_v63  ;;  %6904 = vmatprep.subr.mxu0 %v9109_v52 }
 0x52f   : > { %6985 = vmatprep.subr.mxu1 %v8949_v10  ;;  %6905 = vmatpush3.msra.mxu0 %v9109_v52 }
 0x530   : > { %6986 = vmatpush3.msra.mxu1 %v8949_v10  ;;  %6906 = vmatprep.subr.mxu0 %v9121_v53 }
 0x531   : > { %6987 = vmatprep.subr.mxu1 %v8958_v54  ;;  %6907 = vmatpush3.msra.mxu0 %v9121_v53 }
 0x532   : > { %6988 = vmatpush3.msra.mxu1 %v8958_v54  ;;  %6909 = vmatmul.mubr.f32.vlgmr.msra.gmra.mxu0 %v4484_v15 }
 0x533   : > { %6946 = vmatprep.subr.mxu0 %v8945_v12  ;;  %6989 = vmatprep.subr.mxu1 %v8970_v22 }
 0x534   : > { %6947 = vmatpush3.msra.mxu0 %v8945_v12  ;;  %6978 = vmatprep.mubr.f32.mxu0 %v9003_v38 }
 0x535   : > { %6990 = vmatpush3.msra.mxu1 %v8970_v22  ;;  %6948 = vmatprep.subr.mxu0 %v8956_v5 }
 0x536   : > { %6991 = vmatprep.subr.mxu1 %v8988_v41  ;;  %6949 = vmatpush3.msra.mxu0 %v8956_v5 }
 0x537   : > { %6992 = vmatpush3.msra.mxu1 %v8988_v41  ;;  %6950 = vmatprep.subr.mxu0 %v8968_v25 }
 0x538   : > { %6993 = vmatprep.subr.mxu1 %v8998_v57  ;;  %6951 = vmatpush3.msra.mxu0 %v8968_v25 }
 0x539   : > { %6994 = vmatpush3.msra.mxu1 %v8998_v57  ;;  %6952 = vmatprep.subr.mxu0 %v8982_v40 }
 0x53a   : > { %6995 = vmatprep.subr.mxu1 %v9017_v27  ;;  %6953 = vmatpush3.msra.mxu0 %v8982_v40 }
 0x53b   : > { %6996 = vmatpush3.msra.mxu1 %v9017_v27  ;;  %6954 = vmatprep.subr.mxu0 %v8996_v6 }
 0x53c   : > { %6997 = vmatprep.subr.mxu1 %v9031_v0  ;;  %6955 = vmatpush3.msra.mxu0 %v8996_v6 }
 0x53d   : > { %6998 = vmatpush3.msra.mxu1 %v9031_v0  ;;  %6956 = vmatprep.subr.mxu0 %v9015_v59 }
 0x53e   : > { %6999 = vmatprep.subr.mxu1 %v9045_v36  ;;  %6957 = vmatpush3.msra.mxu0 %v9015_v59  ;;  %v5133_v59 = vstv %s9335_s26  ;;  %s9376_s26 = sld [smem:[#allocation8 + $0x20]] }
 0x53f   : > { %7000 = vmatpush3.msra.mxu1 %v9045_v36  ;;  %6958 = vmatprep.subr.mxu0 %v9027_v29 }
 0x540   : > { %7001 = vmatprep.subr.mxu1 %v9058_v42  ;;  %6959 = vmatpush3.msra.mxu0 %v9027_v29 }
 0x541   : > { %7002 = vmatpush3.msra.mxu1 %v9058_v42  ;;  %6960 = vmatprep.subr.mxu0 %v9043_v61 }
 0x542   : > { %7003 = vmatprep.subr.mxu1 %v9064_v48  ;;  %6961 = vmatpush3.msra.mxu0 %v9043_v61  ;;  %v7233_v61 = vld [vmem:[%s7729_s23 + $0x8] sm:$0xff] }
 0x543   : > { %7004 = vmatpush3.msra.mxu1 %v9064_v48  ;;  %6962 = vmatprep.subr.mxu0 %v9056_v14 }
 0x544   : > { %7005 = vmatprep.subr.mxu1 %v9085_v2  ;;  %6963 = vmatpush3.msra.mxu0 %v9056_v14 }
 0x545   : > { %7006 = vmatpush3.msra.mxu1 %v9085_v2  ;;  %6964 = vmatprep.subr.mxu0 %v9073_v46 }
 0x546   : > { %7007 = vmatprep.subr.mxu1 %v9097_v4  ;;  %6965 = vmatpush3.msra.mxu0 %v9073_v46  ;;  %v7234_v46 = vld [vmem:[%s7729_s23] sm:$0xff]  ;;  %s9373_s23 = sld [smem:[#allocation8 + $0x1f]] }
 0x547   : > { %7008 = vmatpush3.msra.mxu1 %v9097_v4  ;;  %6966 = vmatprep.subr.mxu0 %v9083_v11  ;;  %v5186_v7 = vmul.f32 %v7234_v46, %v5185_v8 }
 0x548   : > { %7009 = vmatprep.subr.mxu1 %v9109_v52  ;;  %6967 = vmatpush3.msra.mxu0 %v9083_v11 }
 0x549   : > { %7010 = vmatpush3.msra.mxu1 %v9109_v52  ;;  %6968 = vmatprep.subr.mxu0 %v9089_v1 }
 0x54a   : > { %7011 = vmatprep.subr.mxu1 %v9121_v53  ;;  %6969 = vmatpush3.msra.mxu0 %v9089_v1  ;;  %v5181_v1 = vstv %s9337_s24  ;;  %s9378_s24 = sld [smem:[#allocation8 + $0x21]] }
 0x54b   : > { %7012 = vmatpush3.msra.mxu1 %v9121_v53  ;;  %6970 = vmatprep.subr.mxu0 %v9107_v23 }
 0x54c   : > { %7014 = vmatmul.mubr.f32.vlgmr.msra.gmra.mxu1 %v4482_v56  ;;  %7051 = vmatprep.subr.mxu1 %v8932_v28 }
 0x54d   : > { %6971 = vmatpush3.msra.mxu0 %v9107_v23  ;;  %7052 = vmatpush3.msra.mxu1 %v8932_v28  ;;  %v2088_v23 = vld [vmem:[%s7573_s21 + $0x8] sm:$0xff] }
 0x54e   : > { %7083 = vmatprep.mubr.f32.mxu1 %v8974_v34  ;;  %6972 = vmatprep.subr.mxu0 %v9119_v47 }
 0x54f   : > { %7053 = vmatprep.subr.mxu1 %v8940_v63  ;;  %6973 = vmatpush3.msra.mxu0 %v9119_v47 }
 0x550   : > { %7054 = vmatpush3.msra.mxu1 %v8940_v63  ;;  %6974 = vmatprep.subr.mxu0 %v9131_v21 }
 0x551   : > { %7055 = vmatprep.subr.mxu1 %v8949_v10  ;;  %6975 = vmatpush3.msra.mxu0 %v9131_v21  ;;  %v5191_v21 = vstv %s9347_s13  ;;  %s9425_s13 = sld [smem:[#allocation8 + $0x27]] }
 0x552   : > { %7056 = vmatpush3.msra.mxu1 %v8949_v10  ;;  %6976 = vmatprep.subr.mxu0 %v9141_v3  ;;  %v5193_v55 = vmul.f32 %v5191_v21, %v2088_v23 }
 0x553   : > { %7057 = vmatprep.subr.mxu1 %v8958_v54  ;;  %6977 = vmatpush3.msra.mxu0 %v9141_v3 }
 0x554   : > { %7058 = vmatpush3.msra.mxu1 %v8958_v54  ;;  %6979 = vmatmul.mubr.f32.vlgmr.msra.gmra.mxu0 %v9171_v35  ;;  %v5243_v35 = vstv %s9353_s7  ;;  %s9417_s7 = sld [smem:[#allocation8 + $0x24]] }
 0x555   : > { %7016 = vmatprep.subr.mxu0 %v8963_v18  ;;  %7059 = vmatprep.subr.mxu1 %v8970_v22 }
 0x556   : > { %7017 = vmatpush3.msra.mxu0 %v8963_v18  ;;  %7048 = vmatprep.mubr.f32.mxu0 %v8974_v34 }
 0x557   : > { %7060 = vmatpush3.msra.mxu1 %v8970_v22  ;;  %7018 = vmatprep.subr.mxu0 %v8979_v49 }
 0x558   : > { %7061 = vmatprep.subr.mxu1 %v8988_v41  ;;  %7019 = vmatpush3.msra.mxu0 %v8979_v49 }
 0x559   : > { %7062 = vmatpush3.msra.mxu1 %v8988_v41  ;;  %7020 = vmatprep.subr.mxu0 %v8993_v32 }
 0x55a   : > { %7063 = vmatprep.subr.mxu1 %v8998_v57  ;;  %7021 = vmatpush3.msra.mxu0 %v8993_v32 }
 0x55b   : > { %7064 = vmatpush3.msra.mxu1 %v8998_v57  ;;  %7022 = vmatprep.subr.mxu0 %v9010_v58 }
 0x55c   : > { %7065 = vmatprep.subr.mxu1 %v9017_v27  ;;  %7023 = vmatpush3.msra.mxu0 %v9010_v58  ;;  %v5081_v58 = vstv %s9331_s11  ;;  %s9359_s11 = sld [smem:[#allocation8 + $0x13]] }
 0x55d   : > { %7066 = vmatpush3.msra.mxu1 %v9017_v27  ;;  %7024 = vmatprep.subr.mxu0 %v9024_v37 }
 0x55e   : > { %7067 = vmatprep.subr.mxu1 %v9031_v0  ;;  %7025 = vmatpush3.msra.mxu0 %v9024_v37  ;;  %v5475_v37 = vld [vmem:[#allocation6 + $0x100] ss:$0 sm:$0xff] }
 0x55f   : > { %7068 = vmatpush3.msra.mxu1 %v9031_v0  ;;  %7026 = vmatprep.subr.mxu0 %v9040_v43 }
 0x560   : > { %7069 = vmatprep.subr.mxu1 %v9045_v36  ;;  %7027 = vmatpush3.msra.mxu0 %v9040_v43  ;;  %v5077_v43 = vstv %s9329_s15  ;;  %s9363_s15 = sld [smem:[#allocation8 + $0x17]] }
 0x561   : > { %7070 = vmatpush3.msra.mxu1 %v9045_v36  ;;  %7028 = vmatprep.subr.mxu0 %v9051_v16  ;;  %v5083_v36 = vmul.f32 %v7233_v61, %v5081_v58 }
 0x562   : > { %7071 = vmatprep.subr.mxu1 %v9058_v42  ;;  %7029 = vmatpush3.msra.mxu0 %v9051_v16  ;;  %v5129_v16 = vstv %s9333_s14  ;;  %s9368_s14 = sld [smem:[#allocation8 + $0x1b]] }
 0x563   : > { %7072 = vmatpush3.msra.mxu1 %v9058_v42  ;;  %7030 = vmatprep.subr.mxu0 %v9070_v9 }
 0x564   : > { %7073 = vmatprep.subr.mxu1 %v9064_v48  ;;  %7031 = vmatpush3.msra.mxu0 %v9070_v9  ;;  %v5237_v9 = vstv %s9341_s18  ;;  %s9419_s18 = sld [smem:[#allocation8 + $0x25]] }
 0x565   : > { %7074 = vmatpush3.msra.mxu1 %v9064_v48  ;;  %7032 = vmatprep.subr.mxu0 %v9080_v44  ;;  %v5135_v48 = vmul.f32 %v7233_v61, %v5133_v59  ;;  %v5239_v3 = vmul.f32 %v7233_v61, %v5237_v9 }
 0x566   : > { %7075 = vmatprep.subr.mxu1 %v9085_v2  ;;  %7033 = vmatpush3.msra.mxu0 %v9080_v44  ;;  %v5082_v44 = vmul.f32 %v7234_v46, %v5081_v58 }
 0x567   : > { %7076 = vmatpush3.msra.mxu1 %v9085_v2  ;;  %7034 = vmatprep.subr.mxu0 %v9095_v26 }
 0x568   : > { %7077 = vmatprep.subr.mxu1 %v9097_v4  ;;  %7035 = vmatpush3.msra.mxu0 %v9095_v26  ;;  %v5187_v26 = vmul.f32 %v7233_v61, %v5185_v8  ;;  %v5197_v58 = vstv %s9368_s14 }
 0x569   : > { %7078 = vmatpush3.msra.mxu1 %v9097_v4  ;;  %7036 = vmatprep.subr.mxu0 %v9104_v20  ;;  %v5134_v4 = vmul.f32 %v7234_v46, %v5133_v59  ;;  %v5249_v59 = vstv %s9373_s23 }
 0x56a   : > { %7079 = vmatprep.subr.mxu1 %v9109_v52  ;;  %7037 = vmatpush3.msra.mxu0 %v9104_v20 }
 0x56b   : > { %7080 = vmatpush3.msra.mxu1 %v9109_v52  ;;  %7038 = vmatprep.subr.mxu0 %v9113_v31  ;;  %v5087_v52 = vstv %s9343_s22  ;;  %s9421_s22 = sld [smem:[#allocation8 + $0x26]] }
 0x56c   : > { %7081 = vmatprep.subr.mxu1 %v9121_v53  ;;  %7039 = vmatpush3.msra.mxu0 %v9113_v31  ;;  %v2087_v31 = vld [vmem:[%s7573_s21] sm:$0xff]  ;;  %v5089_v62 = vmul.f32 %v5087_v52, %v2088_v23  ;;  %s9380_s21 = sld [smem:[#allocation8 + $0x22]] }
 0x56d   : > { %7082 = vmatpush3.msra.mxu1 %v9121_v53  ;;  %7040 = vmatprep.subr.mxu0 %v9128_v19 }
 0x56e   : > { %7084 = vmatmul.mubr.f32.vlgmr.msra.gmra.mxu1 %v9162_v13  ;;  %7041 = vmatpush3.msra.mxu0 %v9128_v19  ;;  %v5139_v19 = vstv %s9345_s20  ;;  %s9423_s20 = sld [smem:[#allocation8 + $0x28]] }
 0x56f   : > { %7042 = vmatprep.subr.mxu0 %v9138_v17  ;;  %v5141_v24 = vmul.f32 %v5139_v19, %v2088_v23  ;;  %v5140_v60 = vmul.f32 %v5139_v19, %v2087_v31 }
 0x570   : > { %7043 = vmatpush3.msra.mxu0 %v9138_v17  ;;  %v5233_v17 = vstv %s9349_s25  ;;  %s5507_s25 = sshll.u32 %s7455_s9, 8 }
 0x571   : > { %7044 = vmatprep.subr.mxu0 %v9148_v51 }
 0x572   : > { %7045 = vmatpush3.msra.mxu0 %v9148_v51 }
 0x573   : > { %7046 = vmatprep.subr.mxu0 %v9155_v30 }
 0x574   : > { %7047 = vmatpush3.msra.mxu0 %v9155_v30  ;;  %v5238_v30 = vmul.f32 %v7234_v46, %v5237_v9 }
 0x575   : > { %7049 = vmatmul.mubr.f32.vlgmr.msra.gmra.mxu0 %v9162_v13  ;;  %v5088_v13 = vmul.f32 %v5087_v52, %v2087_v31 }
 0x585   : > { %v6735_v12 = vpop.f32.mrf.mxu1 }
 0x587   : > { %v3922_v5 = vpop.f32.mrf.mxu1 }
 0x58d   : > { %v6700_v28 = vpop.f32.mrf.mxu0 }
 0x58e   : > { %v3929_v22 = vadd.f32 %v6735_v12, %v6700_v28 }
 0x58f   : > { %v3761_v63 = vpop.f32.mrf.mxu0 }
 0x590   : > { %v3923_v34 = vadd.f32 %v3922_v5, %v3761_v63  ;;  %v5192_v63 = vmul.f32 %v5191_v21, %v2087_v31 }
 0x5a6   : > { %v6805_v18 = vpop.f32.mrf.mxu1 }
 0x5a8   : > { %v4128_v49 = vpop.f32.mrf.mxu1 }
 0x5ae   : > { %v6770_v10 = vpop.f32.mrf.mxu0 }
 0x5af   : > { %v4040_v40 = vadd.f32 %v6770_v10, %v3929_v22  ;;  %v5245_v22 = vmul.f32 %v5243_v35, %v2088_v23  ;;  %v5255_v23 = vstv %s9383_s19  ;;  %s7386_s19 = smov [#allocation9]  }
 0x5b0   : > { %v4032_v54 = vpop.f32.mrf.mxu0 }
 0x5b1   : > { %v4033_v41 = vadd.f32 %v4032_v54, %v3923_v34  ;;  %v4137_v38 = vadd.f32 %v6805_v18, %v4040_v40  ;;  %v5244_v34 = vmul.f32 %v5243_v35, %v2087_v31 }
 0x5b3   : > { %v4129_v27 = vadd.f32 %v4128_v49, %v4033_v41 }
 0x5c8   : > { %v6875_v6 = vpop.f32.mrf.mxu1 }
 0x5ca   : > { %v4348_v29 = vpop.f32.mrf.mxu1 }
 0x5d0   : > { %v6840_v25 = vpop.f32.mrf.mxu0 }
 0x5d1   : > { %v4262_v0 = vadd.f32 %v6840_v25, %v4137_v38  ;;  %v5093_v25 = vstv %s9359_s11  ;;  %s9667_s11 = sshll.u32 %s7567_s6, 4 }
 0x5d2   : > { %v4255_v32 = vpop.f32.mrf.mxu0 }
 0x5d3   : > { %v4256_v14 = vadd.f32 %v4255_v32, %v4129_v27  ;;  %v4355_v47 = vadd.f32 %v6875_v6, %v4262_v0  ;;  %v5145_v32 = vstv %s9363_s15  ;;  %s400_s15 = scalar_lea.vmem [#allocation9], %s9667_s11 }
 0x5d4   : > { %s5300_s14 = sshll.u32 %s400_s15, 4  ;;  %s9456_s14 = int_to_ptr.vmem [resolvable:$true] %s5300_s14 }
 0x5d5   : > { %v4349_v51 = vadd.f32 %v4348_v29, %v4256_v14  ;;  %v5079_v56 = vmul.f32 %v5077_v43, %v4355_v47  ;;  %v5131_v12 = vmul.f32 %v5129_v16, %v4355_v47  ;;  %v5183_v10 = vmul.f32 %v5181_v1, %v4355_v47  ;;  %s7304_s9 = scalar_lea.vmem %s9456_s14, 256 }
 0x5d6   : > { %v5235_v5 = vmul.f32 %v5233_v17, %v4355_v47  ;;  %v5151_v14 = vstv %s9378_s24  ;;  %s9454_s24 = scalar_lea.hbm %s9507_s8, %s5507_s25  ;;  %p7305_p7 = scmp.ne.s32.totalorder %s9456_s14, %s7304_s9 }
 0x5d7   : > { %v5078_v54 = vmul.f32 %v5077_v43, %v4349_v51  ;;  %v5130_v49 = vmul.f32 %v5129_v16, %v4349_v51  ;;  %v5182_v40 = vmul.f32 %v5181_v1, %v4349_v51  ;;  %v5234_v41 = vmul.f32 %v5233_v17, %v4349_v51 }
 0x5d8   : > { %v5085_v6 = vadd.f32 %v5083_v36, %v5079_v56  ;;  %v5137_v27 = vadd.f32 %v5135_v48, %v5131_v12  ;;  %v5241_v29 = vadd.f32 %v5239_v3, %v5235_v5  ;;  %v5099_v16 = vstv %s9376_s26  ;;  %p7306_p13 = pnand %p7305_p7, %p9668_p9 }
 0x5d9   : > { %v5084_v0 = vadd.f32 %v5082_v44, %v5078_v54  ;;  %v5136_v9 = vadd.f32 %v5134_v4, %v5130_v49  ;;  %v5188_v46 = vadd.f32 %v5186_v7, %v5182_v40  ;;  %v5203_v36 = vstv %s9380_s21  ;;  %s5287_s21 = scalar_lea.sflag [#allocation4], %s7567_s6 }
 0x5da   : > { %v5143_v48 = vadd.f32 %v5141_v24, %v5137_v27  ;;  %v5247_v31 = vadd.f32 %v5245_v22, %v5241_v29  ;;  %p7307_p10 = pneg %p7306_p13 }
 0x5db   : > { %v5090_v47 = vadd.f32 %v5088_v13, %v5084_v0  ;;  %v5142_v51 = vadd.f32 %v5140_v60, %v5136_v9  ;;  %v5194_v4 = vadd.f32 %v5192_v63, %v5188_v46 }
 0x5ea   : > { %v6945_v11 = vpop.f32.mrf.mxu1 }
 0x5ec   : > { %v4637_v45 = vpop.f32.mrf.mxu1 }
 0x5f2   : > { %v6910_v57 = vpop.f32.mrf.mxu0 }
 0x5f3   : > { %v4487_v2 = vadd.f32 %v6910_v57, %v5475_v37 }
 0x5f4   : > { %v4476_v42 = vpop.f32.mrf.mxu0 }
 0x5f5   : > { %v4477_v53 = vadd.f32 %v5475_v37, %v4476_v42  ;;  %v4644_v33 = vadd.f32 %v6945_v11, %v4487_v2  ;;  %v5189_v37 = vadd.f32 %v5187_v26, %v5183_v10  ;;  %v5240_v11 = vadd.f32 %v5238_v30, %v5234_v41 }
 0x5f7   : > { %v4638_v28 = vadd.f32 %v4637_v45, %v4477_v53  ;;  %v5195_v26 = vadd.f32 %v5193_v55, %v5189_v37  ;;  %v5246_v7 = vadd.f32 %v5244_v34, %v5240_v11 }
 0x60c   : > { %v7015_v39 = vpop.f32.mrf.mxu1 }
 0x60e   : > { %v4843_v57 = vpop.f32.mrf.mxu1 }
 0x614   : > { %v6980_v20 = vpop.f32.mrf.mxu0 }
 0x615   : > { %v4755_v15 = vadd.f32 %v6980_v20, %v4644_v33  ;;  %v5091_v20 = vadd.f32 %v5089_v62, %v5085_v6 }
 0x616   : > { %v4747_v50 = vpop.f32.mrf.mxu0 }
 0x617   : > { %v4748_v18 = vadd.f32 %v4747_v50, %v4638_v28  ;;  %v4852_v38 = vadd.f32 %v7015_v39, %v4755_v15 }
 0x619   : > { %v4844_v42 = vadd.f32 %v4843_v57, %v4748_v18 }
 0x62e   : > { %v7085_v43 = vpop.f32.mrf.mxu1 }
 0x630   : > { %v5063_v44 = vpop.f32.mrf.mxu1 }
 0x635   : > { %v7050_v8 = vpop.f32.mrf.mxu0 }
 0x636   : > { %v4977_v61 = vadd.f32 %v7050_v8, %v4852_v38 }
 0x637   : > { %v4970_v2 = vpop.f32.mrf.mxu0 }
 0x638   : > { %v5070_v1 = vadd.f32 %v7085_v43, %v4977_v61  ;;  %v4971_v52 = vadd.f32 %v4970_v2, %v4844_v42 }
 0x63a   : > { %v5095_v53 = vmul.f32 %v5093_v25, %v5070_v1  ;;  %v5147_v19 = vmul.f32 %v5145_v32, %v5070_v1  ;;  %v5199_v21 = vmul.f32 %v5197_v58, %v5070_v1  ;;  %v5251_v17 = vmul.f32 %v5249_v59, %v5070_v1 }
 0x63b   : > { %v5064_v3 = vadd.f32 %v5063_v44, %v4971_v52 }
 0x63c   : > { %v5097_v30 = vadd.f32 %v5095_v53, %v5091_v20  ;;  %v5149_v45 = vadd.f32 %v5147_v19, %v5143_v48  ;;  %v5201_v33 = vadd.f32 %v5199_v21, %v5195_v26  ;;  %v5253_v50 = vadd.f32 %v5251_v17, %v5247_v31 }
 0x63d   : > { %v5094_v62 = vmul.f32 %v5093_v25, %v5064_v3  ;;  %v5146_v35 = vmul.f32 %v5145_v32, %v5064_v3  ;;  %v5198_v56 = vmul.f32 %v5197_v58, %v5064_v3  ;;  %v5250_v24 = vmul.f32 %v5249_v59, %v5064_v3 }
 0x63e   : > { %v9393_v55 = vadd.f32 %v5099_v16, %v5097_v30  ;;  %v9395_v13 = vadd.f32 %v5151_v14, %v5149_v45  ;;  %v9397_v39 = vadd.f32 %v5203_v36, %v5201_v33  ;;  %v9399_v15 = vadd.f32 %v5255_v23, %v5253_v50 }
 0x63f   : > { %v5096_v28 = vadd.f32 %v5094_v62, %v5090_v47  ;;  %v5148_v60 = vadd.f32 %v5146_v35, %v5142_v51  ;;  %v5200_v63 = vadd.f32 %v5198_v56, %v5194_v4  ;;  %v5252_v12 = vadd.f32 %v5250_v24, %v5246_v7 }
 0x640   : > { %v5104_v10 = vand.u32 2147483647, %v9393_v55  ;;  %v5156_v5 = vand.u32 2147483647, %v9395_v13  ;;  %v5208_v54 = vand.u32 2147483647, %v9397_v39  ;;  %v5123_v3 = vstv %s9417_s7 }
 0x641   : > { %v5260_v18 = vand.u32 2147483647, %v9399_v15  ;;  %v9405_v34 = vadd.f32 %v5099_v16, %v5096_v28  ;;  %v9407_v49 = vadd.f32 %v5151_v14, %v5148_v60  ;;  %v9409_v32 = vadd.f32 %v5203_v36, %v5200_v63  ;;  %s7308_s7 = sshll.u32 %s7386_s19, 4  ;;  %s7309_s7 = int_to_ptr.vmem [resolvable:$false] %s7308_s7 }
 0x642   : > { %v5106_v25 = vsub.f32 0.0, %v5104_v10  ;;  %v5158_v22 = vsub.f32 0.0, %v5156_v5  ;;  %v5210_v40 = vsub.f32 0.0, %v5208_v54  ;;  %v9411_v6 = vadd.f32 %v5255_v23, %v5252_v12  ;;  %p7311_p2 = scmp.lt.s32.totalorder %s9456_s14, %s7309_s7 }
 0x643   : > { %v5262_v41 = vsub.f32 0.0, %v5260_v18  ;;  %v5103_v58 = vand.u32 2147483647, %v9405_v34  ;;  %v5155_v29 = vand.u32 2147483647, %v9407_v49  ;;  %vm5112_vm12 = vcmp.ge.f32.partialorder %v9393_v55, 0.0 }
 0x644   : > { %v5109_v57 = vmul.f32 1.442695, %v5106_v25  ;;  %v5161_v38 = vmul.f32 1.442695, %v5158_v22  ;;  %v5213_v59 = vmul.f32 1.442695, %v5210_v40  ;;  %v5175_v7 = vstv %s9419_s18 }
 0x645   : > { %v5265_v27 = vmul.f32 1.442695, %v5262_v41  ;;  %v5105_v37 = vsub.f32 0.0, %v5103_v58  ;;  %v5207_v0 = vand.u32 2147483647, %v9409_v32  ;;  %v5157_v61 = vsub.f32 0.0, %v5155_v29 }
 0x646   : > { %7200 = vpow2.f32 %v5109_v57  ;;  %v5259_v8 = vand.u32 2147483647, %v9411_v6  ;;  %vm5164_vm13 = vcmp.ge.f32.partialorder %v9395_v13, 0.0  ;;  %v5227_v30 = vstv %s9421_s22  ;;  %s7310_s18 = scalar_lea.vmem %s7309_s7, 512 }
 0x647   : > { %7202 = vpow2.f32 %v5161_v38  ;;  %v5107_v43 = vmul.f32 1.442695, %v5105_v37  ;;  %v5209_v16 = vsub.f32 0.0, %v5207_v0  ;;  %v5159_v42 = vmul.f32 1.442695, %v5157_v61  ;;  %p7312_p3 = scmp.lt.s32.totalorder %s7310_s18, %s7304_s9 }
 0x648   : > { %7204 = vpow2.f32 %v5213_v59  ;;  %v5261_v14 = vsub.f32 0.0, %v5259_v8  ;;  %vm5216_vm14 = vcmp.ge.f32.partialorder %v9397_v39, 0.0  ;;  %v5074_v62 = vstv %s9423_s20 }
 0x649   : > { %7206 = vpow2.f32 %v5265_v27  ;;  %v5211_v9 = vmul.f32 1.442695, %v5209_v16  ;;  %vm5268_vm15 = vcmp.ge.f32.partialorder %v9399_v15, 0.0  ;;  %v5279_v28 = vstv %s9425_s13  ;;  %p7313_p12 = por %p7312_p3, %p7311_p2 }
 0x64a   : > { %7208 = vpow2.f32 %v5107_v43  ;;  %v5263_v46 = vmul.f32 1.442695, %v5261_v14  ;;  %vm5111_vm0 = vcmp.ge.f32.partialorder %v9405_v34, 0.0  ;;  %vm5163_vm1 = vcmp.ge.f32.partialorder %v9407_v49, 0.0 }
 0x64b   : > { %7210 = vpow2.f32 %v5159_v42  ;;  %vm5215_vm2 = vcmp.ge.f32.partialorder %v9409_v32, 0.0  ;;  %vm5267_vm3 = vcmp.ge.f32.partialorder %v9411_v6, 0.0  ;;  %p7314_p1 = pnand %p7313_p12, %p7307_p10 }
 0x64c   : > { %7212 = vpow2.f32 %v5211_v9 }
 0x64d   : > { %7214 = vpow2.f32 %v5263_v46 }
 0x653   : > { %v7201_v11 = vpop.eup %7200 }
 0x654   : > { %v7203_v36 = vpop.eup %7202  ;;  %v5116_v2 = vadd.f32 1.0, %v7201_v11  ;;  %v5114_v4 = vsel %vm5112_vm12, 1.0, %v7201_v11 }
 0x655   : > { %v7205_v1 = vpop.eup %7204  ;;  %v5168_v20 = vadd.f32 1.0, %v7203_v36  ;;  %v5166_v50 = vsel %vm5164_vm13, 1.0, %v7203_v36 }
 0x656   : > { %v7207_v23 = vpop.eup %7206  ;;  %7216 = vrcp.f32 %v5116_v2  ;;  %v5220_v52 = vadd.f32 1.0, %v7205_v1  ;;  %v5218_v24 = vsel %vm5216_vm14, 1.0, %v7205_v1 }
 0x657   : > { %v7209_v48 = vpop.eup %7208  ;;  %7218 = vrcp.f32 %v5168_v20  ;;  %v5272_v26 = vadd.f32 1.0, %v7207_v23  ;;  %v5270_v10 = vsel %vm5268_vm15, 1.0, %v7207_v23 }
 0x658   : > { %7220 = vrcp.f32 %v5220_v52  ;;  %v5115_v31 = vadd.f32 1.0, %v7209_v48  ;;  %v7211_v47 = vpop.eup %7210  ;;  %v5113_v18 = vsel %vm5111_vm0, 1.0, %v7209_v48 }
 0x659   : > { %7222 = vrcp.f32 %v5272_v26  ;;  %v7213_v44 = vpop.eup %7212  ;;  %v5167_v53 = vadd.f32 1.0, %v7211_v47  ;;  %v5165_v38 = vsel %vm5163_vm1, 1.0, %v7211_v47 }
 0x65a   : > { %7224 = vrcp.f32 %v5115_v31  ;;  %v7215_v19 = vpop.eup %7214  ;;  %v5219_v21 = vadd.f32 1.0, %v7213_v44 }
 0x65b   : > { %7226 = vrcp.f32 %v5167_v53  ;;  %v5271_v17 = vadd.f32 1.0, %v7215_v19 }
 0x65c   : > { %7228 = vrcp.f32 %v5219_v21 }
 0x65d   : > { %7230 = vrcp.f32 %v5271_v17 }
 0x663   : > { %v7217_v51 = vpop.eup %7216 }
 0x664   : > { %v7219_v45 = vpop.eup %7218  ;;  %v5120_v33 = vmul.f32 %v7217_v51, %v5114_v4 }
 0x665   : > { %v7221_v35 = vpop.eup %7220  ;;  %v5172_v56 = vmul.f32 %v7219_v45, %v5166_v50 }
 0x666   : > { %v7223_v60 = vpop.eup %7222  ;;  %v5122_v63 = vmul.f32 %v5120_v33, %v9393_v55  ;;  %v5224_v12 = vmul.f32 %v7221_v35, %v5218_v24  ;;  %v5217_v55 = vsel %vm5215_vm2, 1.0, %v7213_v44 }
 0x667   : > { %v7225_v5 = vpop.eup %7224  ;;  %v5174_v54 = vmul.f32 %v5172_v56, %v9395_v13  ;;  %v5276_v25 = vmul.f32 %v7223_v60, %v5270_v10 }
 0x668   : > { %v5125_v22 = vmul.f32 %v5123_v3, %v5122_v63  ;;  %v5226_v40 = vmul.f32 %v5224_v12, %v9397_v39  ;;  %v5118_v41 = vmul.f32 %v7225_v5, %v5113_v18  ;;  %v7227_v57 = vpop.eup %7226  ;;  %v5269_v39 = vsel %vm5267_vm3, 1.0, %v7215_v19 }
 0x669   : > { %v5278_v58 = vmul.f32 %v5276_v25, %v9399_v15  ;;  %v7229_v59 = vpop.eup %7228  ;;  %v5170_v27 = vmul.f32 %v7227_v57, %v5165_v38  ;;  %v5177_v29 = vmul.f32 %v5175_v7, %v5174_v54 }
 0x66a   : > { %v5121_v13 = vmul.f32 %v5118_v41, %v9405_v34  ;;  %v5127_v37 = vadd.f32 %v5125_v22, %v5074_v62  ;;  %v7231_v0 = vpop.eup %7230  ;;  %v5222_v8 = vmul.f32 %v7229_v59, %v5217_v55  ;;  %v5229_v43 = vmul.f32 %v5227_v30, %v5226_v40 }
 0x66b   : > { %v5173_v16 = vmul.f32 %v5170_v27, %v9407_v49  ;;  %v5274_v42 = vmul.f32 %v7231_v0, %v5269_v39  ;;  %v5281_v15 = vmul.f32 %v5279_v28, %v5278_v58 }
 0x66c   : > { %v5124_v61 = vmul.f32 %v5123_v3, %v5121_v13  ;;  %v5179_v14 = vadd.f32 %v5177_v29, %v5127_v37  ;;  %v5225_v9 = vmul.f32 %v5222_v8, %v9409_v32 }
 0x66d   : > { %v5176_v11 = vmul.f32 %v5175_v7, %v5173_v16  ;;  %v5277_v36 = vmul.f32 %v5274_v42, %v9411_v6 }
 0x66e   : > { %v5126_v46 = vadd.f32 %v5124_v61, %v5074_v62  ;;  %v5231_v34 = vadd.f32 %v5229_v43, %v5179_v14  ;;  %v5228_v1 = vmul.f32 %v5227_v30, %v5225_v9 }
 0x66f   : > { %v5280_v23 = vmul.f32 %v5279_v28, %v5277_v36 }
 0x670   : > { %v5178_v2 = vadd.f32 %v5176_v11, %v5126_v46  ;;  %v5283_v20 = vadd.f32 %v5281_v15, %v5231_v34 }
 0x672   : > { %v5230_v49 = vadd.f32 %v5228_v1, %v5178_v2  ;;  %5285 = vst [vmem:[%s400_s15 + $0x8] sm:$0xff] %v5283_v20 }
 0x674   : > { %v5282_v32 = vadd.f32 %v5280_v23, %v5230_v49 }
 0x676   : > { %5284 = vst [vmem:[%s400_s15] sm:$0xff] %v5282_v32 }
 0x677   : > { %7317 = shalt.err (!%p7314_p1)
}
 0x678   : > { %s7318_s22 = scalar_lea.hbm %s9454_s24, 256  ;;  %s7322_s25 = scalar_lea.hbm %s9507_s8, 512 }
 0x679   : > { %p7319_p4 = scmp.ne.s32.totalorder %s9454_s24, %s7318_s22  ;;  %p7323_p0 = scmp.lt.s32.totalorder %s9454_s24, %s9507_s8 }
 0x67a   : > { %p7324_p11 = scmp.lt.s32.totalorder %s7322_s25, %s7318_s22 }
 0x67b   : > { %p7320_p6 = pnand %p7319_p4, %p9668_p9 }
 0x67c   : > { %p7325_p5 = por %p7324_p11, %p7323_p0 }
 0x67d   : > { %p7321_p8 = pneg %p7320_p6 }
 0x67f   : > { %p7326_p7 = pnand %p7325_p5, %p7321_p8 }
 0x681   : > { %7329 = shalt.err (!%p7326_p7)
}
 0x682   : > { %s7387_s23 = smov 128   ;;  %s7388_s26 = smov 8  }
 0x683   : > { %7096 = dma.vmem_to_hbm [thread:$0]  (%p9668_p9), %s9456_s14, 256, %s9454_s24, %s5287_s21, %s7387_s23, %s7387_s23, %s7388_s26  }
 0x684 PF: > { %s5315_s9 = sand.u32 1, %s7364_s27   ;;  %p9669_p13 = scmp.ne.s32.totalorder %s9584_s12, 0 }
 0x685   : > { %p9670_p10 = scmp.ge.s32.totalorder %s7376_s30, 2  ;;  %s5316_s19 = scalar_lea.sflag [#allocation4], %s5315_s9 }
 0x687   : > { %p7110_p2 = pnand %p9670_p10, %p9669_p13 }
 0x689   : > { %p7111_p3 = pneg %p7110_p2 }
 0x68b   : > { %7359 = dma.done.wait (%p7111_p3), %s5316_s19, 256  }
 0x68c   : > { %7361 = vsyncadd (%p7111_p3), %s5316_s19, 4294967040  ;;  %p23_p12 = scmp.ge.s32.totalorder %s7509_s10, 4   ;;  %s9671_s27 = smov %s7368_s28 }
 0x68d   : > { %s9672_s28 = smov %s7372_s29  ;;  %s9673_s29 = smov %s7525_s17 }
 0x68e   : > { %s9674_s30 = smov %s7509_s10  ;;  %25 = sbr.rel (!%p23_p12) target bundleno = 10 (0xa), region = 115 }
 0x693   :  { %5321 = vsyncpa [#allocation3], 1 }
 0x694   :  { %5323 = vsyncpa [#allocation3 + $0x1], 1 }
 0x695   :  { %5324 = vsyncpa [#allocation7], 1 }
 0x696   :  { %5325 = vsyncpa [#allocation4], 1 }
 0x697   :  { %5327 = vsyncpa [#allocation4 + $0x1], 1 }
 0x698   :  { %5328 = vsyncpa [#allocation5], 1 }
 0x699   :  { %5330 = vsyncpa [#allocation5 + $0x1], 1 }

</bundles_post_ra>
